<compile_context>
chip_gen: v7x
topology: tpu7x:2x2x1
jax: 0.10.0
libtpu: 0.0.40
codegen_flags: <defaults>
</compile_context>

<pallas_src>
import functools

import jax
import jax.numpy as jnp
from jax.experimental import pallas as pl
from jax.experimental.pallas import tpu as pltpu


# ----------------------------------------------------------------------------
# Fused kernel: attention -> softmax -> context -> GRU cell -> fc -> fc2
# ----------------------------------------------------------------------------
def _gru_decoder_attention_kernel(
        x_ref, h_ref, enc_ref, wh_ref, wx_ref, b_ref,
        out_ref, hrep_ref, lg_ref, *, apply_relu):
    f32 = jnp.float32
    B, H = h_ref.shape
    SB = enc_ref.shape[0]
    S = SB // B

    x = x_ref[...]                                       # (B, O)
    h = h_ref[...]                                       # (B, H)
    v = b_ref[:, 9 * H:10 * H]                           # (1, H)

    # ---- fused matmuls for weights sharing an LHS (biases folded in) -------
    # h_combo = [ h @ wa_h + ba | h @ whh + bhh ]        (B, 4H)
    h_combo = (jnp.dot(h, wh_ref[:, 0:4 * H], preferred_element_type=f32)
               + b_ref[:, 0:4 * H])
    # x_combo = [ x @ wih_x + bih | x @ wfc_x + bfc ]    (B, 4H)
    x_combo = (jnp.dot(x, wx_ref[...], preferred_element_type=f32)
               + b_ref[:, 4 * H:8 * H])
    h_part = h_combo[:, 0:H]                             # attention hidden term
    gh = h_combo[:, H:4 * H]                             # GRU hidden gates
    gi_x = x_combo[:, 0:3 * H]                           # GRU input gates (x part)
    fx = x_combo[:, 3 * H:4 * H]                         # fc (x part)

    # ---- attention: ONE matmul / tanh / lane-reduce over all S positions ---
    enc_proj = jnp.dot(enc_ref[...], wh_ref[:, 4 * H:5 * H],
                       preferred_element_type=f32)       # (S*B, H)
    for s in range(S):                                   # broadcast h_part
        hrep_ref[s * B:(s + 1) * B, :] = h_part
    energy_v = jnp.tanh(enc_proj + hrep_ref[...]) * v    # one tanh pass
    lg_ref[...] = jnp.sum(energy_v, axis=-1, keepdims=True)   # (S*B, 1)

    # softmax over the S source positions (per-batch-row, s-major row blocks)
    ls = [lg_ref[s * B:(s + 1) * B, :] for s in range(S)]     # each (B, 1)
    m = ls[0]
    for s in range(1, S):
        m = jnp.maximum(m, ls[s])
    es = [jnp.exp(l - m) for l in ls]
    denom = es[0]
    for s in range(1, S):
        denom = denom + es[s]
    inv = 1.0 / denom
    ps = [e * inv for e in es]                           # attention weights (B,1)

    # attention-weighted context: weighted[b] = sum_s a[b,s] * enc[s,b]
    weighted = ps[0] * enc_ref[0:B, :]
    for s in range(1, S):
        weighted = weighted + ps[s] * enc_ref[s * B:(s + 1) * B, :]   # (B, H)

    # ---- GRU cell (single time step), gates packed [r | z | n] -------------
    # w_combo = [ weighted @ wih_w | weighted @ wfc_w ]  (B, 4H)
    w_combo = jnp.dot(weighted, wh_ref[:, 5 * H:9 * H],
                      preferred_element_type=f32)
    gi = gi_x + w_combo[:, 0:3 * H]
    fw = w_combo[:, 3 * H:4 * H]
    r = jax.nn.sigmoid(gi[:, 0:H] + gh[:, 0:H])
    z = jax.nn.sigmoid(gi[:, H:2 * H] + gh[:, H:2 * H])
    n = jnp.tanh(gi[:, 2 * H:3 * H] + r * gh[:, 2 * H:3 * H])
    h_new = (1.0 - z) * n + z * h                        # (B, H)

    # ---- head: fc(cat([h_new, weighted, x])) ; fc2 --------------------------
    f1 = (jnp.dot(h_new, wh_ref[:, 9 * H:10 * H], preferred_element_type=f32)
          + fw + fx)                                     # (B, H)
    if apply_relu:
        f1 = jnp.maximum(f1, 0.0)
    out_pad = (jnp.dot(f1, wh_ref[:, 10 * H:11 * H], preferred_element_type=f32)
               + b_ref[:, 8 * H:9 * H])                  # (B, H); first O valid

    # ---- packed lane-dense output slab: [h_new | out_pad | a_pad] ----------
    out_ref[:, 0:H] = h_new
    out_ref[:, H:2 * H] = out_pad
    out_ref[:, 2 * H:3 * H] = jnp.zeros((B, H), f32)
    for s in range(S):
        out_ref[:, 2 * H + s:2 * H + s + 1] = ps[s]


# ----------------------------------------------------------------------------
# Wrapper
# ----------------------------------------------------------------------------
def gru_decoder_attention_forward(x, hidden, encoder_outputs, kparams,
                                  activation="None"):
    """x: (B, 1, O), hidden: (B, H), encoder_outputs: (S, B, H) (PyTorch layouts)."""
    B, _, O = x.shape
    S = encoder_outputs.shape[0]
    H = hidden.shape[1]
    x2d = x[:, 0, :]                     # == x.permute(1,0,2).squeeze(0) (seq len 1)
    enc_flat = encoder_outputs.reshape(S * B, H)   # free reshape of contiguous (S,B,H)

    def vmem():
        return pl.BlockSpec(memory_space=pltpu.MemorySpace.VMEM)

    out_slab = pl.pallas_call(
        functools.partial(_gru_decoder_attention_kernel,
                          apply_relu=(activation == "relu")),
        out_shape=jax.ShapeDtypeStruct((B, 3 * H), jnp.float32),
        in_specs=[vmem() for _ in range(6)],
        out_specs=vmem(),
        scratch_shapes=[pltpu.VMEM((S * B, H), jnp.float32),   # h_part broadcast
                        pltpu.VMEM((S * B, 1), jnp.float32)],  # attention logits
    )(x2d, hidden, enc_flat, kparams["w_h"], kparams["w_x"], kparams["b"])

    h_new = out_slab[:, 0:H]
    out = out_slab[:, H:H + O]
    a = out_slab[:, 2 * H:2 * H + S]
    return out, h_new, a


# ----------------------------------------------------------------------------
# Parameters (PyTorch layout) and their one-time conversion to packed slabs
# ----------------------------------------------------------------------------
def init_params(key, hidden_dim, output_dim):
    H, O = hidden_dim, output_dim
    ks = iter(jax.random.split(key, 11))

    def u(k, shape, fan_in):
        b = 1.0 / float(fan_in) ** 0.5
        return jax.random.uniform(k, shape, jnp.float32, -b, b)

    p = {}
    p["attn_fc_w"] = u(next(ks), (H, 2 * H), 2 * H)       # Linear(2H, H)
    p["attn_fc_b"] = u(next(ks), (H,), 2 * H)
    p["v_fc_w"] = u(next(ks), (1, H), H)                  # Linear(H, 1, bias=False)
    p["gru_w_ih"] = u(next(ks), (3 * H, O + H), H)        # GRU(O+H, H)
    p["gru_w_hh"] = u(next(ks), (3 * H, H), H)
    p["gru_b_ih"] = u(next(ks), (3 * H,), H)
    p["gru_b_hh"] = u(next(ks), (3 * H,), H)
    p["fc_w"] = u(next(ks), (H, 2 * H + O), 2 * H + O)    # Linear(2H+O, H)
    p["fc_b"] = u(next(ks), (H,), 2 * H + O)
    p["fc2_w"] = u(next(ks), (O, H), H)                   # Linear(H, O)
    p["fc2_b"] = u(next(ks), (O,), H)
    return p


def prepare_kernel_params(p, hidden_dim, output_dim):
    """Split / transpose / pack PyTorch-layout weights once into 3 slabs.

    w_h (H, 11H): [wa_h | whh | wa_e | wih_w | wfc_w | wfc_o | wfc2_pad]
    w_x (O,  4H): [wih_x | wfc_x]
    b   (1, 10H): [ba | bhh | bih | bfc | bfc2_pad | v]
    # TODO(synk): store the slabs in bf16 on v6e/v7x (keep f32 accumulation).
    """
    H, O = hidden_dim, output_dim
    wa_h = p["attn_fc_w"][:, :H].T                        # (H, H)
    wa_e = p["attn_fc_w"][:, H:].T                        # (H, H)
    whh = p["gru_w_hh"].T                                 # (H, 3H)
    wih_w = p["gru_w_ih"][:, O:].T                        # (H, 3H)
    wfc_w = p["fc_w"][:, H:2 * H].T                       # (H, H)
    wfc_o = p["fc_w"][:, :H].T                            # (H, H)
    wfc2_pad = jnp.pad(p["fc2_w"].T, ((0, 0), (0, H - O)))    # (H, H)
    w_h = jnp.concatenate(
        [wa_h, whh, wa_e, wih_w, wfc_w, wfc_o, wfc2_pad], axis=1)   # (H, 11H)

    wih_x = p["gru_w_ih"][:, :O].T                        # (O, 3H)
    wfc_x = p["fc_w"][:, 2 * H:].T                        # (O, H)
    w_x = jnp.concatenate([wih_x, wfc_x], axis=1)         # (O, 4H)

    b = jnp.concatenate([
        p["attn_fc_b"],                  # ba        (H)
        p["gru_b_hh"],                   # bhh       (3H)
        p["gru_b_ih"],                   # bih       (3H)
        p["fc_b"],                       # bfc       (H)
        jnp.pad(p["fc2_b"], (0, H - O)), # bfc2 pad  (H)
        p["v_fc_w"].reshape(H),          # v         (H)
    ]).reshape(1, 10 * H)

    return {"w_h": w_h.astype(jnp.float32),
            "w_x": w_x.astype(jnp.float32),
            "b": b.astype(jnp.float32)}


# ----------------------------------------------------------------------------
# Pure-JAX reference mirroring the PyTorch module exactly
# ----------------------------------------------------------------------------
def reference_forward(x, hidden, encoder_outputs, p, activation="None"):
    H = hidden.shape[1]
    S = encoder_outputs.shape[0]
    x_t = jnp.transpose(x, (1, 0, 2))                    # (1, B, O)
    hid_rep = jnp.repeat(hidden[:, None, :], S, axis=1)  # (B, S, H)
    enc = jnp.transpose(encoder_outputs, (1, 0, 2))      # (B, S, H)
    energy = jnp.tanh(
        jnp.concatenate([hid_rep, enc], axis=2) @ p["attn_fc_w"].T + p["attn_fc_b"])
    attention = jnp.squeeze(energy @ p["v_fc_w"].T, axis=2)    # (B, S)
    a = jax.nn.softmax(attention, axis=1)
    weighted = jnp.einsum("bs,bsh->bh", a, enc)
    x2 = x_t[0]                                          # (B, O)
    xc = jnp.concatenate([x2, weighted], axis=1)         # (B, O+H)
    gi = xc @ p["gru_w_ih"].T + p["gru_b_ih"]
    gh = hidden @ p["gru_w_hh"].T + p["gru_b_hh"]
    r = jax.nn.sigmoid(gi[:, :H] + gh[:, :H])
    z = jax.nn.sigmoid(gi[:, H:2 * H] + gh[:, H:2 * H])
    n = jnp.tanh(gi[:, 2 * H:] + r * gh[:, 2 * H:])
    h_new = (1.0 - z) * n + z * hidden
    cat = jnp.concatenate([h_new, weighted, x2], axis=1)
    o = cat @ p["fc_w"].T + p["fc_b"]
    if activation == "relu":
        o = jax.nn.relu(o)
    o = o @ p["fc2_w"].T + p["fc2_b"]
    return o, h_new, a


# ----------------------------------------------------------------------------
if __name__ == "__main__":
    jax.config.update("jax_default_matmul_precision", "highest")

    key = jax.random.PRNGKey(0)
    k_param, k_x, k_h, k_e = jax.random.split(key, 4)

    # S=5 and H=128 are fixed by the module's own shape assertion; O=8 decoder output.
    B, S, H, O = 2, 5, 128, 8
    params = init_params(k_param, H, O)
    kparams = prepare_kernel_params(params, H, O)

    x = jax.random.normal(k_x, (B, 1, O), jnp.float32)            # decoder input step
    hidden = jax.random.normal(k_h, (B, H), jnp.float32)          # previous hidden
    encoder_outputs = jax.random.normal(k_e, (S, B, H), jnp.float32)

    out, h_new, a = gru_decoder_attention_forward(x, hidden, encoder_outputs, kparams)
    out, h_new, a = jax.block_until_ready((out, h_new, a))

    assert out.shape == (B, O) and h_new.shape == (B, H) and a.shape == (B, S)

    ref_out, ref_h, ref_a = jax.block_until_ready(
        reference_forward(x, hidden, encoder_outputs, params))

    for got, ref in ((out, ref_out), (h_new, ref_h), (a, ref_a)):
        err = float(jnp.max(jnp.abs(got - ref)))
        assert jnp.allclose(got, ref, rtol=2e-3, atol=2e-3), err

    print("KERNEL_OK")
</pallas_src>

<mosaic_0001>
module attributes {stable_mosaic.version = 11 : i64} {
  func.func @_gru_decoder_attention_kernel(%arg0: memref<2x8xf32, #tpu.memory_space<vmem>>, %arg1: memref<2x128xf32, #tpu.memory_space<vmem>>, %arg2: memref<10x128xf32, #tpu.memory_space<vmem>>, %arg3: memref<128x1408xf32, #tpu.memory_space<vmem>>, %arg4: memref<8x512xf32, #tpu.memory_space<vmem>>, %arg5: memref<1x1280xf32, #tpu.memory_space<vmem>>, %arg6: memref<2x384xf32, #tpu.memory_space<vmem>>, %arg7: memref<10x128xf32, #tpu.memory_space<vmem>>, %arg8: memref<10x1xf32, #tpu.memory_space<vmem>>) attributes {dimension_semantics = [], scalar_prefetch = 0 : i64, scratch_operands = 2 : i64, tpu.core_type = #tpu.core_type<tc>} {
    %c0 = arith.constant 0 : index
    %c0_0 = arith.constant 0 : index
    %0 = vector.load %arg0[%c0, %c0_0] : memref<2x8xf32, #tpu.memory_space<vmem>>, vector<2x8xf32>
    %c0_1 = arith.constant 0 : index
    %c0_2 = arith.constant 0 : index
    %1 = vector.load %arg1[%c0_1, %c0_2] : memref<2x128xf32, #tpu.memory_space<vmem>>, vector<2x128xf32>
    %c0_3 = arith.constant 0 : index
    %c1152 = arith.constant 1152 : index
    %2 = vector.load %arg5[%c0_3, %c1152] : memref<1x1280xf32, #tpu.memory_space<vmem>>, vector<1x128xf32>
    %c0_4 = arith.constant 0 : index
    %c0_5 = arith.constant 0 : index
    %3 = vector.load %arg3[%c0_4, %c0_5] : memref<128x1408xf32, #tpu.memory_space<vmem>>, vector<128x512xf32>
    %cst = arith.constant dense<0.000000e+00> : vector<2x512xf32>
    %4 = tpu.matmul %1, %3, %cst {dimension_numbers = #tpu.dot_dimension_numbers<[1], [0], [0], [1], [0, 0, 1, 1], [], []>, precision = #tpu.contract_precision<fp32>} : vector<2x128xf32>, vector<128x512xf32>, vector<2x512xf32> -> vector<2x512xf32>
    %c0_6 = arith.constant 0 : index
    %c0_7 = arith.constant 0 : index
    %5 = vector.load %arg5[%c0_6, %c0_7] : memref<1x1280xf32, #tpu.memory_space<vmem>>, vector<1x512xf32>
    %6 = vector.broadcast %5 : vector<1x512xf32> to vector<2x512xf32>
    %7 = arith.addf %4, %6 : vector<2x512xf32>
    %c0_8 = arith.constant 0 : index
    %c0_9 = arith.constant 0 : index
    %8 = vector.load %arg4[%c0_8, %c0_9] : memref<8x512xf32, #tpu.memory_space<vmem>>, vector<8x512xf32>
    %cst_10 = arith.constant dense<0.000000e+00> : vector<2x512xf32>
    %9 = tpu.matmul %0, %8, %cst_10 {dimension_numbers = #tpu.dot_dimension_numbers<[1], [0], [0], [1], [0, 0, 1, 1], [], []>, precision = #tpu.contract_precision<fp32>} : vector<2x8xf32>, vector<8x512xf32>, vector<2x512xf32> -> vector<2x512xf32>
    %c0_11 = arith.constant 0 : index
    %c512 = arith.constant 512 : index
    %10 = vector.load %arg5[%c0_11, %c512] : memref<1x1280xf32, #tpu.memory_space<vmem>>, vector<1x512xf32>
    %11 = vector.broadcast %10 : vector<1x512xf32> to vector<2x512xf32>
    %12 = arith.addf %9, %11 : vector<2x512xf32>
    %13 = vector.extract_strided_slice %7 {offsets = [0, 0], sizes = [2, 128], strides = [1, 1]} : vector<2x512xf32> to vector<2x128xf32>
    %14 = vector.extract_strided_slice %7 {offsets = [0, 128], sizes = [2, 384], strides = [1, 1]} : vector<2x512xf32> to vector<2x384xf32>
    %15 = vector.extract_strided_slice %12 {offsets = [0, 0], sizes = [2, 384], strides = [1, 1]} : vector<2x512xf32> to vector<2x384xf32>
    %16 = vector.extract_strided_slice %12 {offsets = [0, 384], sizes = [2, 128], strides = [1, 1]} : vector<2x512xf32> to vector<2x128xf32>
    %c0_12 = arith.constant 0 : index
    %c0_13 = arith.constant 0 : index
    %17 = vector.load %arg2[%c0_12, %c0_13] : memref<10x128xf32, #tpu.memory_space<vmem>>, vector<10x128xf32>
    %c0_14 = arith.constant 0 : index
    %c512_15 = arith.constant 512 : index
    %18 = vector.load %arg3[%c0_14, %c512_15] : memref<128x1408xf32, #tpu.memory_space<vmem>>, vector<128x128xf32>
    %cst_16 = arith.constant dense<0.000000e+00> : vector<10x128xf32>
    %19 = tpu.matmul %17, %18, %cst_16 {dimension_numbers = #tpu.dot_dimension_numbers<[1], [0], [0], [1], [0, 0, 1, 1], [], []>, precision = #tpu.contract_precision<fp32>} : vector<10x128xf32>, vector<128x128xf32>, vector<10x128xf32> -> vector<10x128xf32>
    %c0_17 = arith.constant 0 : index
    %c0_18 = arith.constant 0 : index
    %20 = vector.load %arg7[%c0_17, %c0_18] : memref<10x128xf32, #tpu.memory_space<vmem>>, vector<2x128xf32>
    tpu.vector_store %arg7[%c0_17, %c0_18], %13 {strides = array<i32>} : memref<10x128xf32, #tpu.memory_space<vmem>>, vector<2x128xf32>,
    %c2 = arith.constant 2 : index
    %c0_19 = arith.constant 0 : index
    %21 = vector.load %arg7[%c2, %c0_19] : memref<10x128xf32, #tpu.memory_space<vmem>>, vector<2x128xf32>
    tpu.vector_store %arg7[%c2, %c0_19], %13 {strides = array<i32>} : memref<10x128xf32, #tpu.memory_space<vmem>>, vector<2x128xf32>,
    %c4 = arith.constant 4 : index
    %c0_20 = arith.constant 0 : index
    %22 = vector.load %arg7[%c4, %c0_20] : memref<10x128xf32, #tpu.memory_space<vmem>>, vector<2x128xf32>
    tpu.vector_store %arg7[%c4, %c0_20], %13 {strides = array<i32>} : memref<10x128xf32, #tpu.memory_space<vmem>>, vector<2x128xf32>,
    %c6 = arith.constant 6 : index
    %c0_21 = arith.constant 0 : index
    %23 = vector.load %arg7[%c6, %c0_21] : memref<10x128xf32, #tpu.memory_space<vmem>>, vector<2x128xf32>
    tpu.vector_store %arg7[%c6, %c0_21], %13 {strides = array<i32>} : memref<10x128xf32, #tpu.memory_space<vmem>>, vector<2x128xf32>,
    %c8 = arith.constant 8 : index
    %c0_22 = arith.constant 0 : index
    %24 = vector.load %arg7[%c8, %c0_22] : memref<10x128xf32, #tpu.memory_space<vmem>>, vector<2x128xf32>
    tpu.vector_store %arg7[%c8, %c0_22], %13 {strides = array<i32>} : memref<10x128xf32, #tpu.memory_space<vmem>>, vector<2x128xf32>,
    %c0_23 = arith.constant 0 : index
    %c0_24 = arith.constant 0 : index
    %25 = vector.load %arg7[%c0_23, %c0_24] : memref<10x128xf32, #tpu.memory_space<vmem>>, vector<10x128xf32>
    %26 = arith.addf %19, %25 : vector<10x128xf32>
    %27 = math.tanh %26 : vector<10x128xf32>
    %28 = vector.broadcast %2 : vector<1x128xf32> to vector<10x128xf32>
    %29 = arith.mulf %27, %28 : vector<10x128xf32>
    %cst_25 = arith.constant dense<0.000000e+00> : vector<10xf32>
    %30 = vector.multi_reduction <add>, %29, %cst_25 [1] : vector<10x128xf32> to vector<10xf32>
    %31 = vector.shape_cast %30 : vector<10xf32> to vector<10x1xf32>
    %c0_26 = arith.constant 0 : index
    %c0_27 = arith.constant 0 : index
    %32 = vector.load %arg8[%c0_26, %c0_27] : memref<10x1xf32, #tpu.memory_space<vmem>>, vector<10x1xf32>
    tpu.vector_store %arg8[%c0_26, %c0_27], %31 {strides = array<i32>} : memref<10x1xf32, #tpu.memory_space<vmem>>, vector<10x1xf32>,
    %c0_28 = arith.constant 0 : index
    %c0_29 = arith.constant 0 : index
    %33 = vector.load %arg8[%c0_28, %c0_29] : memref<10x1xf32, #tpu.memory_space<vmem>>, vector<2x1xf32>
    %c2_30 = arith.constant 2 : index
    %c0_31 = arith.constant 0 : index
    %34 = vector.load %arg8[%c2_30, %c0_31] : memref<10x1xf32, #tpu.memory_space<vmem>>, vector<2x1xf32>
    %c4_32 = arith.constant 4 : index
    %c0_33 = arith.constant 0 : index
    %35 = vector.load %arg8[%c4_32, %c0_33] : memref<10x1xf32, #tpu.memory_space<vmem>>, vector<2x1xf32>
    %c6_34 = arith.constant 6 : index
    %c0_35 = arith.constant 0 : index
    %36 = vector.load %arg8[%c6_34, %c0_35] : memref<10x1xf32, #tpu.memory_space<vmem>>, vector<2x1xf32>
    %c8_36 = arith.constant 8 : index
    %c0_37 = arith.constant 0 : index
    %37 = vector.load %arg8[%c8_36, %c0_37] : memref<10x1xf32, #tpu.memory_space<vmem>>, vector<2x1xf32>
    %38 = arith.maximumf %33, %34 : vector<2x1xf32>
    %39 = arith.maximumf %38, %35 : vector<2x1xf32>
    %40 = arith.maximumf %39, %36 : vector<2x1xf32>
    %41 = arith.maximumf %40, %37 : vector<2x1xf32>
    %42 = arith.subf %33, %41 : vector<2x1xf32>
    %43 = math.exp %42 : vector<2x1xf32>
    %44 = arith.subf %34, %41 : vector<2x1xf32>
    %45 = math.exp %44 : vector<2x1xf32>
    %46 = arith.subf %35, %41 : vector<2x1xf32>
    %47 = math.exp %46 : vector<2x1xf32>
    %48 = arith.subf %36, %41 : vector<2x1xf32>
    %49 = math.exp %48 : vector<2x1xf32>
    %50 = arith.subf %37, %41 : vector<2x1xf32>
    %51 = math.exp %50 : vector<2x1xf32>
    %52 = arith.addf %43, %45 : vector<2x1xf32>
    %53 = arith.addf %52, %47 : vector<2x1xf32>
    %54 = arith.addf %53, %49 : vector<2x1xf32>
    %55 = arith.addf %54, %51 : vector<2x1xf32>
    %cst_38 = arith.constant 1.000000e+00 : f32
    %56 = vector.broadcast %cst_38 : f32 to vector<2x1xf32>
    %57 = arith.divf %56, %55 : vector<2x1xf32>
    %58 = arith.mulf %43, %57 : vector<2x1xf32>
    %59 = arith.mulf %45, %57 : vector<2x1xf32>
    %60 = arith.mulf %47, %57 : vector<2x1xf32>
    %61 = arith.mulf %49, %57 : vector<2x1xf32>
    %62 = arith.mulf %51, %57 : vector<2x1xf32>
    %c0_39 = arith.constant 0 : index
    %c0_40 = arith.constant 0 : index
    %63 = vector.load %arg2[%c0_39, %c0_40] : memref<10x128xf32, #tpu.memory_space<vmem>>, vector<2x128xf32>
    %64 = vector.broadcast %58 : vector<2x1xf32> to vector<2x128xf32>
    %65 = arith.mulf %64, %63 : vector<2x128xf32>
    %c2_41 = arith.constant 2 : index
    %c0_42 = arith.constant 0 : index
    %66 = vector.load %arg2[%c2_41, %c0_42] : memref<10x128xf32, #tpu.memory_space<vmem>>, vector<2x128xf32>
    %67 = vector.broadcast %59 : vector<2x1xf32> to vector<2x128xf32>
    %68 = arith.mulf %67, %66 : vector<2x128xf32>
    %69 = arith.addf %65, %68 : vector<2x128xf32>
    %c4_43 = arith.constant 4 : index
    %c0_44 = arith.constant 0 : index
    %70 = vector.load %arg2[%c4_43, %c0_44] : memref<10x128xf32, #tpu.memory_space<vmem>>, vector<2x128xf32>
    %71 = vector.broadcast %60 : vector<2x1xf32> to vector<2x128xf32>
    %72 = arith.mulf %71, %70 : vector<2x128xf32>
    %73 = arith.addf %69, %72 : vector<2x128xf32>
    %c6_45 = arith.constant 6 : index
    %c0_46 = arith.constant 0 : index
    %74 = vector.load %arg2[%c6_45, %c0_46] : memref<10x128xf32, #tpu.memory_space<vmem>>, vector<2x128xf32>
    %75 = vector.broadcast %61 : vector<2x1xf32> to vector<2x128xf32>
    %76 = arith.mulf %75, %74 : vector<2x128xf32>
    %77 = arith.addf %73, %76 : vector<2x128xf32>
    %c8_47 = arith.constant 8 : index
    %c0_48 = arith.constant 0 : index
    %78 = vector.load %arg2[%c8_47, %c0_48] : memref<10x128xf32, #tpu.memory_space<vmem>>, vector<2x128xf32>
    %79 = vector.broadcast %62 : vector<2x1xf32> to vector<2x128xf32>
    %80 = arith.mulf %79, %78 : vector<2x128xf32>
    %81 = arith.addf %77, %80 : vector<2x128xf32>
    %c0_49 = arith.constant 0 : index
    %c640 = arith.constant 640 : index
    %82 = vector.load %arg3[%c0_49, %c640] : memref<128x1408xf32, #tpu.memory_space<vmem>>, vector<128x512xf32>
    %cst_50 = arith.constant dense<0.000000e+00> : vector<2x512xf32>
    %83 = tpu.matmul %81, %82, %cst_50 {dimension_numbers = #tpu.dot_dimension_numbers<[1], [0], [0], [1], [0, 0, 1, 1], [], []>, precision = #tpu.contract_precision<fp32>} : vector<2x128xf32>, vector<128x512xf32>, vector<2x512xf32> -> vector<2x512xf32>
    %84 = vector.extract_strided_slice %83 {offsets = [0, 0], sizes = [2, 384], strides = [1, 1]} : vector<2x512xf32> to vector<2x384xf32>
    %85 = arith.addf %15, %84 : vector<2x384xf32>
    %86 = vector.extract_strided_slice %83 {offsets = [0, 384], sizes = [2, 128], strides = [1, 1]} : vector<2x512xf32> to vector<2x128xf32>
    %87 = vector.extract_strided_slice %85 {offsets = [0, 0], sizes = [2, 128], strides = [1, 1]} : vector<2x384xf32> to vector<2x128xf32>
    %88 = vector.extract_strided_slice %14 {offsets = [0, 0], sizes = [2, 128], strides = [1, 1]} : vector<2x384xf32> to vector<2x128xf32>
    %89 = arith.addf %87, %88 : vector<2x128xf32>
    %90 = arith.negf %89 : vector<2x128xf32>
    %91 = math.exp %90 : vector<2x128xf32>
    %cst_51 = arith.constant 1.000000e+00 : f32
    %92 = vector.broadcast %cst_51 : f32 to vector<2x128xf32>
    %93 = arith.addf %92, %91 : vector<2x128xf32>
    %94 = arith.divf %92, %93 : vector<2x128xf32>
    %95 = vector.extract_strided_slice %85 {offsets = [0, 128], sizes = [2, 128], strides = [1, 1]} : vector<2x384xf32> to vector<2x128xf32>
    %96 = vector.extract_strided_slice %14 {offsets = [0, 128], sizes = [2, 128], strides = [1, 1]} : vector<2x384xf32> to vector<2x128xf32>
    %97 = arith.addf %95, %96 : vector<2x128xf32>
    %98 = arith.negf %97 : vector<2x128xf32>
    %99 = math.exp %98 : vector<2x128xf32>
    %cst_52 = arith.constant 1.000000e+00 : f32
    %100 = vector.broadcast %cst_52 : f32 to vector<2x128xf32>
    %101 = arith.addf %100, %99 : vector<2x128xf32>
    %102 = arith.divf %100, %101 : vector<2x128xf32>
    %103 = vector.extract_strided_slice %85 {offsets = [0, 256], sizes = [2, 128], strides = [1, 1]} : vector<2x384xf32> to vector<2x128xf32>
    %104 = vector.extract_strided_slice %14 {offsets = [0, 256], sizes = [2, 128], strides = [1, 1]} : vector<2x384xf32> to vector<2x128xf32>
    %105 = arith.mulf %94, %104 : vector<2x128xf32>
    %106 = arith.addf %103, %105 : vector<2x128xf32>
    %107 = math.tanh %106 : vector<2x128xf32>
    %cst_53 = arith.constant 1.000000e+00 : f32
    %108 = vector.broadcast %cst_53 : f32 to vector<2x128xf32>
    %109 = arith.subf %108, %102 : vector<2x128xf32>
    %110 = arith.mulf %109, %107 : vector<2x128xf32>
    %111 = arith.mulf %102, %1 : vector<2x128xf32>
    %112 = arith.addf %110, %111 : vector<2x128xf32>
    %c0_54 = arith.constant 0 : index
    %c1152_55 = arith.constant 1152 : index
    %113 = vector.load %arg3[%c0_54, %c1152_55] : memref<128x1408xf32, #tpu.memory_space<vmem>>, vector<128x128xf32>
    %cst_56 = arith.constant dense<0.000000e+00> : vector<2x128xf32>
    %114 = tpu.matmul %112, %113, %cst_56 {dimension_numbers = #tpu.dot_dimension_numbers<[1], [0], [0], [1], [0, 0, 1, 1], [], []>, precision = #tpu.contract_precision<fp32>} : vector<2x128xf32>, vector<128x128xf32>, vector<2x128xf32> -> vector<2x128xf32>
    %115 = arith.addf %114, %86 : vector<2x128xf32>
    %116 = arith.addf %115, %16 : vector<2x128xf32>
    %c0_57 = arith.constant 0 : index
    %c1280 = arith.constant 1280 : index
    %117 = vector.load %arg3[%c0_57, %c1280] : memref<128x1408xf32, #tpu.memory_space<vmem>>, vector<128x128xf32>
    %cst_58 = arith.constant dense<0.000000e+00> : vector<2x128xf32>
    %118 = tpu.matmul %116, %117, %cst_58 {dimension_numbers = #tpu.dot_dimension_numbers<[1], [0], [0], [1], [0, 0, 1, 1], [], []>, precision = #tpu.contract_precision<fp32>} : vector<2x128xf32>, vector<128x128xf32>, vector<2x128xf32> -> vector<2x128xf32>
    %c0_59 = arith.constant 0 : index
    %c1024 = arith.constant 1024 : index
    %119 = vector.load %arg5[%c0_59, %c1024] : memref<1x1280xf32, #tpu.memory_space<vmem>>, vector<1x128xf32>
    %120 = vector.broadcast %119 : vector<1x128xf32> to vector<2x128xf32>
    %121 = arith.addf %118, %120 : vector<2x128xf32>
    %c0_60 = arith.constant 0 : index
    %c0_61 = arith.constant 0 : index
    %122 = vector.load %arg6[%c0_60, %c0_61] : memref<2x384xf32, #tpu.memory_space<vmem>>, vector<2x128xf32>
    tpu.vector_store %arg6[%c0_60, %c0_61], %112 {strides = array<i32>} : memref<2x384xf32, #tpu.memory_space<vmem>>, vector<2x128xf32>,
    %c0_62 = arith.constant 0 : index
    %c128 = arith.constant 128 : index
    %123 = vector.load %arg6[%c0_62, %c128] : memref<2x384xf32, #tpu.memory_space<vmem>>, vector<2x128xf32>
    tpu.vector_store %arg6[%c0_62, %c128], %121 {strides = array<i32>} : memref<2x384xf32, #tpu.memory_space<vmem>>, vector<2x128xf32>,
    %cst_63 = arith.constant 0.000000e+00 : f32
    %124 = vector.broadcast %cst_63 : f32 to vector<2x128xf32>
    %c0_64 = arith.constant 0 : index
    %c256 = arith.constant 256 : index
    %125 = vector.load %arg6[%c0_64, %c256] : memref<2x384xf32, #tpu.memory_space<vmem>>, vector<2x128xf32>
    tpu.vector_store %arg6[%c0_64, %c256], %124 {strides = array<i32>} : memref<2x384xf32, #tpu.memory_space<vmem>>, vector<2x128xf32>,
    %c0_65 = arith.constant 0 : index
    %c256_66 = arith.constant 256 : index
    %126 = vector.load %arg6[%c0_65, %c256_66] : memref<2x384xf32, #tpu.memory_space<vmem>>, vector<2x1xf32>
    tpu.vector_store %arg6[%c0_65, %c256_66], %58 {strides = array<i32>} : memref<2x384xf32, #tpu.memory_space<vmem>>, vector<2x1xf32>,
    %c0_67 = arith.constant 0 : index
    %c257 = arith.constant 257 : index
    %127 = vector.load %arg6[%c0_67, %c257] : memref<2x384xf32, #tpu.memory_space<vmem>>, vector<2x1xf32>
    tpu.vector_store %arg6[%c0_67, %c257], %59 {strides = array<i32>} : memref<2x384xf32, #tpu.memory_space<vmem>>, vector<2x1xf32>,
    %c0_68 = arith.constant 0 : index
    %c258 = arith.constant 258 : index
    %128 = vector.load %arg6[%c0_68, %c258] : memref<2x384xf32, #tpu.memory_space<vmem>>, vector<2x1xf32>
    tpu.vector_store %arg6[%c0_68, %c258], %60 {strides = array<i32>} : memref<2x384xf32, #tpu.memory_space<vmem>>, vector<2x1xf32>,
    %c0_69 = arith.constant 0 : index
    %c259 = arith.constant 259 : index
    %129 = vector.load %arg6[%c0_69, %c259] : memref<2x384xf32, #tpu.memory_space<vmem>>, vector<2x1xf32>
    tpu.vector_store %arg6[%c0_69, %c259], %61 {strides = array<i32>} : memref<2x384xf32, #tpu.memory_space<vmem>>, vector<2x1xf32>,
    %c0_70 = arith.constant 0 : index
    %c260 = arith.constant 260 : index
    %130 = vector.load %arg6[%c0_70, %c260] : memref<2x384xf32, #tpu.memory_space<vmem>>, vector<2x1xf32>
    tpu.vector_store %arg6[%c0_70, %c260], %62 {strides = array<i32>} : memref<2x384xf32, #tpu.memory_space<vmem>>, vector<2x1xf32>,
    return
  }
}

</mosaic_0001>

<bundles_post_ra>
// kernel: tpu_custom_call.1
= control target key start
LH: loop header
LB: loop body
LE: loop exit
PB: predicated region body
PF: predicated region fallthrough
CT: control target
= control target key end

     0   :  { %11 = vsyncpa [#allocation5], 0  ;;  %s12055_s0 = inlined_call_operand.hbm [shape: f32[2,8], index: 0, kind: input, shape index: {}]   ;;  %s12056_s1 = inlined_call_operand.vmem [shape: f32[2,128], index: 1, kind: input, shape index: {}]   ;;  %s12057_s2 = inlined_call_operand.hbm [shape: f32[10,128], index: 2, kind: input, shape index: {}]   ;;  %s12058_s3 = inlined_call_operand.hbm [shape: f32[128,1408], index: 3, kind: input, shape index: {}]   ;;  %s12059_s4 = inlined_call_operand.hbm [shape: f32[8,512], index: 4, kind: input, shape index: {}]   ;;  %s12060_s5 = inlined_call_operand.vmem [shape: f32[1,1280], index: 5, kind: input, shape index: {}]   ;;  %s12061_s6 = inlined_call_operand.hbm [shape: f32[2,384], index: 6, kind: output, shape index: {}]  }
   0x1   :  { %12 = vsyncpa [#allocation8], 0 }
   0x2   :  { %13 = vsyncpa [#allocation11], 0 }
   0x3   :  { %14 = vsyncpa [#allocation6], 0  ;;  %s9288_s21 = smov [#allocation7]   ;;  %s9170_s25 = scalar_lea.hbm %s12057_s2, 256 }
   0x4   :  { %s32_s22 = sshll.u32 %s9288_s21, 4  ;;  %p9171_p0 = scmp.ne.s32.totalorder %s12057_s2, %s9170_s25  ;;  %s33_s22 = int_to_ptr.vmem [resolvable:$true] %s32_s22 }
   0x5   :  { %p9174_p1 = scmp.lt.u32.totalorder %s9170_s25, %s12057_s2 }
   0x7   :  { %p9176_p2 = pnand %p9174_p1, %p9171_p0 }
   0x9   :  { %9179 = shalt.err (!%p9176_p2)
}
   0xa   :  { %s9180_s30 = scalar_lea.vmem %s33_s22, 256  ;;  %p9185_p4 = scmp.lt.s32.totalorder %s33_s22, %s33_s22 }
   0xb   :  { %p9181_p3 = scmp.ne.s32.totalorder %s33_s22, %s9180_s30  ;;  %p9186_p5 = scmp.lt.s32.totalorder %s9180_s30, %s9180_s30 }
   0xd   :  { %p9187_p6 = por %p9186_p5, %p9185_p4 }
   0xf   :  { %p9188_p7 = pnand %p9187_p6, %p9181_p3 }
  0x11   :  { %9191 = shalt.err (!%p9188_p7)
}
  0x12   :  { %s9289_s7 = smov 128   ;;  %s9290_s8 = smov 8  }
  0x13   :  { %38 = dma.hbm_to_vmem [thread:$0]  %s12057_s2, 256, %s33_s22, [#allocation8], %s9289_s7, %s9289_s7, %s9290_s8  }
  0x14   :  { %s9291_s11 = smov [#allocation4]   ;;  %s9292_s13 = smov [#allocation9]  }
  0x15   :  { %s21_s12 = sshll.u32 %s9291_s11, 4  ;;  %s44_s14 = sshll.u32 %s9292_s13, 4  ;;  %s22_s12 = int_to_ptr.vmem [resolvable:$true] %s21_s12  ;;  %s45_s14 = int_to_ptr.vmem [resolvable:$true] %s44_s14 }
  0x16   :  { %s9192_s17 = scalar_lea.hbm %s12055_s0, 32 }
  0x17   :  { %p9193_p8 = scmp.ne.s32.totalorder %s12055_s0, %s9192_s17  ;;  %p9196_p9 = scmp.lt.u32.totalorder %s9192_s17, %s12055_s0 }
  0x19   :  { %p9198_p10 = pnand %p9196_p9, %p9193_p8 }
  0x1b   :  { %9201 = shalt.err (!%p9198_p10)
}
  0x1c   :  { %s9202_s2 = scalar_lea.vmem %s22_s12, 32  ;;  %p9207_p12 = scmp.lt.s32.totalorder %s22_s12, %s22_s12 }
  0x1d   :  { %p9203_p11 = scmp.ne.s32.totalorder %s22_s12, %s9202_s2  ;;  %p9208_p13 = scmp.lt.s32.totalorder %s9202_s2, %s9202_s2 }
  0x1f   :  { %p9209_p0 = por %p9208_p13, %p9207_p12 }
  0x21   :  { %p9210_p1 = pnand %p9209_p0, %p9203_p11 }
  0x23   :  { %9213 = shalt.err (!%p9210_p1)
}
  0x24   :  { %24 = dma.hbm_to_vmem [thread:$0]  %s12055_s0, 32, %s22_s12, [#allocation5]  }
  0x25   :  { %s9214_s26 = scalar_lea.hbm %s12058_s3, 22528 }
  0x26   :  { %p9215_p2 = scmp.ne.s32.totalorder %s12058_s3, %s9214_s26  ;;  %p9218_p3 = scmp.lt.u32.totalorder %s9214_s26, %s12058_s3 }
  0x28   :  { %p9220_p4 = pnand %p9218_p3, %p9215_p2 }
  0x2a   :  { %9223 = shalt.err (!%p9220_p4)
}
  0x2b   :  { %s9224_s7 = scalar_lea.vmem %s45_s14, 22528  ;;  %p9229_p6 = scmp.lt.s32.totalorder %s45_s14, %s45_s14 }
  0x2c   :  { %p9225_p5 = scmp.ne.s32.totalorder %s45_s14, %s9224_s7  ;;  %p9230_p7 = scmp.lt.s32.totalorder %s9224_s7, %s9224_s7 }
  0x2e   :  { %p9231_p8 = por %p9230_p7, %p9229_p6 }
  0x30   :  { %p9232_p9 = pnand %p9231_p8, %p9225_p5 }
  0x32   :  { %9235 = shalt.err (!%p9232_p9)
}
  0x33   :  { %s9293_s0 = smov 1408   ;;  %s9294_s8 = smov 88  }
  0x34   :  { %50 = dma.hbm_to_vmem [thread:$0]  %s12058_s3, 22528, %s45_s14, [#allocation8], %s9293_s0, %s9293_s0, %s9294_s8  }
  0x35   :  { %s9295_s11 = smov [#allocation10]   ;;  %s9236_s16 = scalar_lea.hbm %s12059_s4, 512 }
  0x36   :  { %s57_s12 = sshll.u32 %s9295_s11, 4  ;;  %p9237_p10 = scmp.ne.s32.totalorder %s12059_s4, %s9236_s16  ;;  %s58_s12 = int_to_ptr.vmem [resolvable:$true] %s57_s12 }
  0x37   :  { %p9240_p11 = scmp.lt.u32.totalorder %s9236_s16, %s12059_s4 }
  0x39   :  { %p9242_p12 = pnand %p9240_p11, %p9237_p10 }
  0x3b   :  { %9245 = shalt.err (!%p9242_p12)
}
  0x3c   :  { %s9246_s21 = scalar_lea.vmem %s58_s12, 512  ;;  %p9251_p0 = scmp.lt.s32.totalorder %s58_s12, %s58_s12 }
  0x3d   :  { %p9247_p13 = scmp.ne.s32.totalorder %s58_s12, %s9246_s21  ;;  %p9252_p1 = scmp.lt.s32.totalorder %s9246_s21, %s9246_s21 }
  0x3f   :  { %p9253_p2 = por %p9252_p1, %p9251_p0 }
  0x41   :  { %p9254_p3 = pnand %p9253_p2, %p9247_p13 }
  0x43   :  { %9257 = shalt.err (!%p9254_p3)
}
  0x44   :  { %60 = dma.hbm_to_vmem [thread:$0]  %s12059_s4, 512, %s58_s12, [#allocation11]  }
  0x45   :  { %9280 = dma.done.wait [#allocation5], 32  }
  0x46   :  { %9281 = vsyncadd [#allocation5], 4294967264 }
  0x47   :  { %9282 = dma.done.wait [#allocation8], 22784  }
  0x48   :  { %9283 = vsyncadd [#allocation8], 4294944512 }
  0x49   :  { %9284 = dma.done.wait [#allocation11], 512  }
  0x4a   :  { %9285 = vsyncadd [#allocation11], 4294966784  ;;  %v12062_v0 = vmov 0.0   ;;  %v79_v1 = vld [vmem:[#allocation9 + $0x8] sm:$0xff]  ;;  %v83_v2 = vld [vmem:[#allocation9 + $0x60] sm:$0xff]  ;;  %vm1900_vm0 = vcmask 64512  }
  0x4b   :  { %260 = vmatprep.mubr.f32.mxu1 %v12062_v0  ;;  %6759 = vst [vmem:[#allocation12 + $0x4] sm:$0x3] %v12062_v0  ;;  %737 = vmatprep.mubr.f32.mxu0 %v12062_v0  ;;  %v78_v3 = vld [vmem:[#allocation9] sm:$0xff]  ;;  %v164_v4 = vand.u32 4294901760, %v79_v1  ;;  %v168_v5 = vand.u32 4294901760, %v83_v2  ;;  %v82_v6 = vld [vmem:[#allocation9 + $0x58] sm:$0xff] }
  0x4c   :  { %v166_v7 = vand.u32 4294901760, %v78_v3  ;;  %v87_v8 = vld [vmem:[#allocation9 + $0xb8] sm:$0xff]  ;;  %v91_v9 = vld [vmem:[#allocation9 + $0x110] sm:$0xff]  ;;  %v170_v10 = vand.u32 4294901760, %v82_v6  ;;  %v90_v14 = vld [vmem:[#allocation9 + $0x108] sm:$0xff]  ;;  %vm3555_vm1 = vcmask 1041408  }
  0x4d   :  { %v172_v11 = vand.u32 4294901760, %v87_v8  ;;  %v176_v12 = vand.u32 4294901760, %v91_v9  ;;  %v86_v13 = vld [vmem:[#allocation9 + $0xb0] sm:$0xff]  ;;  %v95_v15 = vld [vmem:[#allocation9 + $0x168] sm:$0xff]  ;;  %v9392_v16 = vpack.c.bf16 %v168_v5, %v164_v4  ;;  %v99_v17 = vld [vmem:[#allocation9 + $0x1c0] sm:$0xff]  ;;  %v9394_v20 = vsub.f32 %v79_v1, %v164_v4  ;;  %s9299_s26 = smov 1  }
  0x4e   :  { %v94_v18 = vld [vmem:[#allocation9 + $0x160] sm:$0xff]  ;;  %v98_v19 = vld [vmem:[#allocation9 + $0x1b8] sm:$0xff]  ;;  %v9396_v21 = vpack.c.bf16 %v170_v10, %v166_v7  ;;  %v107_v24 = vld [vmem:[#allocation9 + $0x270] sm:$0xff]  ;;  %v9401_v25 = vsub.f32 %v83_v2, %v168_v5  ;;  %v174_v26 = vand.u32 4294901760, %v86_v13  ;;  %v178_v27 = vand.u32 4294901760, %v90_v14  ;;  %s9300_s27 = smov 2  }
  0x4f   :  { %v9398_v22 = vpack.c.bf16 %v176_v12, %v172_v11  ;;  %v103_v23 = vld [vmem:[#allocation9 + $0x218] sm:$0xff]  ;;  %7773 = vmatprep.subr.bf16.mxu1 %v9392_v16  ;;  %7869 = vmatprep.subr.bf16.mxu0 %v9392_v16  ;;  %v180_v28 = vand.u32 4294901760, %v95_v15  ;;  %v9405_v29 = vsub.f32 %v78_v3, %v166_v7  ;;  %v184_v30 = vand.u32 4294901760, %v99_v17  ;;  %v102_v37 = vld [vmem:[#allocation9 + $0x210] sm:$0xff]  ;;  %v106_v38 = vld [vmem:[#allocation9 + $0x268] sm:$0xff]  ;;  %s9301_s28 = smov 3  }
  0x50   :  { %12426 = vst [vmem:[#allocation17_spill] sm:$0xff] %v9396_v21  ;;  %7775 = vmatpush1.bf16.msra.mxu1 %v9396_v21  ;;  %7871 = vmatpush1.bf16.msra.mxu0 %v9396_v21  ;;  %v182_v31 = vand.u32 4294901760, %v94_v18  ;;  %v186_v32 = vand.u32 4294901760, %v98_v19  ;;  %v9408_v33 = vsub.f32 %v82_v6, %v170_v10  ;;  %v9412_v34 = vpack.c.bf16 %v178_v27, %v174_v26  ;;  %v111_v39 = vld [vmem:[#allocation9 + $0x2c8] sm:$0xff]  ;;  %v115_v44 = vld [vmem:[#allocation9 + $0x320] sm:$0xff]  ;;  %v114_v46 = vld [vmem:[#allocation9 + $0x318] sm:$0xff] }
  0x51   :  { %12427 = vst [vmem:[#allocation18_spill] sm:$0xff] %v9398_v22  ;;  %7777 = vmatprep.subr.bf16.mxu1 %v9398_v22  ;;  %7873 = vmatprep.subr.bf16.mxu0 %v9398_v22  ;;  %v188_v35 = vand.u32 4294901760, %v103_v23  ;;  %v192_v36 = vand.u32 4294901760, %v107_v24  ;;  %v9414_v40 = vsub.f32 %v87_v8, %v172_v11  ;;  %v9416_v41 = vsub.f32 %v91_v9, %v176_v12  ;;  %v110_v45 = vld [vmem:[#allocation9 + $0x2c0] sm:$0xff]  ;;  %v119_v51 = vld [vmem:[#allocation9 + $0x378] sm:$0xff]  ;;  %v123_v60 = vld [vmem:[#allocation9 + $0x3d0] sm:$0xff] }
  0x52   :  { %12428 = vst [vmem:[#allocation19_spill] sm:$0xff] %v9412_v34  ;;  %v9418_v42 = vsub.f32 %v86_v13, %v174_v26  ;;  %v9420_v43 = vpack.c.bf16 %v184_v30, %v180_v28  ;;  %v9422_v47 = vsub.f32 %v90_v14, %v178_v27  ;;  %v9424_v48 = vsub.f32 %v95_v15, %v180_v28  ;;  %v118_v61 = vld [vmem:[#allocation9 + $0x370] sm:$0xff]  ;;  %v122_v3 = vld [vmem:[#allocation9 + $0x3c8] sm:$0xff]  ;;  %v131_v5 = vld [vmem:[#allocation9 + $0x480] sm:$0xff]  ;;  %s9302_s29 = smov 4   ;;  %s9305_s12 = smov [#allocation12]  }
  0x53   :  { %v9426_v49 = vsub.f32 %v99_v17, %v184_v30  ;;  %v9428_v50 = vpack.c.bf16 %v186_v32, %v182_v31  ;;  %v9432_v52 = vsub.f32 %v94_v18, %v182_v31  ;;  %v190_v53 = vand.u32 4294901760, %v102_v37  ;;  %v127_v4 = vld [vmem:[#allocation9 + $0x428] sm:$0xff]  ;;  %v126_v10 = vld [vmem:[#allocation9 + $0x420] sm:$0xff]  ;;  %v130_v15 = vld [vmem:[#allocation9 + $0x478] sm:$0xff]  ;;  %s6815_s13 = sshll.u32 %s9305_s12, 4  ;;  %s6816_s13 = int_to_ptr.vmem [resolvable:$true] %s6815_s13 }
  0x54   :  { %12429 = vst [vmem:[#allocation20_spill] sm:$0xff] %v9418_v42  ;;  %12430 = vst [vmem:[#allocation21_spill] sm:$0xff] %v9420_v43  ;;  %7779 = vmatpush1.bf16.msra.mxu1 %v9412_v34  ;;  %7875 = vmatpush1.bf16.msra.mxu0 %v9412_v34  ;;  %v194_v54 = vand.u32 4294901760, %v106_v38  ;;  %v196_v55 = vand.u32 4294901760, %v111_v39  ;;  %v9436_v56 = vpack.c.bf16 %v192_v36, %v188_v35  ;;  %v200_v57 = vand.u32 4294901760, %v115_v44  ;;  %v135_v30 = vld [vmem:[#allocation9 + $0x4d8] sm:$0xff]  ;;  %p9263_p5 = scmp.lt.s32.totalorder %s6816_s13, %s6816_s13 }
  0x55   :  { %12431 = vst [vmem:[#allocation22_spill] sm:$0xff] %v9422_v47  ;;  %12432 = vst [vmem:[#allocation23_spill] sm:$0xff] %v9428_v50  ;;  %7781 = vmatprep.subr.bf16.mxu1 %v9420_v43  ;;  %7877 = vmatprep.subr.bf16.mxu0 %v9420_v43  ;;  %v198_v58 = vand.u32 4294901760, %v110_v45  ;;  %v202_v59 = vand.u32 4294901760, %v114_v46  ;;  %v9438_v62 = vsub.f32 %v98_v19, %v186_v32  ;;  %v204_v2 = vand.u32 4294901760, %v119_v51  ;;  %v139_v31 = vld [vmem:[#allocation9 + $0x530] sm:$0xff] }
  0x56   :  { %12433 = vst [vmem:[#allocation24_spill] sm:$0xff] %v9432_v52  ;;  %12434 = vst [vmem:[#allocation25_spill] sm:$0xff] %v9436_v56  ;;  %v9440_v63 = vsub.f32 %v103_v23, %v188_v35  ;;  %v9442_v1 = vsub.f32 %v107_v24, %v192_v36  ;;  %v9444_v6 = vpack.c.bf16 %v194_v54, %v190_v53  ;;  %v208_v13 = vand.u32 4294901760, %v123_v60  ;;  %v134_v32 = vld [vmem:[#allocation9 + $0x4d0] sm:$0xff]  ;;  %s9258_s15 = scalar_lea.vmem %s6816_s13, 96 }
  0x57   :  { %12435 = vst [vmem:[#allocation26_spill] sm:$0xff] %v9438_v62  ;;  %v9446_v7 = vsub.f32 %v102_v37, %v190_v53  ;;  %v9448_v8 = vsub.f32 %v106_v38, %v194_v54  ;;  %v9450_v9 = vsub.f32 %v111_v39, %v196_v55  ;;  %v9454_v11 = vpack.c.bf16 %v200_v57, %v196_v55  ;;  %v138_v39 = vld [vmem:[#allocation9 + $0x528] sm:$0xff]  ;;  %p9259_p4 = scmp.ne.s32.totalorder %s6816_s13, %s9258_s15  ;;  %p9264_p6 = scmp.lt.s32.totalorder %s9258_s15, %s9258_s15 }
  0x58   :  { %12436 = vst [vmem:[#allocation27_spill] sm:$0xff] %v9444_v6  ;;  %7783 = vmatpush1.bf16.msra.mxu1 %v9428_v50  ;;  %7879 = vmatpush1.bf16.msra.mxu0 %v9428_v50  ;;  %v9456_v12 = vsub.f32 %v115_v44, %v200_v57  ;;  %v206_v14 = vand.u32 4294901760, %v118_v61  ;;  %v9460_v17 = vpack.c.bf16 %v202_v59, %v198_v58  ;;  %v210_v18 = vand.u32 4294901760, %v122_v3  ;;  %v76_v44 = vld [vmem:[%s12056_s1] sm:$0x3] }
  0x59   :  { %12437 = vst [vmem:[#allocation28_spill] sm:$0xff] %v9454_v11  ;;  %7785 = vmatprep.subr.bf16.mxu1 %v9436_v56  ;;  %7881 = vmatprep.subr.bf16.mxu0 %v9436_v56  ;;  %v212_v19 = vand.u32 4294901760, %v127_v4  ;;  %v216_v23 = vand.u32 4294901760, %v131_v5  ;;  %v9462_v24 = vsub.f32 %v110_v45, %v198_v58  ;;  %v9464_v26 = vsub.f32 %v114_v46, %v202_v59  ;;  %p9265_p7 = por %p9264_p6, %p9263_p5 }
  0x5a   :  { %12438 = vst [vmem:[#allocation29_spill] sm:$0xff] %v9460_v17  ;;  %v9466_v27 = vsub.f32 %v119_v51, %v204_v2  ;;  %v214_v28 = vand.u32 4294901760, %v126_v10  ;;  %v9468_v35 = vpack.c.bf16 %v208_v13, %v204_v2  ;;  %v9470_v36 = vsub.f32 %v123_v60, %v208_v13 }
  0x5b   :  { %v9472_v37 = vsub.f32 %v118_v61, %v206_v14  ;;  %v218_v38 = vand.u32 4294901760, %v130_v15  ;;  %v9479_v45 = vpack.c.bf16 %v210_v18, %v206_v14  ;;  %v9481_v46 = vsub.f32 %v122_v3, %v210_v18  ;;  %p9266_p8 = pnand %p9265_p7, %p9259_p4 }
  0x5c   :  { %12439 = vst [vmem:[#allocation30_spill] sm:$0xff] %v9466_v27  ;;  %12440 = vst [vmem:[#allocation31_spill] sm:$0xff] %v9468_v35  ;;  %7787 = vmatpush1.bf16.msra.mxu1 %v9444_v6  ;;  %7883 = vmatpush1.bf16.msra.mxu0 %v9444_v6  ;;  %v9483_v51 = vpack.c.bf16 %v216_v23, %v212_v19  ;;  %v9487_v53 = vsub.f32 %v127_v4, %v212_v19  ;;  %v220_v54 = vand.u32 4294901760, %v135_v30  ;;  %vm3559_vm2 = vcmask 7168  }
  0x5d   :  { %12441 = vst [vmem:[#allocation32_spill] sm:$0xff] %v9479_v45  ;;  %7789 = vmatprep.subr.bf16.mxu1 %v9454_v11  ;;  %7885 = vmatprep.subr.bf16.mxu0 %v9454_v11  ;;  %v224_v55 = vand.u32 4294901760, %v139_v31  ;;  %v222_v57 = vand.u32 4294901760, %v134_v32  ;;  %v226_v58 = vand.u32 4294901760, %v138_v39  ;;  %v274_v59 = vand.u32 4294901760, %v9394_v20 }
  0x5e   :  { %12442 = vst [vmem:[#allocation33_spill] sm:$0xff] %v9483_v51  ;;  %12443 = vst [vmem:[#allocation34_spill] sm:$0xff] %v9487_v53  ;;  %v286_v60 = vand.u32 4294901760, %v9401_v25  ;;  %v9491_v61 = vand.u32 4294901760, %v76_v44  ;;  %v9493_v2 = vsub.f32 %v131_v5, %v216_v23  ;;  %v9495_v3 = vpack.c.bf16 %v218_v38, %v214_v28 }
  0x5f   :  { %v9497_v13 = vsub.f32 %v126_v10, %v214_v28  ;;  %v9499_v14 = vsub.f32 %v130_v15, %v218_v38  ;;  %v9503_v4 = vsub.f32 %v135_v30, %v220_v54  ;;  %v275_v18 = vsub.f32 %v9394_v20, %v274_v59 }
  0x60   :  { %12444 = vst [vmem:[#allocation35_spill] sm:$0xff] %v9491_v61  ;;  %12445 = vst [vmem:[#allocation36_spill] sm:$0xff] %v9495_v3  ;;  %7791 = vmatpush1.bf16.msra.mxu1 %v9460_v17  ;;  %7887 = vmatpush1.bf16.msra.mxu0 %v9460_v17  ;;  %v287_v19 = vsub.f32 %v9401_v25, %v286_v60  ;;  %v280_v0 = vand.u32 4294901760, %v9405_v29  ;;  %v9510_v5 = vpack.c.bf16 %v224_v55, %v220_v54  ;;  %vm3561_vm3 = vcmask 1024  }
  0x61   :  { %7793 = vmatprep.subr.bf16.mxu1 %v9468_v35  ;;  %7889 = vmatprep.subr.bf16.mxu0 %v9468_v35  ;;  %v9513_v10 = vsub.f32 %v76_v44, %v9491_v61  ;;  %v292_v15 = vand.u32 4294901760, %v9408_v33  ;;  %v298_v23 = vand.u32 4294901760, %v9414_v40  ;;  %v9517_v28 = vsub.f32 %v139_v31, %v224_v55 }
  0x62   :  { %12446 = vst [vmem:[#allocation37_spill] sm:$0xff] %v9510_v5  ;;  %v9519_v30 = vpack.c.bf16 %v226_v58, %v222_v57  ;;  %v281_v38 = vsub.f32 %v9405_v29, %v280_v0  ;;  %v310_v17 = vand.u32 4294901760, %v9416_v41  ;;  %v9523_v11 = vsub.f32 %v134_v32, %v222_v57 }
  0x63   :  { %12447 = vst [vmem:[#allocation38_spill] sm:$0xff] %v9513_v10  ;;  %v9526_v54 = vand.u32 4294901760, %v9513_v10  ;;  %v293_v44 = vsub.f32 %v9408_v33, %v292_v15  ;;  %v299_v35 = vsub.f32 %v9414_v40, %v298_v23  ;;  %v9532_v31 = vsub.f32 %v138_v39, %v226_v58 }
  0x64   :  { %12448 = vst [vmem:[#allocation39_spill] sm:$0xff] %v9519_v30  ;;  %7795 = vmatpush1.bf16.msra.mxu1 %v9479_v45  ;;  %7891 = vmatpush1.bf16.msra.mxu0 %v9479_v45  ;;  %v276_v55 = vand.u32 4294901760, %v275_v18  ;;  %v288_v6 = vand.u32 4294901760, %v287_v19  ;;  %v311_v56 = vsub.f32 %v9416_v41, %v310_v17  ;;  %v7900_v32 = vpack.c.bf16 %v286_v60, %v274_v59 }
  0x65   :  { %12449 = vst [vmem:[#allocation40_spill] sm:$0xff] %v9526_v54  ;;  %7797 = vmatprep.subr.bf16.mxu1 %v9483_v51  ;;  %7893 = vmatprep.subr.bf16.mxu0 %v9483_v51  ;;  %v264_v57 = vsub.f32 %v9513_v10, %v9526_v54  ;;  %v282_v50 = vand.u32 4294901760, %v281_v38  ;;  %v304_v43 = vand.u32 4294901760, %v9418_v42  ;;  %v294_v34 = vand.u32 4294901760, %v293_v44 }
  0x66   :  { %v316_v45 = vand.u32 4294901760, %v9422_v47  ;;  %v322_v39 = vand.u32 4294901760, %v9424_v48  ;;  %v334_v58 = vand.u32 4294901760, %v9426_v49  ;;  %v7902_v18 = vpack.c.bf16 %v292_v15, %v280_v0 }
  0x67   :  { %v300_v19 = vand.u32 4294901760, %v299_v35  ;;  %v312_v22 = vand.u32 4294901760, %v311_v56  ;;  %v328_v21 = vand.u32 4294901760, %v9432_v52  ;;  %v7804_v59 = vpack.c.bf16 %v288_v6, %v276_v55 }
  0x68   :  { %7799 = vmatpush1.bf16.msra.mxu1 %v9495_v3  ;;  %7895 = vmatpush1.bf16.msra.mxu0 %v9495_v3  ;;  %v305_v60 = vsub.f32 %v9418_v42, %v304_v43  ;;  %v317_v38 = vsub.f32 %v9422_v47, %v316_v45  ;;  %v340_v44 = vand.u32 4294901760, %v9438_v62  ;;  %v7904_v0 = vpack.c.bf16 %v310_v17, %v298_v23 }
  0x69   :  { %7801 = vmatprep.subr.bf16.mxu1 %v9510_v5  ;;  %7897 = vmatprep.subr.bf16.mxu0 %v9510_v5  ;;  %v323_v56 = vsub.f32 %v9424_v48, %v322_v39  ;;  %v335_v35 = vsub.f32 %v9426_v49, %v334_v58  ;;  %v9553_v15 = vand.u32 4294901760, %v264_v57  ;;  %v7806_v10 = vpack.c.bf16 %v294_v34, %v282_v50 }
  0x6a   :  { %v329_v6 = vsub.f32 %v9432_v52, %v328_v21  ;;  %v341_v55 = vsub.f32 %v9438_v62, %v340_v44  ;;  %v7808_v3 = vpack.c.bf16 %v312_v22, %v300_v19  ;;  %v7906_v51 = vpack.c.bf16 %v316_v45, %v304_v43 }
  0x6b   :  { %12450 = vst [vmem:[#allocation41_spill] sm:$0xff] %v9553_v15  ;;  %v346_v47 = vand.u32 4294901760, %v9440_v63  ;;  %v358_v42 = vand.u32 4294901760, %v9442_v1  ;;  %v306_v17 = vand.u32 4294901760, %v305_v60  ;;  %v318_v23 = vand.u32 4294901760, %v317_v38 }
  0x6c   :  { %7803 = vmatpush1.bf16.msra.mxu1 %v9519_v30  ;;  %7899 = vmatpush1.bf16.msra.mxu0 %v9519_v30  ;;  %v324_v5 = vand.u32 4294901760, %v323_v56  ;;  %v352_v57 = vand.u32 4294901760, %v9446_v7  ;;  %v336_v34 = vand.u32 4294901760, %v335_v35  ;;  %v364_v43 = vand.u32 4294901760, %v9448_v8 }
  0x6d   :  { %7805 = vmatprep.subr.bf16.mxu1 %v7804_v59  ;;  %7901 = vmatprep.subr.bf16.mxu0 %v7900_v32  ;;  %v347_v50 = vsub.f32 %v9440_v63, %v346_v47  ;;  %v359_v22 = vsub.f32 %v9442_v1, %v358_v42  ;;  %v7908_v45 = vpack.c.bf16 %v334_v58, %v322_v39  ;;  %v330_v19 = vand.u32 4294901760, %v329_v6 }
  0x6e   :  { %v342_v62 = vand.u32 4294901760, %v341_v55  ;;  %v370_v52 = vand.u32 4294901760, %v9450_v9  ;;  %v7910_v60 = vpack.c.bf16 %v340_v44, %v328_v21  ;;  %v353_v32 = vsub.f32 %v9446_v7, %v352_v57 }
  0x6f   :  { %266 = vmatmul.mubr.f32.vlgmr.msra.gmra.mrb[0].mxu1 %v9553_v15  ;;  %741 = vmatmul.mubr.f32.vlgmr.msra.gmra.mrb[0].mxu0 %v9526_v54  ;;  %v348_v38 = vand.u32 4294901760, %v347_v50  ;;  %v360_v59 = vand.u32 4294901760, %v359_v22  ;;  %v7810_v56 = vpack.c.bf16 %v318_v23, %v306_v17  ;;  %v365_v35 = vsub.f32 %v9448_v8, %v364_v43 }
  0x70   :  { %7807 = vmatpush1.bf16.msra.mxu1 %v7806_v10  ;;  %7903 = vmatpush1.bf16.msra.mxu0 %v7902_v18  ;;  %v382_v39 = vand.u32 4294901760, %v9456_v12  ;;  %v376_v58 = vand.u32 4294901760, %v9462_v24  ;;  %v7812_v6 = vpack.c.bf16 %v336_v34, %v324_v5  ;;  %v371_v55 = vsub.f32 %v9450_v9, %v370_v52 }
  0x71   :  { %7809 = vmatprep.subr.bf16.mxu1 %v7808_v3  ;;  %7905 = vmatprep.subr.bf16.mxu0 %v7904_v0  ;;  %v388_v21 = vand.u32 4294901760, %v9464_v26  ;;  %v394_v44 = vand.u32 4294901760, %v9466_v27  ;;  %v7814_v50 = vpack.c.bf16 %v342_v62, %v330_v19  ;;  %v12451_v17 = vmov 0.0  }
  0x72   :  { %v383_v10 = vsub.f32 %v9456_v12, %v382_v39  ;;  %v377_v18 = vsub.f32 %v9462_v24, %v376_v58  ;;  %496 = vmatprep.mubr.f32.mxu1 %v12451_v17  ;;  %907 = vmatprep.mubr.f32.mxu0 %v12451_v17  ;;  %v7816_v23 = vpack.c.bf16 %v360_v59, %v348_v38  ;;  %v354_v3 = vand.u32 4294901760, %v353_v32 }
  0x73   :  { %v7912_v22 = vpack.c.bf16 %v358_v42, %v346_v47  ;;  %v389_v5 = vsub.f32 %v9464_v26, %v388_v21  ;;  %v366_v0 = vand.u32 4294901760, %v365_v35  ;;  %v395_v34 = vsub.f32 %v9466_v27, %v394_v44 }
  0x74   :  { %7811 = vmatpush1.bf16.msra.mxu1 %v7810_v56  ;;  %7907 = vmatpush1.bf16.msra.mxu0 %v7906_v51  ;;  %v406_v62 = vand.u32 4294901760, %v9470_v36  ;;  %v400_v19 = vand.u32 4294901760, %v9472_v37  ;;  %v372_v54 = vand.u32 4294901760, %v371_v55  ;;  %v384_v15 = vand.u32 4294901760, %v383_v10 }
  0x75   :  { %7813 = vmatprep.subr.bf16.mxu1 %v7812_v6  ;;  %7909 = vmatprep.subr.bf16.mxu0 %v7908_v45  ;;  %v412_v30 = vand.u32 4294901760, %v9481_v46  ;;  %v418_v42 = vand.u32 4294901760, %v9487_v53  ;;  %v7914_v47 = vpack.c.bf16 %v364_v43, %v352_v57  ;;  %v7916_v38 = vpack.c.bf16 %v382_v39, %v370_v52 }
  0x76   :  { %v378_v59 = vand.u32 4294901760, %v377_v18  ;;  %v407_v51 = vsub.f32 %v9470_v36, %v406_v62  ;;  %v390_v32 = vand.u32 4294901760, %v389_v5  ;;  %v401_v56 = vsub.f32 %v9472_v37, %v400_v19 }
  0x77   :  { %v413_v35 = vsub.f32 %v9481_v46, %v412_v30  ;;  %v419_v27 = vsub.f32 %v9487_v53, %v418_v42  ;;  %v7818_v45 = vpack.c.bf16 %v366_v0, %v354_v3  ;;  %v396_v6 = vand.u32 4294901760, %v395_v34 }
  0x78   :  { %7815 = vmatpush1.bf16.msra.mxu1 %v7814_v50  ;;  %7911 = vmatpush1.bf16.msra.mxu0 %v7910_v60  ;;  %v430_v55 = vand.u32 4294901760, %v9493_v2  ;;  %v424_v10 = vand.u32 4294901760, %v9497_v13  ;;  %v7820_v52 = vpack.c.bf16 %v384_v15, %v372_v54  ;;  %v408_v57 = vand.u32 4294901760, %v407_v51 }
  0x79   :  { %7817 = vmatprep.subr.bf16.mxu1 %v7816_v23  ;;  %7913 = vmatprep.subr.bf16.mxu0 %v7912_v22  ;;  %v436_v43 = vand.u32 4294901760, %v9499_v14  ;;  %v442_v39 = vand.u32 4294901760, %v9503_v4  ;;  %v7918_v18 = vpack.c.bf16 %v388_v21, %v376_v58  ;;  %v7920_v5 = vpack.c.bf16 %v406_v62, %v394_v44 }
  0x7a   :  { %v431_v53 = vsub.f32 %v9493_v2, %v430_v55  ;;  %v7822_v50 = vpack.c.bf16 %v390_v32, %v378_v59  ;;  %v402_v60 = vand.u32 4294901760, %v401_v56  ;;  %v414_v3 = vand.u32 4294901760, %v413_v35 }
  0x7b   :  { %v420_v0 = vand.u32 4294901760, %v419_v27  ;;  %v425_v34 = vsub.f32 %v9497_v13, %v424_v10  ;;  %v437_v23 = vsub.f32 %v9499_v14, %v436_v43  ;;  %v454_v54 = vand.u32 4294901760, %v9517_v28 }
  0x7c   :  { %7819 = vmatpush1.bf16.msra.mxu1 %v7818_v45  ;;  %7915 = vmatpush1.bf16.msra.mxu0 %v7914_v47  ;;  %v448_v15 = vand.u32 4294901760, %v9523_v11  ;;  %v7824_v58 = vpack.c.bf16 %v408_v57, %v396_v6  ;;  %v432_v21 = vand.u32 4294901760, %v431_v53  ;;  %v443_v44 = vsub.f32 %v9503_v4, %v442_v39 }
  0x7d   :  { %7821 = vmatprep.subr.bf16.mxu1 %v7820_v52  ;;  %7917 = vmatprep.subr.bf16.mxu0 %v7916_v38  ;;  %v460_v22 = vand.u32 4294901760, %v9532_v31  ;;  %v455_v27 = vsub.f32 %v9517_v28, %v454_v54  ;;  %v7826_v62 = vpack.c.bf16 %v414_v3, %v402_v60  ;;  %v7922_v47 = vpack.c.bf16 %v412_v30, %v400_v19  ;;  %v12459_v3 = vld [vmem:[#allocation21_spill] sm:$0xff] }
  0x7e   :  { %v426_v59 = vand.u32 4294901760, %v425_v34  ;;  %v438_v51 = vand.u32 4294901760, %v437_v23  ;;  %v449_v32 = vsub.f32 %v9523_v11, %v448_v15  ;;  %v7828_v38 = vpack.c.bf16 %v432_v21, %v420_v0  ;;  %v12460_v34 = vld [vmem:[#allocation23_spill] sm:$0xff]  ;;  %v12463_v21 = vld [vmem:[#allocation28_spill] sm:$0xff] }
  0x7f   :  { %v461_v56 = vsub.f32 %v9532_v31, %v460_v22  ;;  %v7924_v53 = vpack.c.bf16 %v430_v55, %v418_v42  ;;  %v444_v35 = vand.u32 4294901760, %v443_v44  ;;  %v456_v45 = vand.u32 4294901760, %v455_v27 }
  0x80   :  { %7823 = vmatpush1.bf16.msra.mxu1 %v7822_v50  ;;  %7919 = vmatpush1.bf16.msra.mxu0 %v7918_v18  ;;  %v7830_v6 = vpack.c.bf16 %v438_v51, %v426_v59  ;;  %v7926_v52 = vpack.c.bf16 %v436_v43, %v424_v10  ;;  %v450_v57 = vand.u32 4294901760, %v449_v32  ;;  %v7928_v18 = vpack.c.bf16 %v454_v54, %v442_v39  ;;  %v12452_v43 = vld [vmem:[#allocation17_spill] sm:$0xff]  ;;  %v12453_v39 = vld [vmem:[#allocation20_spill] sm:$0xff]  ;;  %v75_v54 = vld [vmem:[#allocation4] sm:$0x3] }
  0x81   :  { %7825 = vmatprep.subr.bf16.mxu1 %v7824_v58  ;;  %7921 = vmatprep.subr.bf16.mxu0 %v7920_v5  ;;  %v462_v30 = vand.u32 4294901760, %v461_v56  ;;  %v7832_v19 = vpack.c.bf16 %v456_v45, %v444_v35  ;;  %v7930_v60 = vpack.c.bf16 %v460_v22, %v448_v15  ;;  %v7836_v42 = vpack.c.bf16 %v9401_v25, %v9394_v20  ;;  %v12454_v20 = vld [vmem:[#allocation22_spill] sm:$0xff]  ;;  %v12462_v58 = vld [vmem:[#allocation27_spill] sm:$0xff]  ;;  %v1874_v22 = vld [vmem:[#allocation10] sm:$0xff] }
  0x82   :  { %v7838_v55 = vpack.c.bf16 %v9408_v33, %v9405_v29  ;;  %v7840_v10 = vpack.c.bf16 %v9416_v41, %v9414_v40  ;;  %v7842_v25 = vpack.c.bf16 %v12454_v20, %v12453_v39  ;;  %v12455_v5 = vld [vmem:[#allocation18_spill] sm:$0xff]  ;;  %v7844_v29 = vpack.c.bf16 %v9426_v49, %v9424_v48  ;;  %v12457_v33 = vld [vmem:[#allocation24_spill] sm:$0xff]  ;;  %v12461_v49 = vld [vmem:[#allocation25_spill] sm:$0xff] }
  0x83   :  { %v7834_v50 = vpack.c.bf16 %v462_v30, %v450_v57  ;;  %v12458_v40 = vld [vmem:[#allocation26_spill] sm:$0xff]  ;;  %v7848_v0 = vpack.c.bf16 %v9442_v1, %v9440_v63  ;;  %v7850_v48 = vpack.c.bf16 %v9448_v8, %v9446_v7  ;;  %v7852_v23 = vpack.c.bf16 %v9456_v12, %v9450_v9  ;;  %v12466_v9 = vld [vmem:[#allocation29_spill] sm:$0xff]  ;;  %v12470_v51 = vld [vmem:[#allocation32_spill] sm:$0xff] }
  0x84   :  { %7827 = vmatpush1.bf16.msra.mxu1 %v7826_v62  ;;  %7923 = vmatpush1.bf16.msra.mxu0 %v7922_v47  ;;  %v7846_v41 = vpack.c.bf16 %v12458_v40, %v12457_v33  ;;  %v1875_v15 = vld [vmem:[#allocation10 + $0x8] sm:$0xff]  ;;  %v7854_v63 = vpack.c.bf16 %v9464_v26, %v9462_v24  ;;  %v1902_v1 = vsel %vm1900_vm0, %v75_v54, 0  ;;  %v7858_v12 = vpack.c.bf16 %v9481_v46, %v9472_v37  ;;  %v12467_v24 = vld [vmem:[#allocation31_spill] sm:$0xff] }
  0x85   :  { %7829 = vmatprep.subr.bf16.mxu1 %v7828_v38  ;;  %7925 = vmatprep.subr.bf16.mxu0 %v7924_v53  ;;  %v12464_v7 = vld [vmem:[#allocation30_spill] sm:$0xff]  ;;  %v1904_v44 = vand.u32 4294901760, %v1875_v15  ;;  %v9638_v27 = vand.u32 4294901760, %v1902_v1  ;;  %v9643_v62 = vand.u32 4294901760, %v1874_v22  ;;  %v7862_v32 = vpack.c.bf16 %v9499_v14, %v9497_v13  ;;  %v12471_v46 = vld [vmem:[#allocation33_spill] sm:$0xff]  ;;  %v12473_v53 = vld [vmem:[#allocation36_spill] sm:$0xff] }
  0x86   :  { %v7856_v8 = vpack.c.bf16 %v9470_v36, %v12464_v7  ;;  %v12468_v26 = vld [vmem:[#allocation34_spill] sm:$0xff]  ;;  %v7864_v56 = vpack.c.bf16 %v9517_v28, %v9503_v4  ;;  %v7866_v35 = vpack.c.bf16 %v9532_v31, %v9523_v11  ;;  %v12474_v13 = vld [vmem:[#allocation37_spill] sm:$0xff]  ;;  %v12475_v4 = vld [vmem:[#allocation39_spill] sm:$0xff]  ;;  %vm6771_vm4 = vcmask 9224  }
  0x87   :  { %12465 = vst [vmem:[#allocation17_spill] sm:$0xff] %v9638_v27  ;;  %v7860_v47 = vpack.c.bf16 %v9493_v2, %v12468_v26  ;;  %v1983_v59 = vsub.f32 %v1875_v15, %v1904_v44  ;;  %v9649_v36 = vsub.f32 %v1902_v1, %v9638_v27  ;;  %v1989_v37 = vsub.f32 %v1874_v22, %v9643_v62  ;;  %v12476_v57 = vld [vmem:[#allocation38_spill] sm:$0xff]  ;;  %v2841_v33 = vld [vmem:[#allocation9 + $0x1d8] sm:$0xff]  ;;  %v2844_v15 = vld [vmem:[#allocation9 + $0x2e0] sm:$0xff] }
  0x88   :  { %7831 = vmatpush1.bf16.msra.mxu1 %v7830_v6  ;;  %7927 = vmatpush1.bf16.msra.mxu0 %v7926_v52  ;;  %v2834_v31 = vld [vmem:[#allocation7] sm:$0xff]  ;;  %v2839_v20 = vld [vmem:[#allocation9 + $0x128] sm:$0xff]  ;;  %v2884_v1 = vand.u32 4294901760, %v2844_v15  ;;  %v2835_v22 = vld [vmem:[#allocation7 + $0x8] sm:$0x3]  ;;  %vm6783_vm5 = vcmask 17424  }
  0x89   :  { %7833 = vmatprep.subr.bf16.mxu1 %v7832_v19  ;;  %7929 = vmatprep.subr.bf16.mxu0 %v7928_v18  ;;  %12469 = vst [vmem:[#allocation20_spill] sm:$0xff] %v9649_v36  ;;  %v1984_v38 = vand.u32 4294901760, %v1983_v59  ;;  %v9659_v2 = vand.u32 4294901760, %v9649_v36  ;;  %v1990_v45 = vand.u32 4294901760, %v1989_v37  ;;  %v9682_v19 = vand.u32 4294901760, %v2834_v31  ;;  %v2836_v18 = vld [vmem:[#allocation9 + $0x20] sm:$0xff] }
  0x8a   :  { %v2838_v39 = vld [vmem:[#allocation9 + $0xd0] sm:$0xff]  ;;  %vm6795_vm6 = vcmask 25624   ;;  %vm6807_vm7 = vcmask 33824   ;;  %vm9304_vm8 = vmmov 0  }
  0x8b   :  { %12472 = vst [vmem:[#allocation22_spill] sm:$0xff] %v9659_v2  ;;  %v1985_v14 = vsub.f32 %v1983_v59, %v1984_v38  ;;  %v1974_v6 = vsub.f32 %v9649_v36, %v9659_v2  ;;  %v1991_v28 = vsub.f32 %v1989_v37, %v1990_v45  ;;  %v9713_v7 = vld [vmem:[#allocation9 + $0x390] sm:$0xff] }
  0x8c   :  { %7835 = vmatpush1.bf16.msra.mxu1 %v7834_v50  ;;  %7931 = vmatpush1.bf16.msra.mxu0 %v7930_v60  ;;  %v2837_v50 = vld [vmem:[#allocation9 + $0x78] sm:$0xff]  ;;  %v9687_v60 = vsub.f32 %v2834_v31, %v9682_v19 }
  0x8d   :  { %7837 = vmatprep.subr.bf16.mxu1 %v7836_v42  ;;  %7933 = vmatprep.subr.bf16.mxu0 %v9392_v16  ;;  %v12456_v16 = vld [vmem:[#allocation19_spill] sm:$0xff]  ;;  %v1986_v52 = vand.u32 4294901760, %v1985_v14  ;;  %v9670_v30 = vand.u32 4294901760, %v1974_v6  ;;  %v1992_v11 = vand.u32 4294901760, %v1991_v28  ;;  %v2860_v42 = vand.u32 4294901760, %v2836_v18 }
  0x8f   :  { %498 = vmatmul.mubr.f32.vlgmr.msra.gmra.mrb[0].mxu1 %v9491_v61  ;;  %909 = vmatmul.mubr.f32.vlgmr.msra.gmra.mrb[0].mxu0 %v9491_v61  ;;  %12477 = vst [vmem:[#allocation18_spill] sm:$0xff] %v9670_v30 }
  0x90   :  { %7839 = vmatpush1.bf16.msra.mxu1 %v7838_v55  ;;  %7935 = vmatpush1.bf16.msra.mxu0 %v12452_v43  ;;  %v2863_v55 = vand.u32 4294901760, %v2837_v50 }
  0x91   :  { %7841 = vmatprep.subr.bf16.mxu1 %v7840_v10  ;;  %7937 = vmatprep.subr.bf16.mxu0 %v12455_v5  ;;  %v12106_v10 = vand.u32 4294901760, %v9687_v60  ;;  %v2866_v5 = vand.u32 4294901760, %v2838_v39 }
  0x92   :  { %632 = vmatprep.mubr.f32.mxu1 %v12451_v17  ;;  %1011 = vmatprep.mubr.f32.mxu0 %v12451_v17  ;;  %v9690_v43 = vpack.c.bf16 %v2863_v55, %v2860_v42  ;;  %v9727_v26 = vsub.f32 %v2837_v50, %v2863_v55 }
  0x94   :  { %7843 = vmatpush1.bf16.msra.mxu1 %v7842_v25  ;;  %7939 = vmatpush1.bf16.msra.mxu0 %v12456_v16  ;;  %v2943_v25 = vsub.f32 %v9687_v60, %v12106_v10  ;;  %v2840_v16 = vld [vmem:[#allocation9 + $0x180] sm:$0xff]  ;;  %v105_v10 = vld [vmem:[#allocation9 + $0x228] sm:$0xff] }
  0x95   :  { %7845 = vmatprep.subr.bf16.mxu1 %v7844_v29  ;;  %7941 = vmatprep.subr.bf16.mxu0 %v12459_v3  ;;  %v2869_v29 = vand.u32 4294901760, %v2839_v20  ;;  %v2872_v3 = vand.u32 4294901760, %v2840_v16 }
  0x96   :  { %v2944_v40 = vand.u32 4294901760, %v2943_v25 }
  0x97   :  { %v9753_v6 = vsub.f32 %v2840_v16, %v2872_v3 }
  0x98   :  { %7847 = vmatpush1.bf16.msra.mxu1 %v7846_v41  ;;  %7943 = vmatpush1.bf16.msra.mxu0 %v12460_v34  ;;  %v9699_v41 = vpack.c.bf16 %v2869_v29, %v2866_v5  ;;  %v2842_v34 = vld [vmem:[#allocation9 + $0x230] sm:$0xff] }
  0x99   :  { %7849 = vmatprep.subr.bf16.mxu1 %v7848_v0  ;;  %7945 = vmatprep.subr.bf16.mxu0 %v12461_v49  ;;  %v2875_v0 = vand.u32 4294901760, %v2841_v33  ;;  %v12090_v55 = vand.u32 4294901760, %v9753_v6 }
  0x9b   :  { %v9704_v49 = vpack.c.bf16 %v2875_v0, %v2872_v3 }
  0x9c   :  { %7851 = vmatpush1.bf16.msra.mxu1 %v7850_v48  ;;  %7947 = vmatpush1.bf16.msra.mxu0 %v12462_v58  ;;  %v2843_v48 = vld [vmem:[#allocation9 + $0x288] sm:$0xff]  ;;  %v9706_v58 = vld [vmem:[#allocation9 + $0x338] sm:$0xff] }
  0x9d   :  { %7853 = vmatprep.subr.bf16.mxu1 %v7852_v23  ;;  %7949 = vmatprep.subr.bf16.mxu0 %v12463_v21  ;;  %v2878_v23 = vand.u32 4294901760, %v2842_v34  ;;  %v2881_v54 = vand.u32 4294901760, %v2843_v48  ;;  %v2887_v21 = vand.u32 4294901760, %v9706_v58 }
  0xa0   :  { %7855 = vmatpush1.bf16.msra.mxu1 %v7854_v63  ;;  %7951 = vmatpush1.bf16.msra.mxu0 %v12466_v9  ;;  %v9710_v63 = vpack.c.bf16 %v2881_v54, %v2878_v23  ;;  %v9720_v9 = vpack.c.bf16 %v2887_v21, %v2884_v1 }
  0xa1   :  { %7857 = vmatprep.subr.bf16.mxu1 %v7856_v8  ;;  %7953 = vmatprep.subr.bf16.mxu0 %v12467_v24  ;;  %v9715_v8 = vld [vmem:[#allocation9 + $0x3e8] sm:$0xff]  ;;  %v9725_v24 = vsub.f32 %v2836_v18, %v2860_v42 }
  0xa4   :  { %7859 = vmatpush1.bf16.msra.mxu1 %v7858_v12  ;;  %7955 = vmatpush1.bf16.msra.mxu0 %v12470_v51  ;;  %v2893_v12 = vand.u32 4294901760, %v9715_v8 }
  0xa5   :  { %7861 = vmatprep.subr.bf16.mxu1 %v7860_v47  ;;  %7957 = vmatprep.subr.bf16.mxu0 %v12471_v46  ;;  %v9729_v47 = vld [vmem:[#allocation9 + $0x498] sm:$0xff]  ;;  %v9739_v46 = vsub.f32 %v2839_v20, %v2869_v29 }
  0xa8   :  { %7863 = vmatpush1.bf16.msra.mxu1 %v7862_v32  ;;  %7959 = vmatpush1.bf16.msra.mxu0 %v12473_v53  ;;  %v9735_v32 = vld [vmem:[#allocation9 + $0x4f0] sm:$0xff]  ;;  %v9745_v53 = vld [vmem:[#allocation9 + $0x548] sm:$0xff] }
  0xa9   :  { %7865 = vmatprep.subr.bf16.mxu1 %v7864_v56  ;;  %7961 = vmatprep.subr.bf16.mxu0 %v12474_v13  ;;  %v2902_v13 = vand.u32 4294901760, %v9735_v32 }
  0xac   :  { %7867 = vmatpush1.bf16.msra.mxu1 %v7866_v35  ;;  %7963 = vmatpush1.bf16.msra.mxu0 %v12475_v4  ;;  %v12105_v35 = vand.u32 4294901760, %v9725_v24  ;;  %v2905_v4 = vand.u32 4294901760, %v9745_v53 }
  0xad   :  { %1905 = vmatprep.subr.mxu0 %v1904_v44 }
  0xae   :  { %v2964_v18 = vsub.f32 %v9725_v24, %v12105_v35 }
  0xaf   :  { %635 = vmatmul.mubr.f32.vlgmr.msra.gmra.mrb[0].mxu1 %v12476_v57  ;;  %1013 = vmatmul.mubr.f32.vlgmr.msra.gmra.mrb[0].mxu0 %v9491_v61  ;;  %v1043_v57 = vand.u32 4294901760, %v105_v10  ;;  %v104_v61 = vld [vmem:[#allocation9 + $0x220] sm:$0xff] }
  0xb0   :  { %1907 = vmatpush1.msra.mxu0 %v9643_v62  ;;  %1970 = vmatprep.mubr.f32.mxu0 %v12451_v17  ;;  %v2965_v29 = vand.u32 4294901760, %v2964_v18 }
  0xb1   :  { %1987 = vmatprep.subr.mxu0 %v1986_v52  ;;  %1115 = vmatprep.mubr.f32.mxu1 %v12451_v17  ;;  %v12089_v52 = vand.u32 4294901760, %v9739_v46 }
  0xb3   :  { %1976 = vmatmul.mubr.f32.vlgmr.msra.gmra.mrb[2].mxu0 %v9670_v30  ;;  %v2985_v25 = vsub.f32 %v9739_v46, %v12089_v52 }
  0xb4   :  { %1993 = vmatpush1.msra.mxu0 %v1992_v11  ;;  %2056 = vmatprep.mubr.f32.mxu0 %v12451_v17  ;;  %v9759_v11 = vsub.f32 %v2841_v33, %v2875_v0  ;;  %v9787_v33 = vsub.f32 %v2842_v34, %v2878_v23  ;;  %v2992_v0 = vsub.f32 %v9753_v6, %v12090_v55 }
  0xb5   :  { %2066 = vmatprep.subr.mxu0 %v1983_v59  ;;  %v9731_v59 = vand.u32 4294901760, %v2835_v22  ;;  %v2986_v52 = vand.u32 4294901760, %v2985_v25  ;;  %v9801_v34 = vsub.f32 %v2844_v15, %v2884_v1  ;;  %v9815_v1 = vsub.f32 %v9715_v8, %v2893_v12 }
  0xb6   :  { %v12101_v23 = vand.u32 4294901760, %v9787_v33 }
  0xb7   :  { %12478 = vst [vmem:[#allocation19_spill] sm:$0xff] %v9731_v59  ;;  %v9751_v14 = vsub.f32 %v2835_v22, %v9731_v59  ;;  %v12099_v25 = vand.u32 4294901760, %v9801_v34 }
  0xb9   :  { %v12091_v42 = vand.u32 4294901760, %v9751_v14 }
  0xbb   :  { %2058 = vmatmul.mubr.f32.vlgmr.msra.gmra.mrb[2].mxu0 %v9638_v27  ;;  %v2953_v3 = vsub.f32 %v9751_v14, %v12091_v42  ;;  %v2993_v42 = vand.u32 4294901760, %v2992_v0 }
  0xbc   :  { %2069 = vmatpush1.msra.mxu0 %v1989_v37  ;;  %2132 = vmatprep.mubr.f32.mxu0 %v12451_v17  ;;  %v9737_v37 = vsub.f32 %v2838_v39, %v2866_v5  ;;  %v9777_v39 = vpack.c.bf16 %v2905_v4, %v2902_v13  ;;  %v12102_v5 = vand.u32 4294901760, %v9759_v11 }
  0xbd   :  { %2142 = vmatprep.subr.mxu0 %v1904_v44  ;;  %v2954_v55 = vand.u32 4294901760, %v2953_v3 }
  0xbe   :  { %v12103_v28 = vand.u32 4294901760, %v9737_v37  ;;  %v2999_v18 = vsub.f32 %v9759_v11, %v12102_v5 }
  0xc0   :  { %v2978_v20 = vsub.f32 %v9737_v37, %v12103_v28 }
  0xc2   :  { %v2979_v22 = vand.u32 4294901760, %v2978_v20  ;;  %v3000_v20 = vand.u32 4294901760, %v2999_v18 }
  0xc3   :  { %2135 = vmatmul.mubr.f32.vlgmr.msra.gmra.mrb[2].mxu0 %v9649_v36 }
  0xc4   :  { %2144 = vmatpush1.msra.mxu0 %v9643_v62  ;;  %2207 = vmatprep.mubr.f32.mxu0 %v12451_v17 }
  0xc5   :  { %2220 = vmatprep.subr.mxu0 %v1984_v38  ;;  %v2899_v38 = vand.u32 4294901760, %v9729_v47 }
  0xcb   :  { %2211 = vmatmul.mubr.f32.vlgmr.msra.gmra.mrb[2].mxu0 %v9659_v2 }
  0xcc   :  { %2224 = vmatpush1.msra.mxu0 %v1990_v45  ;;  %2287 = vmatprep.mubr.f32.mxu0 %v12451_v17  ;;  %v12104_v45 = vand.u32 4294901760, %v9727_v26 }
  0xcd   :  { %2296 = vmatprep.subr.mxu0 %v1904_v44  ;;  %v2890_v44 = vand.u32 4294901760, %v9713_v7 }
  0xce   :  { %v2971_v50 = vsub.f32 %v9727_v26, %v12104_v45 }
  0xcf   :  { %v9742_v56 = vpack.c.bf16 %v2893_v12, %v2890_v44  ;;  %v9812_v15 = vsub.f32 %v9713_v7, %v2890_v44  ;;  %v3020_v7 = vsub.f32 %v9801_v34, %v12099_v25  ;;  %v12096_v44 = vand.u32 4294901760, %v9815_v1  ;;  %v101_v25 = vld [vmem:[#allocation9 + $0x1d0] sm:$0xff] }
  0xd0   :  { %v2972_v16 = vand.u32 4294901760, %v2971_v50  ;;  %v9807_v50 = vsub.f32 %v9706_v58, %v2887_v21  ;;  %v3006_v58 = vsub.f32 %v9787_v33, %v12101_v23  ;;  %v9833_v12 = vsub.f32 %v9729_v47, %v2899_v38  ;;  %v100_v23 = vld [vmem:[#allocation9 + $0x1c8] sm:$0xff] }
  0xd1   :  { %v12097_v8 = vand.u32 4294901760, %v9812_v15  ;;  %v3041_v47 = vsub.f32 %v9815_v1, %v12096_v44  ;;  %v1039_v30 = vand.u32 4294901760, %v101_v25 }
  0xd2   :  { %12480 = vst [vmem:[#allocation26_spill] sm:$0xff] %v9833_v12  ;;  %v9897_v44 = vpack.c.bf16 %v9807_v50, %v9801_v34 }
  0xd3   :  { %2289 = vmatmul.mubr.f32.vlgmr.msra.gmra.mrb[2].mxu0 %v9638_v27  ;;  %v3034_v18 = vsub.f32 %v9812_v15, %v12097_v8  ;;  %v9901_v8 = vpack.c.bf16 %v9815_v1, %v9812_v15 }
  0xd4   :  { %2298 = vmatpush1.msra.mxu0 %v9643_v62  ;;  %2361 = vmatprep.mubr.f32.mxu0 %v12451_v17  ;;  %v9723_v62 = vld [vmem:[#allocation9 + $0x440] sm:$0xff] }
  0xd5   :  { %8157 = vmatprep.subr.bf16.mxu0 %v9690_v43  ;;  %v2896_v51 = vand.u32 4294901760, %v9723_v62 }
  0xd7   :  { %v9762_v31 = vpack.c.bf16 %v2899_v38, %v2896_v51  ;;  %v9825_v3 = vsub.f32 %v9723_v62, %v2896_v51  ;;  %v12094_v38 = vand.u32 4294901760, %v9833_v12 }
  0xd9   :  { %12479 = vst [vmem:[#allocation24_spill] sm:$0xff] %v9825_v3  ;;  %v12095_v51 = vand.u32 4294901760, %v9825_v3  ;;  %v9911_v5 = vpack.c.bf16 %v9833_v12, %v9825_v3 }
  0xdb   :  { %2363 = vmatmul.mubr.f32.vlgmr.msra.gmra.mrb[2].mxu0 %v9638_v27  ;;  %v109_v27 = vld [vmem:[#allocation9 + $0x280] sm:$0xff] }
  0xdc   :  { %8159 = vmatpush3.bf16.msra.mxu0 %v9690_v43  ;;  %7174 = vmatprep.mubr.f32.mxu0 %v2944_v40  ;;  %v9789_v40 = vsub.f32 %v2843_v48, %v2881_v54  ;;  %v8188_v48 = vpack.c.bf16 %v2972_v16, %v2965_v29  ;;  %v8192_v29 = vpack.c.bf16 %v2986_v52, %v2979_v22  ;;  %v12098_v16 = vand.u32 4294901760, %v9807_v50 }
  0xdd   :  { %8161 = vmatprep.subr.bf16.mxu0 %v9699_v41  ;;  %v8196_v52 = vpack.c.bf16 %v3000_v20, %v2993_v42  ;;  %v3021_v22 = vand.u32 4294901760, %v3020_v7  ;;  %v9850_v20 = vsub.f32 %v9735_v32, %v2902_v13  ;;  %v3048_v7 = vsub.f32 %v9825_v3, %v12095_v51 }
  0xde   :  { %v12100_v54 = vand.u32 4294901760, %v9789_v40  ;;  %v3027_v62 = vsub.f32 %v9807_v50, %v12098_v16  ;;  %v9893_v51 = vpack.c.bf16 %v9789_v40, %v9787_v33 }
  0xdf   :  { %v12093_v32 = vand.u32 4294901760, %v9850_v20 }
  0xe0   :  { %8163 = vmatpush3.bf16.msra.mxu0 %v9699_v41  ;;  %v3013_v21 = vsub.f32 %v9789_v40, %v12100_v54  ;;  %v96_v54 = vld [vmem:[#allocation9 + $0x170] sm:$0xff] }
  0xe1   :  { %8165 = vmatprep.subr.bf16.mxu0 %v9704_v49 }
  0xe2   :  { %v3014_v0 = vand.u32 4294901760, %v3013_v21  ;;  %v3042_v21 = vand.u32 4294901760, %v3041_v47 }
  0xe4   :  { %8167 = vmatpush3.bf16.msra.mxu0 %v9704_v49 }
  0xe5   :  { %8169 = vmatprep.subr.bf16.mxu0 %v9710_v63 }
  0xe8   :  { %8171 = vmatpush3.bf16.msra.mxu0 %v9710_v63 }
  0xe9   :  { %8173 = vmatprep.subr.bf16.mxu0 %v9720_v9 }
  0xec   :  { %8175 = vmatpush3.bf16.msra.mxu0 %v9720_v9 }
  0xed   :  { %8177 = vmatprep.subr.bf16.mxu0 %v9742_v56 }
  0xf0   :  { %8179 = vmatpush3.bf16.msra.mxu0 %v9742_v56 }
  0xf1   :  { %8181 = vmatprep.subr.bf16.mxu0 %v9762_v31 }
  0xf4   :  { %8183 = vmatpush3.bf16.msra.mxu0 %v9762_v31 }
  0xf5   :  { %8185 = vmatprep.subr.bf16.mxu0 %v9777_v39 }
  0xf8   :  { %8187 = vmatpush3.bf16.msra.mxu0 %v9777_v39 }
  0xf9   :  { %8189 = vmatprep.subr.bf16.mxu0 %v8188_v48 }
  0xfb   :  { %7175 = vmatmul.mubr.f32.vlgmr.msra.gmra.mrb[4].mxu0 %v2954_v55  ;;  %v3007_v55 = vand.u32 4294901760, %v3006_v58  ;;  %v3035_v58 = vand.u32 4294901760, %v3034_v18 }
  0xfc   :  { %8191 = vmatpush3.bf16.msra.mxu0 %v8188_v48  ;;  %7209 = vmatprep.mubr.f32.mxu0 %v9682_v19  ;;  %v3028_v48 = vand.u32 4294901760, %v3027_v62  ;;  %v3062_v62 = vsub.f32 %v9850_v20, %v12093_v32  ;;  %v92_v32 = vld [vmem:[#allocation9 + $0x118] sm:$0xff] }
  0xfd   :  { %8193 = vmatprep.subr.bf16.mxu0 %v8192_v29  ;;  %v8200_v42 = vpack.c.bf16 %v3014_v0, %v3007_v55  ;;  %v3055_v0 = vsub.f32 %v9833_v12, %v12094_v38  ;;  %v97_v38 = vld [vmem:[#allocation9 + $0x178] sm:$0xff]  ;;  %v1033_v2 = vand.u32 4294901760, %v92_v32 }
  0xfe   :  { %v8204_v55 = vpack.c.bf16 %v3028_v48, %v3021_v22  ;;  %v3063_v47 = vand.u32 4294901760, %v3062_v62  ;;  %v1035_v36 = vand.u32 4294901760, %v97_v38 }
 0x100   :  { %8195 = vmatpush3.bf16.msra.mxu0 %v8192_v29  ;;  %v9855_v29 = vsub.f32 %v9745_v53, %v2905_v4  ;;  %v3049_v53 = vand.u32 4294901760, %v3048_v7  ;;  %v8208_v4 = vpack.c.bf16 %v3042_v21, %v3035_v58  ;;  %v8220_v58 = vpack.c.bf16 %v9727_v26, %v9725_v24  ;;  %v9876_v7 = vld [vmem:[#allocation9 + $0x18] sm:$0xff] }
 0x101   :  { %8197 = vmatprep.subr.bf16.mxu0 %v8196_v52  ;;  %v8224_v21 = vpack.c.bf16 %v9739_v46, %v9737_v37 }
 0x102   :  { %v12092_v13 = vand.u32 4294901760, %v9855_v29 }
 0x104   :  { %8199 = vmatpush3.bf16.msra.mxu0 %v8196_v52  ;;  %v3056_v52 = vand.u32 4294901760, %v3055_v0  ;;  %v3069_v22 = vsub.f32 %v9855_v29, %v12092_v13  ;;  %v9880_v0 = vld [vmem:[#allocation9 + $0x10] sm:$0xff]  ;;  %v88_v13 = vld [vmem:[#allocation9 + $0xc0] sm:$0xff] }
 0x105   :  { %8201 = vmatprep.subr.bf16.mxu0 %v8200_v42  ;;  %v12115_v62 = vand.u32 4294901760, %v9880_v0 }
 0x106   :  { %v8212_v18 = vpack.c.bf16 %v3056_v52, %v3049_v53  ;;  %v3070_v48 = vand.u32 4294901760, %v3069_v22  ;;  %v12108_v53 = vand.u32 4294901760, %v9876_v7  ;;  %v9885_v52 = vld [vmem:[#allocation9 + $0x68] sm:$0xff] }
 0x107   :  { %v89_v22 = vld [vmem:[#allocation9 + $0xc8] sm:$0xff] }
 0x108   :  { %8203 = vmatpush3.bf16.msra.mxu0 %v8200_v42  ;;  %v8216_v42 = vpack.c.bf16 %v3070_v48, %v3063_v47  ;;  %v8228_v47 = vpack.c.bf16 %v9759_v11, %v9753_v6  ;;  %v12114_v48 = vand.u32 4294901760, %v9885_v52 }
 0x109   :  { %8205 = vmatprep.subr.bf16.mxu0 %v8204_v55 }
 0x10a   :  { %v9917_v28 = vpack.c.bf16 %v12114_v48, %v12115_v62  ;;  %v1037_v48 = vand.u32 4294901760, %v96_v54  ;;  %v1041_v62 = vand.u32 4294901760, %v100_v23 }
 0x10c   :  { %8207 = vmatpush3.bf16.msra.mxu0 %v8204_v55  ;;  %v9878_v55 = vld [vmem:[#allocation9 + $0x70] sm:$0xff]  ;;  %12482 = vst [vmem:[#allocation23_spill] sm:$0xff] %v9917_v28  ;;  %v9942_v12 = vpack.c.bf16 %v1041_v62, %v1037_v48  ;;  %v9944_v3 = vsub.f32 %v96_v54, %v1037_v48  ;;  %v125_v48 = vld [vmem:[#allocation9 + $0x3e0] sm:$0xff] }
 0x10d   :  { %8209 = vmatprep.subr.bf16.mxu0 %v8208_v4 }
 0x10e   :  { %12490 = vst [vmem:[#allocation32_spill] sm:$0xff] %v9942_v12  ;;  %12491 = vst [vmem:[#allocation33_spill] sm:$0xff] %v9944_v3 }
 0x110   :  { %8211 = vmatpush3.bf16.msra.mxu0 %v8208_v4  ;;  %v12107_v4 = vand.u32 4294901760, %v9878_v55 }
 0x111   :  { %8213 = vmatprep.subr.bf16.mxu0 %v8212_v18 }
 0x112   :  { %v9907_v16 = vpack.c.bf16 %v12107_v4, %v12108_v53  ;;  %v1029_v53 = vand.u32 4294901760, %v88_v13 }
 0x114   :  { %8215 = vmatpush3.bf16.msra.mxu0 %v8212_v18  ;;  %v93_v18 = vld [vmem:[#allocation9 + $0x120] sm:$0xff]  ;;  %12481 = vst [vmem:[#allocation21_spill] sm:$0xff] %v9907_v16  ;;  %7965 = vmatprep.subr.bf16.mxu1 %v9907_v16  ;;  %v113_v16 = vld [vmem:[#allocation9 + $0x2d8] sm:$0xff] }
 0x115   :  { %8217 = vmatprep.subr.bf16.mxu0 %v8216_v42  ;;  %7967 = vmatpush1.bf16.msra.mxu1 %v9917_v28  ;;  %v9938_v28 = vpack.c.bf16 %v1039_v30, %v1035_v36 }
 0x117   :  { %12488 = vst [vmem:[#allocation31_spill] sm:$0xff] %v9938_v28 }
 0x118   :  { %8219 = vmatpush3.bf16.msra.mxu0 %v8216_v42  ;;  %v1027_v42 = vand.u32 4294901760, %v89_v22 }
 0x119   :  { %8221 = vmatprep.subr.bf16.mxu0 %v8220_v58 }
 0x11a   :  { %v9921_v35 = vsub.f32 %v89_v22, %v1027_v42  ;;  %v108_v22 = vld [vmem:[#allocation9 + $0x278] sm:$0xff] }
 0x11b   :  { %7210 = vmatmul.mubr.f32.vlgmr.msra.gmra.mrb[4].mxu0 %v9731_v59  ;;  %v9940_v59 = vsub.f32 %v101_v25, %v1039_v30 }
 0x11c   :  { %8223 = vmatpush3.bf16.msra.mxu0 %v8220_v58  ;;  %7244 = vmatprep.mubr.f32.mxu0 %v9687_v60  ;;  %v1031_v58 = vand.u32 4294901760, %v93_v18  ;;  %12484 = vst [vmem:[#allocation27_spill] sm:$0xff] %v9921_v35  ;;  %v9936_v35 = vld [vmem:[#allocation9 + $0x2d0] sm:$0xff] }
 0x11d   :  { %8225 = vmatprep.subr.bf16.mxu0 %v8224_v21  ;;  %12489 = vst [vmem:[#allocation34_spill] sm:$0xff] %v9940_v59  ;;  %v1053_v25 = vand.u32 4294901760, %v9936_v35 }
 0x11e   :  { %v9919_v45 = vpack.c.bf16 %v1031_v58, %v1027_v42  ;;  %v9924_v4 = vsub.f32 %v93_v18, %v1031_v58  ;;  %v9930_v42 = vsub.f32 %v88_v13, %v1029_v53  ;;  %v9932_v18 = vsub.f32 %v92_v32, %v1033_v2 }
 0x11f   :  { %v9934_v58 = vsub.f32 %v97_v38, %v1035_v36  ;;  %v9946_v13 = vsub.f32 %v100_v23, %v1041_v62  ;;  %v9948_v32 = vsub.f32 %v105_v10, %v1043_v57  ;;  %v1045_v38 = vand.u32 4294901760, %v104_v61  ;;  %v121_v62 = vld [vmem:[#allocation9 + $0x388] sm:$0xff] }
 0x120   :  { %12483 = vst [vmem:[#allocation25_spill] sm:$0xff] %v9919_v45  ;;  %8227 = vmatpush3.bf16.msra.mxu0 %v8224_v21  ;;  %12485 = vst [vmem:[#allocation28_spill] sm:$0xff] %v9924_v4  ;;  %7969 = vmatprep.subr.bf16.mxu1 %v9919_v45  ;;  %v9928_v21 = vpack.c.bf16 %v1033_v2, %v1029_v53  ;;  %v117_v4 = vld [vmem:[#allocation9 + $0x330] sm:$0xff]  ;;  %v116_v45 = vld [vmem:[#allocation9 + $0x328] sm:$0xff]  ;;  %v1047_v2 = vand.u32 4294901760, %v109_v27  ;;  %v1049_v36 = vand.u32 4294901760, %v108_v22 }
 0x121   :  { %8229 = vmatprep.subr.bf16.mxu0 %v8228_v47  ;;  %12487 = vst [vmem:[#allocation29_spill] sm:$0xff] %v9934_v58  ;;  %12492 = vst [vmem:[#allocation36_spill] sm:$0xff] %v9946_v13  ;;  %v1051_v53 = vand.u32 4294901760, %v113_v16  ;;  %v1055_v30 = vand.u32 4294901760, %v117_v4  ;;  %v9958_v23 = vsub.f32 %v104_v61, %v1045_v38  ;;  %v1057_v10 = vand.u32 4294901760, %v116_v45  ;;  %v124_v61 = vld [vmem:[#allocation9 + $0x3d8] sm:$0xff] }
 0x122   :  { %12486 = vst [vmem:[#allocation30_spill] sm:$0xff] %v9928_v21  ;;  %12493 = vst [vmem:[#allocation37_spill] sm:$0xff] %v9948_v32  ;;  %7971 = vmatpush1.bf16.msra.mxu1 %v9928_v21  ;;  %v9954_v54 = vpack.c.bf16 %v1047_v2, %v1043_v57  ;;  %v12497_v32 = vand.u32 4294901760, %v9876_v7  ;;  %v12499_v13 = vand.u32 4294901760, %v9878_v55 }
 0x123   :  { %7973 = vmatprep.subr.bf16.mxu1 %v9938_v28  ;;  %12496 = vst [vmem:[#allocation43_spill] sm:$0xff] %v9958_v23  ;;  %v9970_v28 = vsub.f32 %v108_v22, %v1049_v36  ;;  %v9972_v57 = vsub.f32 %v113_v16, %v1051_v53  ;;  %v12503_v23 = vand.u32 4294901760, %v9880_v0  ;;  %v133_v22 = vld [vmem:[#allocation9 + $0x490] sm:$0xff] }
 0x124   :  { %8231 = vmatpush3.bf16.msra.mxu0 %v8228_v47  ;;  %12494 = vst [vmem:[#allocation39_spill] sm:$0xff] %v9954_v54  ;;  %v9956_v47 = vsub.f32 %v109_v27, %v1047_v2  ;;  %v9963_v21 = vsub.f32 %v9876_v7, %v12497_v32  ;;  %v9968_v3 = vsub.f32 %v9878_v55, %v12499_v13  ;;  %v120_v27 = vld [vmem:[#allocation9 + $0x380] sm:$0xff]  ;;  %v129_v2 = vld [vmem:[#allocation9 + $0x438] sm:$0xff]  ;;  %v128_v16 = vld [vmem:[#allocation9 + $0x430] sm:$0xff]  ;;  %v12507_v13 = vand.u32 4294901760, %v9885_v52 }
 0x125   :  { %8233 = vmatprep.subr.bf16.mxu0 %v9893_v51  ;;  %12501 = vst [vmem:[#allocation46_spill] sm:$0xff] %v9970_v28  ;;  %12502 = vst [vmem:[#allocation47_spill] sm:$0xff] %v9972_v57  ;;  %v9980_v7 = vsub.f32 %v117_v4, %v1055_v30  ;;  %v9983_v32 = vsub.f32 %v9936_v35, %v1053_v25  ;;  %v9985_v55 = vsub.f32 %v116_v45, %v1057_v10  ;;  %v137_v57 = vld [vmem:[#allocation9 + $0x4e8] sm:$0xff] }
 0x126   :  { %12495 = vst [vmem:[#allocation42_spill] sm:$0xff] %v9956_v47  ;;  %12498 = vst [vmem:[#allocation44_spill] sm:$0xff] %v9963_v21  ;;  %v9978_v47 = vsub.f32 %v9880_v0, %v12503_v23  ;;  %7975 = vmatpush1.bf16.msra.mxu1 %v9942_v12  ;;  %v9994_v0 = vpack.c.bf16 %v1049_v36, %v1045_v38  ;;  %v1059_v4 = vand.u32 4294901760, %v121_v62  ;;  %v1063_v23 = vand.u32 4294901760, %v125_v48  ;;  %v141_v12 = vld [vmem:[#allocation9 + $0x540] sm:$0xff] }
 0x127   :  { %12500 = vst [vmem:[#allocation45_spill] sm:$0xff] %v9968_v3  ;;  %12504 = vst [vmem:[#allocation48_spill] sm:$0xff] %v9980_v7  ;;  %v132_v7 = vld [vmem:[#allocation9 + $0x488] sm:$0xff]  ;;  %7977 = vmatprep.subr.bf16.mxu1 %v9954_v54  ;;  %v9997_v35 = vpack.c.bf16 %v1055_v30, %v1051_v53  ;;  %v1061_v45 = vand.u32 4294901760, %v120_v27  ;;  %v136_v38 = vld [vmem:[#allocation9 + $0x4e0] sm:$0xff] }
 0x128   :  { %8235 = vmatpush3.bf16.msra.mxu0 %v9893_v51  ;;  %12505 = vst [vmem:[#allocation49_spill] sm:$0xff] %v9983_v32  ;;  %12506 = vst [vmem:[#allocation50_spill] sm:$0xff] %v9985_v55  ;;  %v9991_v51 = vsub.f32 %v9885_v52, %v12507_v13  ;;  %v1065_v55 = vand.u32 4294901760, %v124_v61  ;;  %v1067_v32 = vand.u32 4294901760, %v129_v2  ;;  %v9999_v28 = vsub.f32 %v121_v62, %v1059_v4  ;;  %v140_v54 = vld [vmem:[#allocation9 + $0x538] sm:$0xff] }
 0x129   :  { %8237 = vmatprep.subr.bf16.mxu0 %v9897_v44  ;;  %12509 = vst [vmem:[#allocation52_spill] sm:$0xff] %v9994_v0  ;;  %v10001_v59 = vsub.f32 %v125_v48, %v1063_v23  ;;  %v1071_v52 = vand.u32 4294901760, %v133_v22  ;;  %v1069_v13 = vand.u32 4294901760, %v128_v16  ;;  %v10004_v36 = vsub.f32 %v120_v27, %v1061_v45 }
 0x12a   :  { %12508 = vst [vmem:[#allocation51_spill] sm:$0xff] %v9991_v51  ;;  %12510 = vst [vmem:[#allocation53_spill] sm:$0xff] %v9999_v28  ;;  %v10006_v58 = vsub.f32 %v124_v61, %v1065_v55  ;;  %v10008_v53 = vsub.f32 %v129_v2, %v1067_v32  ;;  %v1073_v30 = vand.u32 4294901760, %v132_v7  ;;  %7979 = vmatpush1.bf16.msra.mxu1 %v9994_v0  ;;  %v1075_v28 = vand.u32 4294901760, %v137_v57 }
 0x12b   :  { %12511 = vst [vmem:[#allocation54_spill] sm:$0xff] %v10001_v59  ;;  %v10012_v62 = vpack.c.bf16 %v1057_v10, %v1053_v25  ;;  %v10014_v48 = vsub.f32 %v133_v22, %v1071_v52  ;;  %v10016_v59 = vsub.f32 %v128_v16, %v1069_v13  ;;  %7981 = vmatprep.subr.bf16.mxu1 %v9997_v35  ;;  %v1079_v61 = vand.u32 4294901760, %v141_v12 }
 0x12c   :  { %8239 = vmatpush3.bf16.msra.mxu0 %v9897_v44  ;;  %12512 = vst [vmem:[#allocation55_spill] sm:$0xff] %v10006_v58  ;;  %12513 = vst [vmem:[#allocation56_spill] sm:$0xff] %v10008_v53  ;;  %v10019_v44 = vpack.c.bf16 %v1063_v23, %v1059_v4  ;;  %v10021_v27 = vsub.f32 %v132_v7, %v1073_v30  ;;  %v1077_v2 = vand.u32 4294901760, %v136_v38  ;;  %v1081_v58 = vand.u32 4294901760, %v140_v54 }
 0x12d   :  { %8241 = vmatprep.subr.bf16.mxu0 %v9901_v8  ;;  %v10023_v53 = vsub.f32 %v137_v57, %v1075_v28  ;;  %v12161_v0 = vand.u32 4294901760, %v9963_v21  ;;  %v12156_v25 = vand.u32 4294901760, %v9968_v3  ;;  %v8248_v10 = vpack.c.bf16 %v9855_v29, %v9850_v20 }
 0x12e   :  { %v10030_v22 = vsub.f32 %v141_v12, %v1079_v61  ;;  %v10032_v16 = vsub.f32 %v136_v38, %v1077_v2  ;;  %7983 = vmatpush1.bf16.msra.mxu1 %v10012_v62  ;;  %v10036_v57 = vpack.c.bf16 %v1065_v55, %v1061_v45  ;;  %v10038_v7 = vsub.f32 %v140_v54, %v1081_v58 }
 0x12f   :  { %v12157_v4 = vand.u32 4294901760, %v9978_v47  ;;  %v12160_v23 = vand.u32 4294901760, %v9991_v51  ;;  %7985 = vmatprep.subr.bf16.mxu1 %v10019_v44  ;;  %v1130_v12 = vsub.f32 %v9963_v21, %v12161_v0  ;;  %v1142_v38 = vsub.f32 %v9968_v3, %v12156_v25 }
 0x130   :  { %8243 = vmatpush3.bf16.msra.mxu0 %v9901_v8  ;;  %v10043_v8 = vpack.c.bf16 %v1071_v52, %v1067_v32  ;;  %v10053_v54 = vpack.c.bf16 %v1073_v30, %v1069_v13  ;;  %v10062_v45 = vpack.c.bf16 %v1079_v61, %v1075_v28  ;;  %v12517_v28 = vand.u32 4294901760, %v9687_v60 }
 0x131   :  { %8245 = vmatprep.subr.bf16.mxu0 %v9911_v5  ;;  %v1136_v32 = vsub.f32 %v9978_v47, %v12157_v4  ;;  %v1148_v55 = vsub.f32 %v9991_v51, %v12160_v23  ;;  %v1131_v52 = vand.u32 4294901760, %v1130_v12  ;;  %v1143_v25 = vand.u32 4294901760, %v1142_v38  ;;  %v12553_v23 = vld [vmem:[#allocation49_spill] sm:$0xff] }
 0x132   :  { %7987 = vmatpush1.bf16.msra.mxu1 %v10036_v57  ;;  %12514 = vst [vmem:[#allocation57_spill] sm:$0xff] %v10053_v54  ;;  %12515 = vst [vmem:[#allocation58_spill] sm:$0xff] %v10062_v45  ;;  %v12519_v60 = vand.u32 4294901760, %v9725_v24  ;;  %v12523_v38 = vand.u32 4294901760, %v9751_v14  ;;  %v12524_v24 = vand.u32 4294901760, %v9753_v6  ;;  %v12530_v6 = vand.u32 4294901760, %v9812_v15 }
 0x133   :  { %7989 = vmatprep.subr.bf16.mxu1 %v10043_v8  ;;  %v1137_v13 = vand.u32 4294901760, %v1136_v32  ;;  %v1149_v30 = vand.u32 4294901760, %v1148_v55  ;;  %v7996_v4 = vpack.c.bf16 %v1143_v25, %v1131_v52  ;;  %v12526_v55 = vand.u32 4294901760, %v9787_v33  ;;  %v12532_v33 = vld [vmem:[#allocation24_spill] sm:$0xff] }
 0x134   :  { %8247 = vmatpush3.bf16.msra.mxu0 %v9911_v5  ;;  %v10066_v5 = vpack.c.bf16 %v1081_v58, %v1077_v2  ;;  %v12518_v58 = vld [vmem:[#allocation41_spill] sm:$0xff]  ;;  %v12520_v2 = vand.u32 4294901760, %v9727_v26  ;;  %v12525_v26 = vand.u32 4294901760, %v9759_v11  ;;  %v12529_v52 = vand.u32 4294901760, %v9807_v50 }
 0x135   :  { %8249 = vmatprep.subr.bf16.mxu0 %v8248_v10  ;;  %v7998_v61 = vpack.c.bf16 %v1149_v30, %v1137_v13  ;;  %v12531_v11 = vand.u32 4294901760, %v9815_v1  ;;  %v12537_v50 = vand.u32 4294901760, %v9855_v29  ;;  %v12539_v1 = vld [vmem:[#allocation19_spill] sm:$0xff]  ;;  %v12174_v0 = vand.u32 4294901760, %v12553_v23 }
 0x136   :  { %7991 = vmatpush1.bf16.msra.mxu1 %v10053_v54  ;;  %12516 = vst [vmem:[#allocation59_spill] sm:$0xff] %v10066_v5  ;;  %v8284_v25 = vpack.c.bf16 %v12520_v2, %v12519_v60  ;;  %v8292_v32 = vpack.c.bf16 %v12525_v26, %v12524_v24  ;;  %v144_v2 = vlaneseq  ;;  %v12562_v54 = vand.u32 4294901760, %v9932_v18 }
 0x137   :  { %7993 = vmatprep.subr.bf16.mxu1 %v10062_v45  ;;  %v8304_v30 = vpack.c.bf16 %v12531_v11, %v12530_v6  ;;  %v12543_v6 = vld [vmem:[#allocation29_spill] sm:$0xff] }
 0x138   :  { %8251 = vmatpush3.bf16.msra.mxu0 %v8248_v10  ;;  %v12521_v10 = vand.u32 4294901760, %v9737_v37  ;;  %v12527_v37 = vand.u32 4294901760, %v9789_v40  ;;  %v12534_v40 = vld [vmem:[#allocation26_spill] sm:$0xff]  ;;  %v10125_v15 = vshrl.u32 %v144_v2, 7  ;;  %v12171_v11 = vand.u32 4294901760, %v12543_v6 }
 0x139   :  { %8253 = vmatprep.subr.bf16.mxu0 %v9690_v43 }
 0x13a   :  { %7995 = vmatpush1.bf16.msra.mxu1 %v10066_v5  ;;  %12538 = vst [vmem:[#allocation41_spill] sm:$0xff] %v10125_v15  ;;  %v12158_v29 = vsub.s32 1, %v10125_v15  ;;  %v1178_v2 = vsub.f32 %v12543_v6, %v12171_v11  ;;  %v8034_v5 = vpack.c.bf16 %v9932_v18, %v9930_v42 }
 0x13b   :  { %7245 = vmatmul.mubr.f32.vlgmr.msra.gmra.mrb[4].mxu0 %v9751_v14  ;;  %7997 = vmatprep.subr.bf16.mxu1 %v7996_v4  ;;  %v12522_v4 = vand.u32 4294901760, %v9739_v46  ;;  %v8296_v46 = vpack.c.bf16 %v12527_v37, %v12526_v55  ;;  %v12528_v14 = vand.u32 4294901760, %v9801_v34  ;;  %v12536_v34 = vand.u32 4294901760, %v9850_v20  ;;  %v142_v20 = vld [vmem:[%s12060_s5] sm:$0xf] }
 0x13c   :  { %8255 = vmatpush3.bf16.msra.mxu0 %v9690_v43  ;;  %7279 = vmatprep.mubr.f32.mxu0 %v12517_v28  ;;  %v12533_v28 = vand.u32 4294901760, %v12532_v33  ;;  %v12180_v37 = vand.u32 4294901760, %v9930_v42 }
 0x13d   :  { %8257 = vmatprep.subr.bf16.mxu0 %v9699_v41  ;;  %1121 = vmatmul.mubr.f32.vlgmr.msra.gmra.mrb[2].mxu1 %v12518_v58  ;;  %v8288_v12 = vpack.c.bf16 %v12522_v4, %v12521_v10  ;;  %v8300_v13 = vpack.c.bf16 %v12529_v52, %v12528_v14  ;;  %v8312_v60 = vpack.c.bf16 %v12537_v50, %v12536_v34  ;;  %v12546_v34 = vld [vmem:[#allocation36_spill] sm:$0xff] }
 0x13e   :  { %7999 = vmatpush1.bf16.msra.mxu1 %v7998_v61  ;;  %1351 = vmatprep.mubr.f32.mxu1 %v12451_v17  ;;  %v12535_v61 = vand.u32 4294901760, %v12534_v40  ;;  %v151_v4 = vrot.slane %v142_v20, %v12158_v29  ;;  %v12166_v50 = vand.u32 4294901760, %v12546_v34 }
 0x140   :  { %8259 = vmatpush3.bf16.msra.mxu0 %v9699_v41  ;;  %v8308_v58 = vpack.c.bf16 %v12535_v61, %v12533_v28  ;;  %v12545_v61 = vld [vmem:[#allocation33_spill] sm:$0xff] }
 0x141   :  { %8261 = vmatprep.subr.bf16.mxu0 %v9704_v49 }
 0x144   :  { %8263 = vmatpush3.bf16.msra.mxu0 %v9704_v49 }
 0x145   :  { %8265 = vmatprep.subr.bf16.mxu0 %v9710_v63 }
 0x148   :  { %8267 = vmatpush3.bf16.msra.mxu0 %v9710_v63 }
 0x149   :  { %8269 = vmatprep.subr.bf16.mxu0 %v9720_v9 }
 0x14c   :  { %8271 = vmatpush3.bf16.msra.mxu0 %v9720_v9 }
 0x14d   :  { %8273 = vmatprep.subr.bf16.mxu0 %v9742_v56 }
 0x150   :  { %8275 = vmatpush3.bf16.msra.mxu0 %v9742_v56 }
 0x151   :  { %8277 = vmatprep.subr.bf16.mxu0 %v9762_v31 }
 0x154   :  { %8279 = vmatpush3.bf16.msra.mxu0 %v9762_v31 }
 0x155   :  { %8281 = vmatprep.subr.bf16.mxu0 %v9777_v39 }
 0x158   :  { %8283 = vmatpush3.bf16.msra.mxu0 %v9777_v39 }
 0x159   :  { %8285 = vmatprep.subr.bf16.mxu0 %v8284_v25 }
 0x15b   :  { %7280 = vmatmul.mubr.f32.vlgmr.msra.gmra.mrb[4].mxu0 %v12523_v38 }
 0x15c   :  { %8287 = vmatpush3.bf16.msra.mxu0 %v8284_v25  ;;  %7314 = vmatprep.mubr.f32.mxu0 %v9682_v19  ;;  %v12159_v25 = vsub.s32 0, %v10125_v15 }
 0x15d   :  { %8289 = vmatprep.subr.bf16.mxu0 %v8288_v12 }
 0x15e   :  { %v147_v10 = vrot.slane %v142_v20, %v12159_v25 }
 0x160   :  { %8291 = vmatpush3.bf16.msra.mxu0 %v8288_v12 }
 0x161   :  { %8293 = vmatprep.subr.bf16.mxu0 %v8292_v32 }
 0x164   :  { %8295 = vmatpush3.bf16.msra.mxu0 %v8292_v32 }
 0x165   :  { %8297 = vmatprep.subr.bf16.mxu0 %v8296_v46 }
 0x168   :  { %8299 = vmatpush3.bf16.msra.mxu0 %v8296_v46  ;;  %v1160_v46 = vsub.f32 %v9930_v42, %v12180_v37 }
 0x169   :  { %8301 = vmatprep.subr.bf16.mxu0 %v8300_v13 }
 0x16a   :  { %v1161_v28 = vand.u32 4294901760, %v1160_v46 }
 0x16c   :  { %8303 = vmatpush3.bf16.msra.mxu0 %v8300_v13 }
 0x16d   :  { %8305 = vmatprep.subr.bf16.mxu0 %v8304_v30 }
 0x170   :  { %8307 = vmatpush3.bf16.msra.mxu0 %v8304_v30  ;;  %v12544_v30 = vld [vmem:[#allocation34_spill] sm:$0xff] }
 0x171   :  { %8309 = vmatprep.subr.bf16.mxu0 %v8308_v58  ;;  %v12170_v33 = vand.u32 4294901760, %v12544_v30 }
 0x174   :  { %8311 = vmatpush3.bf16.msra.mxu0 %v8308_v58  ;;  %v12168_v58 = vand.u32 4294901760, %v12545_v61 }
 0x175   :  { %8313 = vmatprep.subr.bf16.mxu0 %v8312_v60 }
 0x178   :  { %8315 = vmatpush3.bf16.msra.mxu0 %v8312_v60 }
 0x179   :  { %8317 = vmatprep.subr.bf16.mxu0 %v9690_v43 }
 0x17b   :  { %7315 = vmatmul.mubr.f32.vlgmr.msra.gmra.mrb[4].mxu0 %v12539_v1 }
 0x17c   :  { %8319 = vmatpush3.bf16.msra.mxu0 %v9690_v43  ;;  %7349 = vmatprep.mubr.f32.mxu0 %v9682_v19 }
 0x17d   :  { %8321 = vmatprep.subr.bf16.mxu0 %v9699_v41 }
 0x180   :  { %8323 = vmatpush3.bf16.msra.mxu0 %v9699_v41  ;;  %v12541_v41 = vld [vmem:[#allocation27_spill] sm:$0xff] }
 0x181   :  { %8325 = vmatprep.subr.bf16.mxu0 %v9704_v49 }
 0x182   :  { %v636_v43 = vpop.f32.mrb[0].mxu1  ;;  %v1014_v12 = vpop.f32.mrb[0].mxu0 }
 0x183   :  { %v9020_v38 = vadd.f32 %v636_v43, %v147_v10  ;;  %v638_v24 = vpop.f32.mrb[1].mxu1  ;;  %v1016_v26 = vpop.f32.mrb[1].mxu0  ;;  %v1184_v10 = vsub.f32 %v12545_v61, %v12168_v58  ;;  %v1179_v43 = vand.u32 4294901760, %v1178_v2  ;;  %v12556_v58 = vld [vmem:[#allocation54_spill] sm:$0xff] }
 0x184   :  { %v9022_v32 = vadd.f32 %v638_v24, %v151_v4  ;;  %8327 = vmatpush3.bf16.msra.mxu0 %v9704_v49  ;;  %v12182_v49 = vand.u32 4294901760, %v12541_v41  ;;  %v1196_v4 = vsub.f32 %v12546_v34, %v12166_v50 }
 0x185   :  { %v9021_v19 = vadd.f32 %v9020_v38, %v1014_v12  ;;  %8329 = vmatprep.subr.bf16.mxu0 %v9710_v63  ;;  %v12547_v38 = vld [vmem:[#allocation37_spill] sm:$0xff] }
 0x186   :  { %v10145_v55 = vadd.f32 %v9022_v32, %v1016_v26  ;;  %v12165_v24 = vand.u32 4294901760, %v12547_v38  ;;  %v12548_v26 = vld [vmem:[#allocation42_spill] sm:$0xff] }
 0x187   :  { %2852 = vst [vmem:[#allocation2] sm:$0x3] %v9021_v19  ;;  %2853 = vst [vmem:[#allocation2 + $0x2] sm:$0x3] %v9021_v19  ;;  %v12163_v32 = vand.u32 4294901760, %v12548_v26 }
 0x188   :  { %12540 = vst [vmem:[#allocation24_spill] sm:$0xff] %v10145_v55  ;;  %2854 = vst [vmem:[#allocation2 + $0x4] sm:$0x3] %v9021_v19  ;;  %8331 = vmatpush3.bf16.msra.mxu0 %v9710_v63  ;;  %v12542_v63 = vld [vmem:[#allocation28_spill] sm:$0xff] }
 0x189   :  { %2855 = vst [vmem:[#allocation2 + $0x6] sm:$0x3] %v9021_v19  ;;  %2856 = vst [vmem:[#allocation2 + $0x8] sm:$0x3] %v9021_v19  ;;  %8333 = vmatprep.subr.bf16.mxu0 %v9720_v9  ;;  %v1185_v19 = vand.u32 4294901760, %v1184_v10  ;;  %v8032_v55 = vpack.c.bf16 %v12542_v63, %v12541_v41 }
 0x18c   :  { %8335 = vmatpush3.bf16.msra.mxu0 %v9720_v9  ;;  %v12181_v9 = vand.u32 4294901760, %v12542_v63 }
 0x18d   :  { %8337 = vmatprep.subr.bf16.mxu0 %v9742_v56 }
 0x190   :  { %8339 = vmatpush3.bf16.msra.mxu0 %v9742_v56  ;;  %v12179_v56 = vand.u32 4294901760, %v9932_v18 }
 0x191   :  { %8341 = vmatprep.subr.bf16.mxu0 %v9762_v31 }
 0x192   :  { %v1172_v14 = vsub.f32 %v9932_v18, %v12179_v56  ;;  %v1315_v56 = vand.u32 4294901760, %v10038_v7 }
 0x194   :  { %8343 = vmatpush3.bf16.msra.mxu0 %v9762_v31  ;;  %v1154_v31 = vsub.f32 %v12541_v41, %v12182_v49  ;;  %v1173_v40 = vand.u32 4294901760, %v1172_v14  ;;  %v12550_v14 = vld [vmem:[#allocation46_spill] sm:$0xff]  ;;  %v8028_v49 = vpack.c.bf16 %v9968_v3, %v9963_v21  ;;  %v8038_v3 = vpack.c.bf16 %v12546_v34, %v12545_v61 }
 0x195   :  { %8345 = vmatprep.subr.bf16.mxu0 %v9777_v39  ;;  %v12560_v21 = vand.u32 4294901760, %v12542_v63  ;;  %v12570_v18 = vand.u32 4294901760, %v12550_v14 }
 0x196   :  { %v1155_v52 = vand.u32 4294901760, %v1154_v31  ;;  %v8002_v20 = vpack.c.bf16 %v1173_v40, %v1161_v28  ;;  %v1197_v31 = vand.u32 4294901760, %v1196_v4  ;;  %v1202_v28 = vsub.f32 %v12547_v38, %v12165_v24  ;;  %v12552_v4 = vld [vmem:[#allocation48_spill] sm:$0xff] }
 0x197   :  { %v1214_v40 = vsub.f32 %v12548_v26, %v12163_v32  ;;  %v12554_v32 = vld [vmem:[#allocation50_spill] sm:$0xff] }
 0x198   :  { %8347 = vmatpush3.bf16.msra.mxu0 %v9777_v39  ;;  %v1166_v39 = vsub.f32 %v12542_v63, %v12181_v9  ;;  %v1316_v9 = vsub.f32 %v10038_v7, %v1315_v56 }
 0x199   :  { %v1215_v29 = vand.u32 4294901760, %v1214_v40 }
 0x19a   :  { %v1167_v13 = vand.u32 4294901760, %v1166_v39  ;;  %v12549_v39 = vld [vmem:[#allocation43_spill] sm:$0xff]  ;;  %v1317_v15 = vand.u32 4294901760, %v1316_v9 }
 0x19b   :  { %7350 = vmatmul.mubr.f32.vlgmr.msra.gmra.mrb[4].mxu0 %v12539_v1  ;;  %v1190_v1 = vsub.f32 %v12544_v30, %v12170_v33  ;;  %v12162_v46 = vand.u32 4294901760, %v12549_v39 }
 0x19c   :  { %3797 = vmatprep.mubr.f32.mxu0 %v12451_v17  ;;  %v8000_v60 = vpack.c.bf16 %v1167_v13, %v1155_v52  ;;  %v12164_v52 = vand.u32 4294901760, %v12550_v14 }
 0x19d   :  { %v1191_v12 = vand.u32 4294901760, %v1190_v1  ;;  %v8006_v1 = vpack.c.bf16 %v1197_v31, %v1185_v19 }
 0x19e   :  { %8001 = vmatprep.subr.bf16.mxu1 %v8000_v60  ;;  %v12551_v60 = vld [vmem:[#allocation47_spill] sm:$0xff]  ;;  %v1220_v10 = vsub.f32 %v12550_v14, %v12164_v52  ;;  %v12173_v52 = vand.u32 4294901760, %v12554_v32 }
 0x19f   :  { %8003 = vmatpush1.bf16.msra.mxu1 %v8002_v20  ;;  %v8004_v13 = vpack.c.bf16 %v1191_v12, %v1179_v43  ;;  %v12167_v2 = vand.u32 4294901760, %v12551_v60  ;;  %v1208_v20 = vsub.f32 %v12549_v39, %v12162_v46  ;;  %v12169_v43 = vand.u32 4294901760, %v12552_v4 }
 0x1a0   :  { %v1203_v12 = vand.u32 4294901760, %v1202_v28  ;;  %v1221_v31 = vand.u32 4294901760, %v1220_v10  ;;  %v12555_v10 = vld [vmem:[#allocation53_spill] sm:$0xff]  ;;  %v8044_v9 = vpack.c.bf16 %v12552_v4, %v12551_v60 }
 0x1a1   :  { %8005 = vmatprep.subr.bf16.mxu1 %v8004_v13  ;;  %v1226_v25 = vsub.f32 %v12551_v60, %v12167_v2  ;;  %v1209_v19 = vand.u32 4294901760, %v1208_v20  ;;  %v1238_v46 = vsub.f32 %v12552_v4, %v12169_v43  ;;  %v1232_v13 = vsub.f32 %v12553_v23, %v12174_v0 }
 0x1a2   :  { %v8008_v24 = vpack.c.bf16 %v1215_v29, %v1203_v12  ;;  %v12172_v2 = vand.u32 4294901760, %v12555_v10  ;;  %v12176_v43 = vand.u32 4294901760, %v12556_v58  ;;  %v12557_v12 = vld [vmem:[#allocation55_spill] sm:$0xff]  ;;  %v1285_v0 = vand.u32 4294901760, %v10014_v48 }
 0x1a3   :  { %8007 = vmatpush1.bf16.msra.mxu1 %v8006_v1  ;;  %v1227_v50 = vand.u32 4294901760, %v1226_v25  ;;  %v8010_v28 = vpack.c.bf16 %v1221_v31, %v1209_v19  ;;  %v1239_v40 = vand.u32 4294901760, %v1238_v46  ;;  %v1244_v1 = vsub.f32 %v12554_v32, %v12173_v52 }
 0x1a4   :  { %8009 = vmatprep.subr.bf16.mxu1 %v8008_v24  ;;  %v1233_v20 = vand.u32 4294901760, %v1232_v13  ;;  %v12175_v25 = vand.u32 4294901760, %v10004_v36  ;;  %v12177_v11 = vand.u32 4294901760, %v12557_v12  ;;  %v1250_v46 = vsub.f32 %v12555_v10, %v12172_v2 }
 0x1a5   :  { %v8012_v33 = vpack.c.bf16 %v1239_v40, %v1227_v50  ;;  %v1245_v29 = vand.u32 4294901760, %v1244_v1  ;;  %v1262_v24 = vsub.f32 %v12556_v58, %v12176_v43  ;;  %v12558_v40 = vld [vmem:[#allocation56_spill] sm:$0xff] }
 0x1a6   :  { %v1256_v31 = vsub.f32 %v10004_v36, %v12175_v25  ;;  %v1268_v50 = vsub.f32 %v12557_v12, %v12177_v11  ;;  %v1251_v13 = vand.u32 4294901760, %v1250_v46  ;;  %v12178_v1 = vand.u32 4294901760, %v12558_v40 }
 0x1a7   :  { %8011 = vmatpush1.bf16.msra.mxu1 %v8010_v28  ;;  %v8014_v19 = vpack.c.bf16 %v1245_v29, %v1233_v20  ;;  %v1263_v28 = vand.u32 4294901760, %v1262_v24  ;;  %v1291_v25 = vand.u32 4294901760, %v10021_v27  ;;  %v1286_v46 = vsub.f32 %v10014_v48, %v1285_v0 }
 0x1a8   :  { %8013 = vmatprep.subr.bf16.mxu1 %v8012_v33  ;;  %v1257_v2 = vand.u32 4294901760, %v1256_v31  ;;  %v1269_v52 = vand.u32 4294901760, %v1268_v50  ;;  %v1279_v33 = vand.u32 4294901760, %v10016_v59  ;;  %v1274_v29 = vsub.f32 %v12558_v40, %v12178_v1 }
 0x1a9   :  { %v8016_v20 = vpack.c.bf16 %v1263_v28, %v1251_v13  ;;  %v1292_v31 = vsub.f32 %v10021_v27, %v1291_v25  ;;  %v1297_v50 = vand.u32 4294901760, %v10023_v53  ;;  %v1309_v11 = vand.u32 4294901760, %v10030_v22 }
 0x1aa   :  { %v8018_v43 = vpack.c.bf16 %v1269_v52, %v1257_v2  ;;  %v1280_v24 = vsub.f32 %v10016_v59, %v1279_v33  ;;  %v1287_v13 = vand.u32 4294901760, %v1286_v46  ;;  %v1303_v1 = vand.u32 4294901760, %v10032_v16 }
 0x1ab   :  { %8015 = vmatpush1.bf16.msra.mxu1 %v8014_v19  ;;  %v1275_v19 = vand.u32 4294901760, %v1274_v29  ;;  %v1293_v52 = vand.u32 4294901760, %v1292_v31  ;;  %v1298_v2 = vsub.f32 %v10023_v53, %v1297_v50  ;;  %v1310_v37 = vsub.f32 %v10030_v22, %v1309_v11 }
 0x1ac   :  { %8017 = vmatprep.subr.bf16.mxu1 %v8016_v20  ;;  %v1281_v28 = vand.u32 4294901760, %v1280_v24  ;;  %v1304_v29 = vsub.f32 %v10032_v16, %v1303_v1 }
 0x1ad   :  { %v8020_v20 = vpack.c.bf16 %v1287_v13, %v1275_v19  ;;  %v1299_v46 = vand.u32 4294901760, %v1298_v2  ;;  %v1311_v24 = vand.u32 4294901760, %v1310_v37  ;;  %v8036_v19 = vpack.c.bf16 %v12544_v30, %v12543_v6 }
 0x1ae   :  { %v1305_v31 = vand.u32 4294901760, %v1304_v29  ;;  %v8040_v37 = vpack.c.bf16 %v12548_v26, %v12547_v38  ;;  %v8046_v2 = vpack.c.bf16 %v12554_v32, %v12553_v23  ;;  %v8050_v29 = vpack.c.bf16 %v12557_v12, %v10004_v36 }
 0x1af   :  { %8019 = vmatpush1.bf16.msra.mxu1 %v8018_v43  ;;  %v8022_v43 = vpack.c.bf16 %v1293_v52, %v1281_v28  ;;  %v8024_v13 = vpack.c.bf16 %v1311_v24, %v1299_v46  ;;  %v8042_v28 = vpack.c.bf16 %v12550_v14, %v12549_v39  ;;  %v8054_v46 = vpack.c.bf16 %v10021_v27, %v10016_v59 }
 0x1b0   :  { %8021 = vmatprep.subr.bf16.mxu1 %v8020_v20  ;;  %v8026_v52 = vpack.c.bf16 %v1317_v15, %v1305_v31  ;;  %v8048_v20 = vpack.c.bf16 %v12556_v58, %v12555_v10  ;;  %v8056_v15 = vpack.c.bf16 %v10030_v22, %v10023_v53  ;;  %v8030_v24 = vpack.c.bf16 %v9991_v51, %v9978_v47 }
 0x1b1   :  { %v8058_v31 = vpack.c.bf16 %v10038_v7, %v10032_v16  ;;  %v12563_v27 = vand.u32 4294901760, %v12543_v6  ;;  %v12564_v53 = vand.u32 4294901760, %v12544_v30  ;;  %v12565_v51 = vand.u32 4294901760, %v12545_v61 }
 0x1b2   :  { %v12566_v16 = vand.u32 4294901760, %v12546_v34  ;;  %v12571_v6 = vand.u32 4294901760, %v12551_v60  ;;  %v12572_v30 = vand.u32 4294901760, %v12552_v4  ;;  %v12573_v61 = vand.u32 4294901760, %v12553_v23 }
 0x1b3   :  { %8023 = vmatpush1.bf16.msra.mxu1 %v8022_v43  ;;  %v8052_v43 = vpack.c.bf16 %v10014_v48, %v12558_v40  ;;  %v12561_v48 = vand.u32 4294901760, %v9930_v42  ;;  %v8100_v22 = vpack.c.bf16 %v12564_v53, %v12563_v27  ;;  %v12569_v42 = vand.u32 4294901760, %v12549_v39  ;;  %v12580_v53 = vld [vmem:[#allocation35_spill] sm:$0xff] }
 0x1b4   :  { %8025 = vmatprep.subr.bf16.mxu1 %v8024_v13  ;;  %v12559_v13 = vand.u32 4294901760, %v12541_v41  ;;  %v8102_v7 = vpack.c.bf16 %v12566_v16, %v12565_v51  ;;  %v12567_v41 = vand.u32 4294901760, %v12547_v38  ;;  %v12574_v51 = vand.u32 4294901760, %v12554_v32  ;;  %v12589_v32 = vld [vmem:[#allocation52_spill] sm:$0xff] }
 0x1b5   :  { %v8098_v59 = vpack.c.bf16 %v12562_v54, %v12561_v48  ;;  %v8106_v54 = vpack.c.bf16 %v12570_v18, %v12569_v42  ;;  %v12575_v38 = vand.u32 4294901760, %v12555_v10  ;;  %v12577_v39 = vand.u32 4294901760, %v10004_v36  ;;  %v12582_v36 = vld [vmem:[#allocation38_spill] sm:$0xff]  ;;  %v12590_v10 = vld [vmem:[#allocation57_spill] sm:$0xff]  ;;  %v10389_v18 = vld [vmem:[#allocation9 + $0x98] sm:$0xff] }
 0x1b6   :  { %v8096_v45 = vpack.c.bf16 %v12560_v21, %v12559_v13  ;;  %v12568_v21 = vand.u32 4294901760, %v12548_v26  ;;  %v8110_v34 = vpack.c.bf16 %v12574_v51, %v12573_v61  ;;  %v12576_v26 = vand.u32 4294901760, %v12556_v58  ;;  %v12588_v58 = vld [vmem:[#allocation39_spill] sm:$0xff]  ;;  %v10387_v42 = vld [vmem:[#allocation9 + $0x40] sm:$0xff] }
 0x1b7   :  { %8027 = vmatpush1.bf16.msra.mxu1 %v8026_v52  ;;  %v8108_v52 = vpack.c.bf16 %v12572_v30, %v12571_v6  ;;  %v12578_v14 = vand.u32 4294901760, %v12557_v12  ;;  %v12579_v60 = vand.u32 4294901760, %v12558_v40  ;;  %v8118_v4 = vpack.c.bf16 %v1291_v25, %v1279_v33  ;;  %v12591_v25 = vld [vmem:[#allocation58_spill] sm:$0xff]  ;;  %v12592_v12 = vld [vmem:[#allocation44_spill] sm:$0xff] }
 0x1b8   :  { %v8104_v63 = vpack.c.bf16 %v12568_v21, %v12567_v41  ;;  %8029 = vmatprep.subr.bf16.mxu1 %v8028_v49  ;;  %v8112_v49 = vpack.c.bf16 %v12576_v26, %v12575_v38  ;;  %v8120_v27 = vpack.c.bf16 %v1309_v11, %v1297_v50  ;;  %v8122_v23 = vpack.c.bf16 %v1315_v56, %v1303_v1  ;;  %v12583_v56 = vld [vmem:[#allocation23_spill] sm:$0xff]  ;;  %v12587_v11 = vld [vmem:[#allocation32_spill] sm:$0xff]  ;;  %v12594_v1 = vld [vmem:[#allocation45_spill] sm:$0xff] }
 0x1b9   :  { %v8114_v13 = vpack.c.bf16 %v12578_v14, %v12577_v39  ;;  %v8116_v48 = vpack.c.bf16 %v1285_v0, %v12579_v60  ;;  %v12581_v0 = vld [vmem:[#allocation21_spill] sm:$0xff]  ;;  %v12593_v40 = vand.u32 4294901760, %v12592_v12  ;;  %v12595_v33 = vand.u32 4294901760, %v12594_v1  ;;  %v3638_v41 = vld [vmem:[#allocation9 + $0x30] sm:$0xff] }
 0x1ba   :  { %1353 = vmatmul.mubr.f32.vlgmr.msra.gmra.mrb[2].mxu1 %v12580_v53  ;;  %v4556_v6 = vand.u32 4294901760, %v10387_v42  ;;  %v4560_v30 = vand.u32 4294901760, %v10389_v18  ;;  %v3641_v61 = vld [vmem:[#allocation9 + $0x80] sm:$0xff]  ;;  %v10404_v39 = vld [vmem:[#allocation9 + $0x90] sm:$0xff]  ;;  %v3652_v12 = vld [vmem:[#allocation9 + $0x148] sm:$0xff] }
 0x1bb   :  { %8031 = vmatpush1.bf16.msra.mxu1 %v8030_v24  ;;  %1487 = vmatprep.mubr.f32.mxu1 %v12451_v17  ;;  %v8092_v50 = vpack.c.bf16 %v12595_v33, %v12593_v40  ;;  %v6826_v24 = vld [vmem:[%s12060_s5 + $0x9] ss:$0 sm:$0xff]  ;;  %v3645_v40 = vld [vmem:[#allocation9 + $0xd8] sm:$0xff] }
 0x1bc   :  { %8033 = vmatprep.subr.bf16.mxu1 %v8032_v55  ;;  %v12586_v55 = vld [vmem:[#allocation31_spill] sm:$0xff]  ;;  %v3646_v14 = vld [vmem:[#allocation9 + $0xe0] sm:$0xff] }
 0x1bf   :  { %8035 = vmatpush1.bf16.msra.mxu1 %v8034_v5  ;;  %v12584_v5 = vld [vmem:[#allocation25_spill] sm:$0xff] }
 0x1c0   :  { %8037 = vmatprep.subr.bf16.mxu1 %v8036_v19  ;;  %v12596_v19 = vld [vmem:[#allocation59_spill] sm:$0xff] }
 0x1c3   :  { %8039 = vmatpush1.bf16.msra.mxu1 %v8038_v3  ;;  %v12585_v3 = vld [vmem:[#allocation30_spill] sm:$0xff] }
 0x1c4   :  { %8041 = vmatprep.subr.bf16.mxu1 %v8040_v37  ;;  %v12597_v37 = vand.u32 4294901760, %v9978_v47  ;;  %v2858_v47 = vld [vmem:[#allocation2 + $0x8] sm:$0x3] }
 0x1c7   :  { %8043 = vmatpush1.bf16.msra.mxu1 %v8042_v28  ;;  %v12598_v28 = vld [vmem:[#allocation51_spill] sm:$0xff] }
 0x1c8   :  { %8045 = vmatprep.subr.bf16.mxu1 %v8044_v9  ;;  %v12599_v9 = vand.u32 4294901760, %v12598_v28 }
 0x1cb   :  { %8047 = vmatpush1.bf16.msra.mxu1 %v8046_v2  ;;  %v8094_v2 = vpack.c.bf16 %v12599_v9, %v12597_v37 }
 0x1cc   :  { %8049 = vmatprep.subr.bf16.mxu1 %v8048_v20  ;;  %v12600_v20 = vld [vmem:[#allocation40_spill] sm:$0xff] }
 0x1cf   :  { %8051 = vmatpush1.bf16.msra.mxu1 %v8050_v29 }
 0x1d0   :  { %8053 = vmatprep.subr.bf16.mxu1 %v8052_v43  ;;  %v2857_v43 = vld [vmem:[#allocation2] sm:$0xff] }
 0x1d3   :  { %8055 = vmatpush1.bf16.msra.mxu1 %v8054_v46 }
 0x1d4   :  { %8057 = vmatprep.subr.bf16.mxu1 %v8056_v15 }
 0x1d7   :  { %8059 = vmatpush1.bf16.msra.mxu1 %v8058_v31 }
 0x1d8   :  { %8061 = vmatprep.subr.bf16.mxu1 %v12581_v0 }
 0x1da   :  { %1490 = vmatmul.mubr.f32.vlgmr.msra.gmra.mrb[2].mxu1 %v12582_v36  ;;  %v3650_v36 = vld [vmem:[#allocation9 + $0x138] sm:$0xff] }
 0x1db   :  { %8063 = vmatpush1.bf16.msra.mxu1 %v12583_v56  ;;  %1592 = vmatprep.mubr.f32.mxu1 %v12451_v17 }
 0x1dc   :  { %8065 = vmatprep.subr.bf16.mxu1 %v12584_v5 }
 0x1df   :  { %8067 = vmatpush1.bf16.msra.mxu1 %v12585_v3 }
 0x1e0   :  { %8069 = vmatprep.subr.bf16.mxu1 %v12586_v55 }
 0x1e3   :  { %8071 = vmatpush1.bf16.msra.mxu1 %v12587_v11 }
 0x1e4   :  { %8073 = vmatprep.subr.bf16.mxu1 %v12588_v58 }
 0x1e7   :  { %8075 = vmatpush1.bf16.msra.mxu1 %v12589_v32 }
 0x1e8   :  { %8077 = vmatprep.subr.bf16.mxu1 %v9997_v35 }
 0x1eb   :  { %8079 = vmatpush1.bf16.msra.mxu1 %v10012_v62 }
 0x1ec   :  { %8081 = vmatprep.subr.bf16.mxu1 %v10019_v44 }
 0x1ef   :  { %8083 = vmatpush1.bf16.msra.mxu1 %v10036_v57 }
 0x1f0   :  { %8085 = vmatprep.subr.bf16.mxu1 %v10043_v8 }
 0x1f3   :  { %8087 = vmatpush1.bf16.msra.mxu1 %v12590_v10 }
 0x1f4   :  { %8089 = vmatprep.subr.bf16.mxu1 %v12591_v25 }
 0x1f7   :  { %8091 = vmatpush1.bf16.msra.mxu1 %v12596_v19 }
 0x1f8   :  { %8093 = vmatprep.subr.bf16.mxu1 %v8092_v50  ;;  %v3713_v50 = vand.u32 4294901760, %v3650_v36 }
 0x1fa   :  { %1596 = vmatmul.mubr.f32.vlgmr.msra.gmra.mrb[2].mxu1 %v12600_v20  ;;  %v3647_v20 = vld [vmem:[#allocation9 + $0xe8] sm:$0xff] }
 0x1fb   :  { %8095 = vmatpush1.bf16.msra.mxu1 %v8094_v2  ;;  %1762 = vmatprep.mubr.f32.mxu1 %v12451_v17 }
 0x1fc   :  { %8097 = vmatprep.subr.bf16.mxu1 %v8096_v45 }
 0x1ff   :  { %8099 = vmatpush1.bf16.msra.mxu1 %v8098_v59 }
 0x200   :  { %8101 = vmatprep.subr.bf16.mxu1 %v8100_v22 }
 0x203   :  { %8103 = vmatpush1.bf16.msra.mxu1 %v8102_v7 }
 0x204   :  { %8105 = vmatprep.subr.bf16.mxu1 %v8104_v63  ;;  %v3701_v63 = vand.u32 4294901760, %v3638_v41 }
 0x206   :  { %v10400_v38 = vsub.f32 %v3638_v41, %v3701_v63 }
 0x207   :  { %8107 = vmatpush1.bf16.msra.mxu1 %v8106_v54 }
 0x208   :  { %8109 = vmatprep.subr.bf16.mxu1 %v8108_v52  ;;  %v3637_v52 = vld [vmem:[#allocation9 + $0x28] sm:$0xff] }
 0x209   :  { %v3703_v26 = vand.u32 4294901760, %v3637_v52 }
 0x20b   :  { %8111 = vmatpush1.bf16.msra.mxu1 %v8110_v34 }
 0x20c   :  { %8113 = vmatprep.subr.bf16.mxu1 %v8112_v49  ;;  %v10402_v49 = vld [vmem:[#allocation9 + $0x38] sm:$0xff] }
 0x20f   :  { %8115 = vmatpush1.bf16.msra.mxu1 %v8114_v13 }
 0x210   :  { %8117 = vmatprep.subr.bf16.mxu1 %v8116_v48  ;;  %v10414_v48 = vsub.f32 %v10387_v42, %v4556_v6 }
 0x213   :  { %8119 = vmatpush1.bf16.msra.mxu1 %v8118_v4  ;;  %v12602_v4 = vld [vmem:[#allocation18_spill] sm:$0xff] }
 0x214   :  { %8121 = vmatprep.subr.bf16.mxu1 %v8120_v27 }
 0x217   :  { %8123 = vmatpush1.bf16.msra.mxu1 %v8122_v23  ;;  %v10422_v23 = vsub.f32 %v10389_v18, %v4560_v30 }
 0x218   :  { %8125 = vmatprep.subr.bf16.mxu1 %v12581_v0  ;;  %v3707_v0 = vand.u32 4294901760, %v3641_v61 }
 0x219   :  { %12603 = vst [vmem:[#allocation19_spill] sm:$0xff] %v10422_v23 }
 0x21a   :  { %1764 = vmatmul.mubr.f32.vlgmr.msra.gmra.mrb[2].mxu1 %v12580_v53 }
 0x21b   :  { %8127 = vmatpush1.bf16.msra.mxu1 %v12583_v56  ;;  %1866 = vmatprep.mubr.f32.mxu1 %v12451_v17  ;;  %v10426_v56 = vsub.f32 %v3637_v52, %v3703_v26 }
 0x21c   :  { %8129 = vmatprep.subr.bf16.mxu1 %v12584_v5  ;;  %v4558_v5 = vand.u32 4294901760, %v10402_v49 }
 0x21d   :  { %12604 = vst [vmem:[#allocation27_spill] sm:$0xff] %v10426_v56 }
 0x21e   :  { %v10437_v1 = vsub.f32 %v10402_v49, %v4558_v5 }
 0x21f   :  { %8131 = vmatpush1.bf16.msra.mxu1 %v12585_v3  ;;  %v4562_v3 = vand.u32 4294901760, %v10404_v39 }
 0x220   :  { %8133 = vmatprep.subr.bf16.mxu1 %v12586_v55  ;;  %v3709_v55 = vand.u32 4294901760, %v3646_v14  ;;  %12606 = vst [vmem:[#allocation29_spill] sm:$0xff] %v10437_v1 }
 0x221   :  { %v10440_v33 = vsub.f32 %v10404_v39, %v4562_v3  ;;  %v10486_v52 = vpack.c.bf16 %v4562_v3, %v4558_v5 }
 0x222   :  { %v10443_v9 = vsub.f32 %v3646_v14, %v3709_v55 }
 0x223   :  { %8135 = vmatpush1.bf16.msra.mxu1 %v12587_v11  ;;  %v3648_v11 = vld [vmem:[#allocation9 + $0xf0] sm:$0xff]  ;;  %12613 = vst [vmem:[#allocation37_spill] sm:$0xff] %v10486_v52 }
 0x224   :  { %8137 = vmatprep.subr.bf16.mxu1 %v12588_v58  ;;  %v4564_v2 = vand.u32 4294901760, %v3648_v11 }
 0x227   :  { %8139 = vmatpush1.bf16.msra.mxu1 %v12589_v32 }
 0x228   :  { %8141 = vmatprep.subr.bf16.mxu1 %v9997_v35  ;;  %v9297_v35 = vmov 0  }
 0x229   :  { %9141 = vset.pattern.permute.xlu0 %v9297_v35  ;;  %9140 = vset.pattern.permute.xlu1 %v9297_v35 }
 0x22b   :  { %8143 = vmatpush1.bf16.msra.mxu1 %v10012_v62  ;;  %v1877_v62 = vld [vmem:[#allocation10 + $0x18] sm:$0xff] }
 0x22c   :  { %8145 = vmatprep.subr.bf16.mxu1 %v10019_v44  ;;  %v1876_v44 = vld [vmem:[#allocation10 + $0x10] sm:$0xff]  ;;  %v10383_v21 = vand.u32 4294901760, %v1877_v62 }
 0x22e   :  { %v10398_v34 = vsub.f32 %v1877_v62, %v10383_v21 }
 0x22f   :  { %8147 = vmatpush1.bf16.msra.mxu1 %v10036_v57  ;;  %v10385_v57 = vand.u32 4294901760, %v1876_v44 }
 0x230   :  { %8149 = vmatprep.subr.bf16.mxu1 %v10043_v8  ;;  %v3642_v8 = vld [vmem:[#allocation9 + $0x88] sm:$0xff]  ;;  %v2449_v27 = vand.u32 4294901760, %v10398_v34 }
 0x231   :  { %v3705_v54 = vand.u32 4294901760, %v3642_v8  ;;  %v10395_v51 = vsub.f32 %v1876_v44, %v10385_v57 }
 0x232   :  { %v2450_v58 = vsub.f32 %v10398_v34, %v2449_v27 }
 0x233   :  { %8151 = vmatpush1.bf16.msra.mxu1 %v12590_v10  ;;  %v10407_v13 = vpack.c.bf16 %v3705_v54, %v3701_v63  ;;  %v10409_v60 = vsub.f32 %v3642_v8, %v3705_v54  ;;  %v10432_v10 = vpack.c.bf16 %v3707_v0, %v3703_v26  ;;  %v12610_v8 = vld [vmem:[#allocation20_spill] sm:$0xff]  ;;  %v12611_v63 = vld [vmem:[#allocation22_spill] sm:$0xff]  ;;  %v10480_v54 = vpack.c.bf16 %v4560_v30, %v4556_v6 }
 0x234   :  { %8153 = vmatprep.subr.bf16.mxu1 %v12591_v25  ;;  %v10434_v25 = vsub.f32 %v3641_v61, %v3707_v0  ;;  %v2451_v37 = vand.u32 4294901760, %v2450_v58 }
 0x235   :  { %12601 = vst [vmem:[#allocation26_spill] sm:$0xff] %v10407_v13  ;;  %8349 = vmatprep.subr.bf16.mxu0 %v10407_v13  ;;  %12605 = vst [vmem:[#allocation28_spill] sm:$0xff] %v10432_v10 }
 0x236   :  { %8351 = vmatpush1.bf16.msra.mxu0 %v10432_v10  ;;  %12612 = vst [vmem:[#allocation36_spill] sm:$0xff] %v10480_v54  ;;  %v3682_v10 = vld [vmem:[#allocation9 + $0x3f8] sm:$0xff] }
 0x237   :  { %8155 = vmatpush1.bf16.msra.mxu1 %v12596_v19  ;;  %v3649_v19 = vld [vmem:[#allocation9 + $0x130] sm:$0xff] }
 0x238   :  { %2370 = vmatprep.subr.mxu1 %v10383_v21 }
 0x23a   :  { %1868 = vmatmul.mubr.f32.vlgmr.msra.gmra.mrb[2].mxu1 %v12580_v53  ;;  %v2455_v53 = vand.u32 4294901760, %v10395_v51 }
 0x23b   :  { %2435 = vmatprep.mubr.f32.mxu1 %v12451_v17  ;;  %2372 = vmatpush1.msra.mxu1 %v10385_v57 }
 0x23c   :  { %v2456_v32 = vsub.f32 %v10395_v51, %v2455_v53  ;;  %2452 = vmatprep.subr.mxu1 %v2451_v37 }
 0x23e   :  { %2441 = vmatmul.mubr.f32.vlgmr.msra.gmra.mrb[4].mxu1 %v12602_v4  ;;  %v2457_v28 = vand.u32 4294901760, %v2456_v32 }
 0x23f   :  { %2521 = vmatprep.mubr.f32.mxu1 %v12451_v17 }
 0x240   :  { %2458 = vmatpush1.msra.mxu1 %v2457_v28 }
 0x241   :  { %2531 = vmatprep.subr.mxu1 %v10398_v34 }
 0x26e   :  { %v7351_v29 = vpop.f32.mrb[4].mxu0 }
 0x26f   :  { %v9030_v45 = vadd.f32 %v7351_v29, %v2858_v47  ;;  %v3533_v46 = vpop.f32.mrb[5].mxu0  ;;  %v3651_v47 = vld [vmem:[#allocation9 + $0x140] sm:$0xff]  ;;  %v10445_v29 = vpack.c.bf16 %v3713_v50, %v3709_v55 }
 0x270   :  { %v9031_v15 = vadd.f32 %v3533_v46, %v2857_v43  ;;  %v4568_v43 = vand.u32 4294901760, %v3652_v12  ;;  %v3711_v46 = vand.u32 4294901760, %v3645_v40 }
 0x271   :  { %9142 = vtanh.f32 %v9030_v45  ;;  %12607 = vst [vmem:[#allocation34_spill] sm:$0xff] %v10445_v29  ;;  %v10447_v45 = vsub.f32 %v3650_v36, %v3713_v50  ;;  %8353 = vmatprep.subr.bf16.mxu0 %v10445_v29  ;;  %v3671_v29 = vld [vmem:[#allocation9 + $0x2f8] sm:$0xff] }
 0x272   :  { %9144 = vtanh.f32 %v9031_v15  ;;  %v10449_v15 = vsub.f32 %v3648_v11, %v4564_v2  ;;  %v10488_v61 = vpack.c.bf16 %v4568_v43, %v4564_v2 }
 0x274   :  { %12614 = vst [vmem:[#allocation42_spill] sm:$0xff] %v10488_v61 }
 0x27b   :  { %v9143_v31 = vpop.eup %9142 }
 0x27c   :  { %v9145_v59 = vpop.eup %9144  ;;  %v3552_v16 = vmul.f32 %v9143_v31, %v6826_v24  ;;  %v10452_v31 = vsub.f32 %v3652_v12, %v4568_v43 }
 0x27d   :  { %v3551_v22 = vmul.f32 %v9145_v59, %v6826_v24  ;;  %v3715_v24 = vand.u32 4294901760, %v3649_v19  ;;  %v10454_v59 = vsub.f32 %v3645_v40, %v3711_v46 }
 0x27e   :  { %v3556_v7 = vsel %vm3555_vm1, %v3552_v16, 0.0  ;;  %v4570_v16 = vand.u32 4294901760, %v3651_v47 }
 0x27f   :  { %3553 = vadd.xlane.f32.xlu0 %v3551_v22  ;;  %v4566_v22 = vand.u32 4294901760, %v3647_v20  ;;  %v10458_v35 = vpack.c.bf16 %v3715_v24, %v3711_v46  ;;  %v10460_v62 = vsub.f32 %v3649_v19, %v3715_v24  ;;  %v12616_v24 = vld [vmem:[#allocation41_spill] sm:$0xff] }
 0x280   :  { %v10466_v41 = vsub.f32 %v3651_v47, %v4570_v16  ;;  %v9298_v47 = vmov 1983009808  }
 0x281   :  { %12609 = vst [vmem:[#allocation33_spill] sm:$0xff] %v10458_v35  ;;  %v10464_v44 = vsub.f32 %v3647_v20, %v4566_v22  ;;  %8355 = vmatpush1.bf16.msra.mxu0 %v10458_v35  ;;  %v10492_v42 = vpack.c.bf16 %v4570_v16, %v4566_v22  ;;  %v6762_v43 = vunpack.c.l.s4 %v9298_v47 }
 0x283   :  { %3557 = vadd.xlane.f32.xlu0 %v3556_v7  ;;  %v12608_v7 = vld [vmem:[#allocation17_spill] sm:$0xff]  ;;  %12615 = vst [vmem:[#allocation43_spill] sm:$0xff] %v10492_v42  ;;  %v6763_v46 = vunpack.c.0.s8 %v6762_v43 }
 0x284   :  { %2523 = vmatmul.mubr.f32.vlgmr.msra.gmra.mrb[4].mxu1 %v12608_v7  ;;  %v3668_v43 = vld [vmem:[#allocation9 + $0x2a8] sm:$0xff] }
 0x285   :  { %2534 = vmatpush1.msra.mxu1 %v10395_v51  ;;  %2597 = vmatprep.mubr.f32.mxu1 %v12451_v17  ;;  %v10499_v22 = vsub.s32 %v6763_v46, %v12616_v24  ;;  %v3661_v46 = vld [vmem:[#allocation9 + $0x238] sm:$0xff]  ;;  %v3672_v24 = vld [vmem:[#allocation9 + $0x300] sm:$0xff] }
 0x286   :  { %2607 = vmatprep.subr.mxu1 %v10383_v21 }
 0x28c   :  { %2600 = vmatmul.mubr.f32.vlgmr.msra.gmra.mrb[4].mxu1 %v12610_v8 }
 0x28d   :  { %2609 = vmatpush1.msra.mxu1 %v10385_v57  ;;  %2672 = vmatprep.mubr.f32.mxu1 %v12451_v17 }
 0x28e   :  { %2685 = vmatprep.subr.mxu1 %v2449_v27 }
 0x294   :  { %2676 = vmatmul.mubr.f32.vlgmr.msra.gmra.mrb[4].mxu1 %v12611_v63 }
 0x295   :  { %2689 = vmatpush1.msra.mxu1 %v2455_v53  ;;  %2752 = vmatprep.mubr.f32.mxu1 %v12451_v17 }
 0x296   :  { %2761 = vmatprep.subr.mxu1 %v10383_v21 }
 0x29c   :  { %2754 = vmatmul.mubr.f32.vlgmr.msra.gmra.mrb[4].mxu1 %v12608_v7 }
 0x29d   :  { %2763 = vmatpush1.msra.mxu1 %v10385_v57  ;;  %2826 = vmatprep.mubr.f32.mxu1 %v12451_v17 }
 0x29e   :  { %8541 = vmatprep.subr.bf16.mxu1 %v10480_v54 }
 0x2a4   :  { %2828 = vmatmul.mubr.f32.vlgmr.msra.gmra.mrb[4].mxu1 %v12608_v7 }
 0x2a5   :  { %8543 = vmatpush1.bf16.msra.mxu1 %v10486_v52  ;;  %4652 = vmatprep.mubr.f32.mxu1 %v12451_v17  ;;  %v3678_v52 = vld [vmem:[#allocation9 + $0x3a0] sm:$0xff] }
 0x2a6   :  { %8545 = vmatprep.subr.bf16.mxu1 %v10488_v61 }
 0x2a9   :  { %8547 = vmatpush1.bf16.msra.mxu1 %v10492_v42 }
 0x30c   :  { %v3554_v21 = vpop.xlane.xlu0 %3553 }
 0x30d   :  { %3560 = vst.msk [vmem:[#allocation3] sm:$0xff] %vm3559_vm2, %v3554_v21  ;;  %v3654_v21 = vld [vmem:[#allocation9 + $0x190] sm:$0xff] }
 0x310   :  { %v3558_v57 = vpop.xlane.xlu0 %3557 }
 0x311   :  { %3562 = vst.msk [vmem:[#allocation3 + $0x8] sm:$0x3] %vm3561_vm3, %v3558_v57  ;;  %v3658_v57 = vld [vmem:[#allocation9 + $0x1e8] sm:$0xff] }
 0x314   :  { %v3563_v18 = vld [vmem:[#allocation3] sm:$0x3]  ;;  %v3564_v6 = vld [vmem:[#allocation3 + $0x2] sm:$0x3]  ;;  %v3565_v51 = vld [vmem:[#allocation3 + $0x4] sm:$0x3] }
 0x315   :  { %v3568_v30 = vmax.f32 %v3563_v18, %v3564_v6  ;;  %v3566_v26 = vld [vmem:[#allocation3 + $0x6] sm:$0x3] }
 0x317   :  { %v3569_v34 = vmax.f32 %v3568_v30, %v3565_v51 }
 0x318   :  { %v3567_v39 = vld [vmem:[#allocation3 + $0x8] sm:$0x3] }
 0x319   :  { %v3570_v49 = vmax.f32 %v3569_v34, %v3566_v26  ;;  %v3717_v34 = vand.u32 4294901760, %v3654_v21 }
 0x31b   :  { %v3571_v14 = vmax.f32 %v3570_v49, %v3567_v39  ;;  %v3653_v49 = vld [vmem:[#allocation9 + $0x188] sm:$0xff] }
 0x31d   :  { %v3572_v4 = vsub.f32 %v3563_v18, %v3571_v14  ;;  %v3575_v27 = vsub.f32 %v3564_v6, %v3571_v14  ;;  %v3578_v53 = vsub.f32 %v3565_v51, %v3571_v14  ;;  %v3581_v0 = vsub.f32 %v3566_v26, %v3571_v14  ;;  %v3656_v18 = vld [vmem:[#allocation9 + $0x1a0] sm:$0xff]  ;;  %v3660_v26 = vld [vmem:[#allocation9 + $0x1f8] sm:$0xff]  ;;  %v3674_v51 = vld [vmem:[#allocation9 + $0x348] sm:$0xff] }
 0x31e   :  { %v3584_v55 = vsub.f32 %v3567_v39, %v3571_v14  ;;  %v3721_v14 = vand.u32 4294901760, %v3658_v57 }
 0x31f   :  { %v3573_v36 = vmul.f32 1.442695, %v3572_v4  ;;  %v3576_v5 = vmul.f32 1.442695, %v3575_v27  ;;  %v3579_v3 = vmul.f32 1.442695, %v3578_v53 }
 0x320   :  { %v3582_v11 = vmul.f32 1.442695, %v3581_v0  ;;  %v3585_v58 = vmul.f32 1.442695, %v3584_v55  ;;  %v4572_v4 = vand.u32 4294901760, %v3656_v18  ;;  %v4576_v27 = vand.u32 4294901760, %v3660_v26 }
 0x321   :  { %9146 = vpow2.f32 %v3573_v36  ;;  %v3657_v53 = vld [vmem:[#allocation9 + $0x1e0] sm:$0xff]  ;;  %v3655_v0 = vld [vmem:[#allocation9 + $0x198] sm:$0xff]  ;;  %v10515_v36 = vsub.f32 %v3654_v21, %v3717_v34  ;;  %v3659_v55 = vld [vmem:[#allocation9 + $0x1f0] sm:$0xff] }
 0x322   :  { %9148 = vpow2.f32 %v3576_v5  ;;  %v3719_v5 = vand.u32 4294901760, %v3653_v49 }
 0x323   :  { %9150 = vpow2.f32 %v3579_v3  ;;  %v3723_v3 = vand.u32 4294901760, %v3657_v53 }
 0x324   :  { %9152 = vpow2.f32 %v3582_v11  ;;  %v4574_v11 = vand.u32 4294901760, %v3655_v0 }
 0x325   :  { %9154 = vpow2.f32 %v3585_v58  ;;  %v10517_v58 = vpack.c.bf16 %v3721_v14, %v3717_v34  ;;  %v10532_v47 = vsub.f32 %v3657_v53, %v3723_v3 }
 0x326   :  { %v10536_v21 = vsub.f32 %v3655_v0, %v4574_v11  ;;  %v3670_v0 = vld [vmem:[#allocation9 + $0x2f0] sm:$0xff] }
 0x327   :  { %12617 = vst [vmem:[#allocation46_spill] sm:$0xff] %v10517_v58  ;;  %8357 = vmatprep.subr.bf16.mxu0 %v10517_v58 }
 0x32b   :  { %v9147_v32 = vpop.eup %9146 }
 0x32c   :  { %v9149_v12 = vpop.eup %9148 }
 0x32d   :  { %v3587_v40 = vadd.f32 %v9149_v12, %v9147_v32  ;;  %v9151_v50 = vpop.eup %9150 }
 0x32e   :  { %v9153_v37 = vpop.eup %9152 }
 0x32f   :  { %v3588_v19 = vadd.f32 %v9151_v50, %v3587_v40  ;;  %v9155_v2 = vpop.eup %9154  ;;  %v10523_v40 = vsub.f32 %v3656_v18, %v4572_v4 }
 0x331   :  { %v3589_v28 = vadd.f32 %v9153_v37, %v3588_v19  ;;  %v3666_v19 = vld [vmem:[#allocation9 + $0x298] sm:$0xff] }
 0x332   :  { %v3729_v18 = vand.u32 4294901760, %v3666_v19 }
 0x333   :  { %v3590_v20 = vadd.f32 %v9155_v2, %v3589_v28  ;;  %v10526_v28 = vsub.f32 %v3660_v26, %v4576_v27  ;;  %v4584_v26 = vand.u32 4294901760, %v3668_v43 }
 0x335   :  { %9156 = vrcp.f32 %v3590_v20  ;;  %v10530_v20 = vsub.f32 %v3653_v49, %v3719_v5  ;;  %v3727_v49 = vand.u32 4294901760, %v3661_v46  ;;  %v10554_v42 = vsub.f32 %v3668_v43, %v4584_v26 }
 0x336   :  { %v3737_v43 = vand.u32 4294901760, %v3674_v51 }
 0x337   :  { %12626 = vst [vmem:[#allocation35_spill] sm:$0xff] %v10554_v42 }
 0x33f   :  { %v9157_v16 = vpop.eup %9156 }
 0x340   :  { %v10501_v7 = vmul.f32 %v9157_v16, %v9151_v50  ;;  %v3593_v8 = vmul.f32 %v9157_v16, %v9147_v32  ;;  %v10503_v63 = vmul.f32 %v9157_v16, %v9149_v12  ;;  %v10507_v6 = vmul.f32 %v9157_v16, %v9153_v37  ;;  %v3662_v50 = vld [vmem:[#allocation9 + $0x240] sm:$0xff]  ;;  %v3664_v37 = vld [vmem:[#allocation9 + $0x250] sm:$0xff] }
 0x341   :  { %v10509_v30 = vmul.f32 %v9157_v16, %v9155_v2  ;;  %v10519_v32 = vsub.f32 %v3658_v57, %v3721_v14  ;;  %v10521_v12 = vpack.c.bf16 %v4576_v27, %v4572_v4  ;;  %v10528_v2 = vpack.c.bf16 %v3723_v3, %v3719_v5  ;;  %v3665_v16 = vld [vmem:[#allocation9 + $0x290] sm:$0xff]  ;;  %v3663_v4 = vld [vmem:[#allocation9 + $0x248] sm:$0xff]  ;;  %v3667_v27 = vld [vmem:[#allocation9 + $0x2a0] sm:$0xff] }
 0x342   :  { %3616 = vperm.xlu0 %9141, %v10501_v7   ;;  %3601 = vperm.xlu1 %9140, %v3593_v8   ;;  %6760 = vst.msk [vmem:[#allocation12 + $0x4] sm:$0x3] %vm3561_vm3, %v3593_v8  ;;  %v4578_v8 = vand.u32 4294901760, %v3659_v55  ;;  %v3725_v57 = vand.u32 4294901760, %v3662_v50  ;;  %v4580_v34 = vand.u32 4294901760, %v3664_v37  ;;  %v3731_v14 = vand.u32 4294901760, %v3665_v16 }
 0x343   :  { %12618 = vst [vmem:[#allocation47_spill] sm:$0xff] %v10521_v12  ;;  %12619 = vst [vmem:[#allocation48_spill] sm:$0xff] %v10528_v2  ;;  %8549 = vmatprep.subr.bf16.mxu1 %v10521_v12  ;;  %8359 = vmatpush1.bf16.msra.mxu0 %v10528_v2  ;;  %v10548_v2 = vsub.f32 %v3666_v19, %v3729_v18  ;;  %v4582_v19 = vand.u32 4294901760, %v3663_v4 }
 0x344   :  { %v10539_v53 = vpack.c.bf16 %v4578_v8, %v4574_v11  ;;  %v10541_v5 = vsub.f32 %v3659_v55, %v4578_v8  ;;  %v10543_v3 = vpack.c.bf16 %v3729_v18, %v3725_v57  ;;  %v10545_v39 = vsub.f32 %v3662_v50, %v3725_v57  ;;  %v3676_v11 = vld [vmem:[#allocation9 + $0x358] sm:$0xff]  ;;  %v3669_v55 = vld [vmem:[#allocation9 + $0x2e8] sm:$0xff]  ;;  %v3673_v18 = vld [vmem:[#allocation9 + $0x340] sm:$0xff] }
 0x345   :  { %12623 = vst [vmem:[#allocation54_spill] sm:$0xff] %v10548_v2  ;;  %v10550_v12 = vpack.c.bf16 %v4584_v26, %v4580_v34  ;;  %v10552_v58 = vsub.f32 %v3664_v37, %v4580_v34  ;;  %v10558_v50 = vpack.c.bf16 %v3731_v14, %v3727_v49  ;;  %v10560_v8 = vsub.f32 %v3661_v46, %v3727_v49  ;;  %v3675_v46 = vld [vmem:[#allocation9 + $0x350] sm:$0xff] }
 0x346   :  { %3608 = vperm.xlu1 %9140, %v10503_v63   ;;  %12620 = vst [vmem:[#allocation49_spill] sm:$0xff] %v10539_v53  ;;  %12621 = vst [vmem:[#allocation50_spill] sm:$0xff] %v10543_v3  ;;  %8551 = vmatpush1.bf16.msra.mxu1 %v10539_v53  ;;  %v10562_v57 = vsub.f32 %v3665_v16, %v3731_v14  ;;  %v4586_v37 = vand.u32 4294901760, %v3667_v27  ;;  %v3733_v34 = vand.u32 4294901760, %v3670_v0  ;;  %v4588_v26 = vand.u32 4294901760, %v3672_v24 }
 0x347   :  { %12622 = vst [vmem:[#allocation53_spill] sm:$0xff] %v10545_v39  ;;  %12624 = vst [vmem:[#allocation55_spill] sm:$0xff] %v10550_v12  ;;  %8361 = vmatprep.subr.bf16.mxu0 %v10543_v3  ;;  %8553 = vmatprep.subr.bf16.mxu1 %v10550_v12  ;;  %v10566_v35 = vsub.f32 %v3663_v4, %v4582_v19  ;;  %v4592_v53 = vand.u32 4294901760, %v3676_v11  ;;  %v3735_v3 = vand.u32 4294901760, %v3669_v55  ;;  %v3739_v61 = vand.u32 4294901760, %v3673_v18 }
 0x348   :  { %12625 = vst [vmem:[#allocation56_spill] sm:$0xff] %v10552_v58  ;;  %12627 = vst [vmem:[#allocation21_spill] sm:$0xff] %v10558_v50  ;;  %8363 = vmatpush1.bf16.msra.mxu0 %v10558_v50  ;;  %v10569_v16 = vpack.c.bf16 %v4586_v37, %v4582_v19  ;;  %v10571_v49 = vsub.f32 %v3667_v27, %v4586_v37  ;;  %v10573_v14 = vpack.c.bf16 %v3737_v43, %v3733_v34  ;;  %v3680_v50 = vld [vmem:[#allocation9 + $0x3b0] sm:$0xff]  ;;  %v3677_v19 = vld [vmem:[#allocation9 + $0x398] sm:$0xff] }
 0x349   :  { %12628 = vst [vmem:[#allocation38_spill] sm:$0xff] %v10560_v8  ;;  %12629 = vst [vmem:[#allocation23_spill] sm:$0xff] %v10562_v57  ;;  %v10575_v12 = vsub.f32 %v3670_v0, %v3733_v34  ;;  %v10577_v4 = vsub.f32 %v3674_v51, %v3737_v43  ;;  %v10579_v54 = vpack.c.bf16 %v4592_v53, %v4588_v26  ;;  %v3681_v57 = vld [vmem:[#allocation9 + $0x3f0] sm:$0xff]  ;;  %v4590_v51 = vand.u32 4294901760, %v3671_v29  ;;  %v3679_v34 = vld [vmem:[#allocation9 + $0x3a8] sm:$0xff] }
 0x34a   :  { %3624 = vperm.xlu1 %9140, %v10507_v6   ;;  %12630 = vst [vmem:[#allocation25_spill] sm:$0xff] %v10566_v35  ;;  %12631 = vst [vmem:[#allocation30_spill] sm:$0xff] %v10569_v16  ;;  %v10581_v13 = vsub.f32 %v3672_v24, %v4588_v26  ;;  %v10583_v17 = vsub.f32 %v3676_v11, %v4592_v53  ;;  %v3684_v35 = vld [vmem:[#allocation9 + $0x408] sm:$0xff]  ;;  %8555 = vmatpush1.bf16.msra.mxu1 %v10569_v16  ;;  %v4594_v24 = vand.u32 4294901760, %v3675_v46 }
 0x34b   :  { %12632 = vst [vmem:[#allocation31_spill] sm:$0xff] %v10571_v49  ;;  %12633 = vst [vmem:[#allocation32_spill] sm:$0xff] %v10573_v14  ;;  %8365 = vmatprep.subr.bf16.mxu0 %v10573_v14  ;;  %v10587_v27 = vpack.c.bf16 %v3739_v61, %v3735_v3  ;;  %v10589_v0 = vsub.f32 %v3669_v55, %v3735_v3  ;;  %v10591_v37 = vsub.f32 %v3673_v18, %v3739_v61  ;;  %v3683_v18 = vld [vmem:[#allocation9 + $0x400] sm:$0xff] }
 0x34c   :  { %12634 = vst [vmem:[#allocation39_spill] sm:$0xff] %v10575_v12  ;;  %12635 = vst [vmem:[#allocation52_spill] sm:$0xff] %v10579_v54  ;;  %8557 = vmatprep.subr.bf16.mxu1 %v10579_v54  ;;  %v3741_v53 = vand.u32 4294901760, %v3678_v52  ;;  %v3745_v11 = vand.u32 4294901760, %v3682_v10  ;;  %v4596_v43 = vand.u32 4294901760, %v3680_v50  ;;  %v12641_v26 = vrot.slane %v10503_v63, %v10499_v22 }
 0x34d   :  { %12636 = vst [vmem:[#allocation57_spill] sm:$0xff] %v10581_v13  ;;  %12637 = vst [vmem:[#allocation58_spill] sm:$0xff] %v10583_v17  ;;  %8367 = vmatpush1.bf16.msra.mxu0 %v10587_v27  ;;  %v10598_v14 = vsub.f32 %v3671_v29, %v4590_v51  ;;  %v4600_v3 = vand.u32 4294901760, %v3684_v35  ;;  %v3743_v61 = vand.u32 4294901760, %v3677_v19  ;;  %v3747_v55 = vand.u32 4294901760, %v3681_v57  ;;  %v3686_v17 = vld [vmem:[#allocation9 + $0x450] sm:$0xff] }
 0x34e   :  { %3632 = vperm.xlu1 %9140, %v10509_v30   ;;  %12638 = vst [vmem:[#allocation44_spill] sm:$0xff] %v10587_v27  ;;  %12639 = vst [vmem:[#allocation45_spill] sm:$0xff] %v10589_v0  ;;  %v10600_v16 = vpack.c.bf16 %v4594_v24, %v4590_v51  ;;  %v10602_v54 = vsub.f32 %v3675_v46, %v4594_v24  ;;  %v4598_v0 = vand.u32 4294901760, %v3679_v34  ;;  %v3690_v27 = vld [vmem:[#allocation9 + $0x4a8] sm:$0xff] }
 0x34f   :  { %12640 = vst [vmem:[#allocation59_spill] sm:$0xff] %v10591_v37  ;;  %12642 = vst [vmem:[#allocation51_spill] sm:$0xff] %v10598_v14  ;;  %v10604_v37 = vpack.c.bf16 %v3745_v11, %v3741_v53  ;;  %v10606_v13 = vsub.f32 %v3678_v52, %v3741_v53  ;;  %v10608_v63 = vsub.f32 %v3682_v10, %v3745_v11  ;;  %v3688_v14 = vld [vmem:[#allocation9 + $0x460] sm:$0xff]  ;;  %v4602_v52 = vand.u32 4294901760, %v3683_v18  ;;  %v3692_v53 = vld [vmem:[#allocation9 + $0x4b8] sm:$0xff] }
 0x350   :  { %12643 = vst [vmem:[#allocation40_spill] sm:$0xff] %v10600_v16  ;;  %12644 = vst [vmem:[#allocation18_spill] sm:$0xff] %v10602_v54  ;;  %v10612_v29 = vsub.f32 %v3680_v50, %v4596_v43  ;;  %8559 = vmatpush1.bf16.msra.mxu1 %v10600_v16  ;;  %v10616_v46 = vsub.f32 %v3684_v35, %v4600_v3  ;;  %v10618_v51 = vpack.c.bf16 %v3747_v55, %v3743_v61  ;;  %v3685_v10 = vld [vmem:[#allocation9 + $0x448] sm:$0xff]  ;;  %v3689_v11 = vld [vmem:[#allocation9 + $0x4a0] sm:$0xff] }
 0x351   :  { %12645 = vst [vmem:[#allocation17_spill] sm:$0xff] %v10604_v37  ;;  %12646 = vst [vmem:[#allocation20_spill] sm:$0xff] %v10606_v13  ;;  %8369 = vmatprep.subr.bf16.mxu0 %v10604_v37  ;;  %v10620_v24 = vsub.f32 %v3677_v19, %v3743_v61  ;;  %v12653_v50 = vrot.slane %v10501_v7, %v10499_v22  ;;  %v10628_v35 = vsub.f32 %v3681_v57, %v3747_v55  ;;  %v3687_v61 = vld [vmem:[#allocation9 + $0x458] sm:$0xff]  ;;  %v3694_v57 = vld [vmem:[#allocation9 + $0x500] sm:$0xff] }
 0x352   :  { %6768 = vrot.lane.b32.xlu1 %v12641_v26, %s9299_s26  ;;  %12647 = vst [vmem:[#allocation22_spill] sm:$0xff] %v10608_v63  ;;  %v10610_v26 = vpack.c.bf16 %v4600_v3, %v4596_v43  ;;  %12649 = vst [vmem:[#allocation61_spill] sm:$0xff] %v10612_v29  ;;  %v6791_v43 = vrot.slane %v10507_v6, %v10499_v22  ;;  %v10630_v3 = vsub.f32 %v3679_v34, %v4598_v0 }
 0x353   :  { %12650 = vst [vmem:[#allocation62_spill] sm:$0xff] %v10616_v46  ;;  %12651 = vst [vmem:[#allocation63_spill] sm:$0xff] %v10618_v51  ;;  %v3749_v19 = vand.u32 4294901760, %v3686_v17  ;;  %8371 = vmatpush1.bf16.msra.mxu0 %v10618_v51  ;;  %v10633_v37 = vpack.c.bf16 %v4602_v52, %v4598_v0  ;;  %v10635_v16 = vsub.f32 %v3683_v18, %v4602_v52  ;;  %v4604_v7 = vand.u32 4294901760, %v3688_v14  ;;  %v3698_v18 = vld [vmem:[#allocation9 + $0x558] sm:$0xff]  ;;  %v3696_v52 = vld [vmem:[#allocation9 + $0x510] sm:$0xff] }
 0x354   :  { %12648 = vst [vmem:[#allocation60_spill] sm:$0xff] %v10610_v26  ;;  %12652 = vst [vmem:[#allocation64_spill] sm:$0xff] %v10620_v24  ;;  %8561 = vmatprep.subr.bf16.mxu1 %v10610_v26  ;;  %v3753_v24 = vand.u32 4294901760, %v3690_v27  ;;  %v4608_v46 = vand.u32 4294901760, %v3692_v53  ;;  %v3751_v6 = vand.u32 4294901760, %v3685_v10  ;;  %v3755_v29 = vand.u32 4294901760, %v3689_v11 }
 0x355   :  { %12654 = vst [vmem:[#allocation65_spill] sm:$0xff] %v10628_v35  ;;  %12655 = vst [vmem:[#allocation66_spill] sm:$0xff] %v10630_v3  ;;  %v3691_v26 = vld [vmem:[#allocation9 + $0x4b0] sm:$0xff]  ;;  %8563 = vmatpush1.bf16.msra.mxu1 %v10633_v37  ;;  %v10644_v51 = vsub.f32 %v3688_v14, %v4604_v7  ;;  %v4606_v0 = vand.u32 4294901760, %v3687_v61  ;;  %v6803_v14 = vrot.slane %v10509_v30, %v10499_v22 }
 0x356   :  { %6780 = vrot.lane.b32.xlu1 %v12653_v50, %s9300_s27  ;;  %12656 = vst [vmem:[#allocation67_spill] sm:$0xff] %v10633_v37  ;;  %12657 = vst [vmem:[#allocation68_spill] sm:$0xff] %v10635_v16  ;;  %v10637_v50 = vsub.f32 %v3686_v17, %v3749_v19  ;;  %v10640_v34 = vpack.c.bf16 %v3753_v24, %v3749_v19  ;;  %v10642_v55 = vsub.f32 %v3690_v27, %v3753_v24  ;;  %v3700_v16 = vld [vmem:[#allocation9 + $0x568] sm:$0xff]  ;;  %v3693_v19 = vld [vmem:[#allocation9 + $0x4f8] sm:$0xff] }
 0x357   :  { %12661 = vst [vmem:[#allocation72_spill] sm:$0xff] %v10644_v51  ;;  %v10646_v17 = vpack.c.bf16 %v4608_v46, %v4604_v7  ;;  %v10650_v3 = vpack.c.bf16 %v3755_v29, %v3751_v6  ;;  %v10652_v35 = vsub.f32 %v3685_v10, %v3751_v6  ;;  %v3697_v37 = vld [vmem:[#allocation9 + $0x550] sm:$0xff]  ;;  %v10657_v27 = vsub.f32 %v3689_v11, %v3755_v29  ;;  %v3699_v29 = vld [vmem:[#allocation9 + $0x560] sm:$0xff] }
 0x358   :  { %12658 = vst [vmem:[#allocation69_spill] sm:$0xff] %v10637_v50  ;;  %12659 = vst [vmem:[#allocation70_spill] sm:$0xff] %v10640_v34  ;;  %v10648_v50 = vsub.f32 %v3692_v53, %v4608_v46  ;;  %8373 = vmatprep.subr.bf16.mxu0 %v10640_v34  ;;  %v4610_v24 = vand.u32 4294901760, %v3691_v26  ;;  %v10659_v51 = vsub.f32 %v3687_v61, %v4606_v0  ;;  %v3757_v46 = vand.u32 4294901760, %v3694_v57  ;;  %v3695_v34 = vld [vmem:[#allocation9 + $0x508] sm:$0xff] }
 0x359   :  { %12660 = vst [vmem:[#allocation71_spill] sm:$0xff] %v10642_v55  ;;  %12662 = vst [vmem:[#allocation73_spill] sm:$0xff] %v10646_v17  ;;  %8565 = vmatprep.subr.bf16.mxu1 %v10646_v17  ;;  %8375 = vmatpush1.bf16.msra.mxu0 %v10650_v3  ;;  %v3761_v53 = vand.u32 4294901760, %v3698_v18  ;;  %v4612_v10 = vand.u32 4294901760, %v3696_v52  ;;  %v3759_v22 = vand.u32 4294901760, %v3693_v19  ;;  %v3763_v30 = vand.u32 4294901760, %v3697_v37 }
 0x35a   :  { %6792 = vrot.lane.b32.xlu1 %v6791_v43, %s9301_s28  ;;  %12663 = vst [vmem:[#allocation74_spill] sm:$0xff] %v10648_v50  ;;  %12664 = vst [vmem:[#allocation75_spill] sm:$0xff] %v10650_v3  ;;  %v4616_v43 = vand.u32 4294901760, %v3700_v16  ;;  %v10663_v7 = vpack.c.bf16 %v4610_v24, %v4606_v0  ;;  %v10665_v6 = vsub.f32 %v3691_v26, %v4610_v24 }
 0x35b   :  { %12665 = vst [vmem:[#allocation76_spill] sm:$0xff] %v10652_v35  ;;  %12666 = vst [vmem:[#allocation77_spill] sm:$0xff] %v10657_v27  ;;  %v10667_v11 = vpack.c.bf16 %v3761_v53, %v3757_v46  ;;  %v10669_v61 = vsub.f32 %v3694_v57, %v3757_v46  ;;  %v10671_v17 = vsub.f32 %v3698_v18, %v3761_v53  ;;  %v4614_v18 = vand.u32 4294901760, %v3695_v34 }
 0x35c   :  { %12667 = vst [vmem:[#allocation78_spill] sm:$0xff] %v10659_v51  ;;  %12668 = vst [vmem:[#allocation79_spill] sm:$0xff] %v10663_v7  ;;  %v10673_v3 = vpack.c.bf16 %v4616_v43, %v4612_v10  ;;  %8567 = vmatpush1.bf16.msra.mxu1 %v10663_v7  ;;  %v10676_v0 = vsub.f32 %v3696_v52, %v4612_v10  ;;  %v10678_v26 = vsub.f32 %v3700_v16, %v4616_v43 }
 0x35d   :  { %12669 = vst [vmem:[#allocation80_spill] sm:$0xff] %v10665_v6  ;;  %12670 = vst [vmem:[#allocation81_spill] sm:$0xff] %v10667_v11  ;;  %v10680_v24 = vpack.c.bf16 %v3763_v30, %v3759_v22  ;;  %v10682_v6 = vsub.f32 %v3693_v19, %v3759_v22  ;;  %8377 = vmatprep.subr.bf16.mxu0 %v10667_v11  ;;  %v10686_v57 = vsub.f32 %v3697_v37, %v3763_v30  ;;  %v10693_v19 = vpop.f32.mrb[2].mxu1 }
 0x35e   :  { %6804 = vrot.lane.b32.xlu1 %v6803_v14, %s9302_s29  ;;  %12671 = vst [vmem:[#allocation82_spill] sm:$0xff] %v10669_v61  ;;  %12672 = vst [vmem:[#allocation83_spill] sm:$0xff] %v10671_v17  ;;  %8569 = vmatprep.subr.bf16.mxu1 %v10673_v3  ;;  %v4618_v14 = vand.u32 4294901760, %v3699_v29  ;;  %v12267_v46 = vand.u32 4294901760, %v10400_v38  ;;  %v10697_v43 = vsub.f32 %v3695_v34, %v4614_v18  ;;  %v12276_v22 = vand.u32 4294901760, %v10426_v56  ;;  %v10702_v30 = vpop.f32.mrb[3].mxu1 }
 0x35f   :  { %12673 = vst [vmem:[#allocation84_spill] sm:$0xff] %v10673_v3  ;;  %12674 = vst [vmem:[#allocation85_spill] sm:$0xff] %v10680_v24  ;;  %8379 = vmatpush1.bf16.msra.mxu0 %v10680_v24  ;;  %v12680_v16 = vand.u32 4294901760, %v10409_v60  ;;  %v12682_v34 = vand.u32 4294901760, %v10422_v23 }
 0x360   :  { %12675 = vst [vmem:[#allocation86_spill] sm:$0xff] %v10686_v57  ;;  %12676 = vst [vmem:[#allocation87_spill] sm:$0xff] %v10693_v19  ;;  %v10695_v10 = vpack.c.bf16 %v4618_v14, %v4614_v18  ;;  %v10699_v37 = vsub.f32 %v3699_v29, %v4618_v14  ;;  %v3812_v52 = vsub.f32 %v10400_v38, %v12267_v46  ;;  %v12681_v19 = vand.u32 4294901760, %v10414_v48 }
 0x361   :  { %12678 = vst [vmem:[#allocation89_spill] sm:$0xff] %v10697_v43  ;;  %12679 = vst [vmem:[#allocation90_spill] sm:$0xff] %v10702_v30  ;;  %v3824_v53 = vsub.f32 %v10409_v60, %v12680_v16  ;;  %v4679_v29 = vsub.f32 %v10422_v23, %v12682_v34  ;;  %v3818_v18 = vsub.f32 %v10426_v56, %v12276_v22  ;;  %v12281_v14 = vand.u32 4294901760, %v10434_v25 }
 0x362   :  { %12677 = vst [vmem:[#allocation88_spill] sm:$0xff] %v10695_v10  ;;  %v4667_v24 = vsub.f32 %v10414_v48, %v12681_v19  ;;  %8571 = vmatpush1.bf16.msra.mxu1 %v10695_v10  ;;  %v12282_v46 = vand.u32 4294901760, %v10437_v1  ;;  %v12288_v16 = vand.u32 4294901760, %v10440_v33  ;;  %v3813_v30 = vand.u32 4294901760, %v3812_v52 }
 0x363   :  { %v3825_v3 = vand.u32 4294901760, %v3824_v53  ;;  %v4680_v19 = vand.u32 4294901760, %v4679_v29  ;;  %v3819_v7 = vand.u32 4294901760, %v3818_v18  ;;  %v3830_v34 = vsub.f32 %v10434_v25, %v12281_v14 }
 0x364   :  { %v4668_v11 = vand.u32 4294901760, %v4667_v24  ;;  %v4673_v10 = vsub.f32 %v10437_v1, %v12282_v46  ;;  %v4685_v22 = vsub.f32 %v10440_v33, %v12288_v16  ;;  %v12287_v52 = vand.u32 4294901760, %v10443_v9 }
 0x365   :  { %v8380_v56 = vpack.c.bf16 %v3825_v3, %v3813_v30  ;;  %v3831_v53 = vand.u32 4294901760, %v3830_v34  ;;  %v12285_v18 = vand.u32 4294901760, %v10447_v45  ;;  %v12286_v46 = vand.u32 4294901760, %v10449_v15 }
 0x366   :  { %v8572_v23 = vpack.c.bf16 %v4680_v19, %v4668_v11  ;;  %v4674_v24 = vand.u32 4294901760, %v4673_v10  ;;  %v4686_v29 = vand.u32 4294901760, %v4685_v22  ;;  %v3836_v14 = vsub.f32 %v10443_v9, %v12287_v52 }
 0x367   :  { %8381 = vmatprep.subr.bf16.mxu0 %v8380_v56  ;;  %v12289_v1 = vand.u32 4294901760, %v10452_v31  ;;  %v12290_v3 = vand.u32 4294901760, %v10454_v59  ;;  %v10740_v11 = vpack.c.bf16 %v3831_v53, %v3819_v7  ;;  %v3848_v10 = vsub.f32 %v10447_v45, %v12285_v18 }
 0x368   :  { %8573 = vmatprep.subr.bf16.mxu1 %v8572_v23  ;;  %v10742_v30 = vpack.c.bf16 %v4686_v29, %v4674_v24  ;;  %v12291_v23 = vand.u32 4294901760, %v10460_v62  ;;  %v3837_v56 = vand.u32 4294901760, %v3836_v14  ;;  %v4691_v22 = vsub.f32 %v10449_v15, %v12286_v46 }
 0x369   :  { %12683 = vst [vmem:[#allocation91_spill] sm:$0xff] %v10740_v11  ;;  %v4703_v19 = vsub.f32 %v10452_v31, %v12289_v1  ;;  %v3842_v7 = vsub.f32 %v10454_v59, %v12290_v3  ;;  %v3849_v34 = vand.u32 4294901760, %v3848_v10  ;;  %v12296_v24 = vand.u32 4294901760, %v10464_v44 }
 0x36a   :  { %12684 = vst [vmem:[#allocation92_spill] sm:$0xff] %v10742_v30  ;;  %v3854_v53 = vsub.f32 %v10460_v62, %v12291_v23  ;;  %v12294_v14 = vand.u32 4294901760, %v10466_v41  ;;  %v4692_v29 = vand.u32 4294901760, %v4691_v22  ;;  %v12292_v23 = vand.u32 4294901760, %v10515_v36 }
 0x36b   :  { %v4704_v18 = vand.u32 4294901760, %v4703_v19  ;;  %v3843_v46 = vand.u32 4294901760, %v3842_v7  ;;  %v10762_v52 = vpack.c.bf16 %v3849_v34, %v3837_v56  ;;  %v4697_v1 = vsub.f32 %v10464_v44, %v12296_v24 }
 0x36c   :  { %v3855_v16 = vand.u32 4294901760, %v3854_v53  ;;  %v4709_v10 = vsub.f32 %v10466_v41, %v12294_v14  ;;  %v12293_v56 = vand.u32 4294901760, %v10519_v32  ;;  %v3860_v7 = vsub.f32 %v10515_v36, %v12292_v23 }
 0x36d   :  { %12685 = vst [vmem:[#allocation93_spill] sm:$0xff] %v10762_v52  ;;  %v10770_v3 = vpack.c.bf16 %v4704_v18, %v4692_v29  ;;  %v4698_v22 = vand.u32 4294901760, %v4697_v1  ;;  %v12295_v34 = vand.u32 4294901760, %v10523_v40  ;;  %v12297_v29 = vand.u32 4294901760, %v10526_v28 }
 0x36e   :  { %v10773_v30 = vpack.c.bf16 %v3855_v16, %v3843_v46  ;;  %v4710_v19 = vand.u32 4294901760, %v4709_v10  ;;  %v3872_v18 = vsub.f32 %v10519_v32, %v12293_v56  ;;  %v12298_v46 = vand.u32 4294901760, %v10530_v20 }
 0x36f   :  { %12686 = vst [vmem:[#allocation94_spill] sm:$0xff] %v10770_v3  ;;  %v3861_v1 = vand.u32 4294901760, %v3860_v7  ;;  %v4715_v16 = vsub.f32 %v10523_v40, %v12295_v34  ;;  %v12299_v10 = vand.u32 4294901760, %v10532_v47  ;;  %v12300_v56 = vand.u32 4294901760, %v10536_v21 }
 0x370   :  { %12687 = vst [vmem:[#allocation95_spill] sm:$0xff] %v10773_v30  ;;  %v10780_v53 = vpack.c.bf16 %v4710_v19, %v4698_v22  ;;  %v3873_v23 = vand.u32 4294901760, %v3872_v18  ;;  %v4727_v22 = vsub.f32 %v10526_v28, %v12297_v29  ;;  %v3866_v19 = vsub.f32 %v10530_v20, %v12298_v46 }
 0x371   :  { %v4716_v14 = vand.u32 4294901760, %v4715_v16  ;;  %v3878_v7 = vsub.f32 %v10532_v47, %v12299_v10  ;;  %v12301_v34 = vand.u32 4294901760, %v10541_v5  ;;  %v12302_v24 = vand.u32 4294901760, %v10545_v39 }
 0x372   :  { %12688 = vst [vmem:[#allocation96_spill] sm:$0xff] %v10780_v53  ;;  %v10803_v18 = vpack.c.bf16 %v3873_v23, %v3861_v1  ;;  %v4728_v53 = vand.u32 4294901760, %v4727_v22  ;;  %v3867_v30 = vand.u32 4294901760, %v3866_v19  ;;  %v4721_v29 = vsub.f32 %v10536_v21, %v12300_v56 }
 0x373   :  { %v3879_v46 = vand.u32 4294901760, %v3878_v7  ;;  %v4733_v16 = vsub.f32 %v10541_v5, %v12301_v34  ;;  %v3884_v10 = vsub.f32 %v10545_v39, %v12302_v24  ;;  %v12303_v3 = vand.u32 4294901760, %v10548_v2 }
 0x374   :  { %12689 = vst [vmem:[#allocation97_spill] sm:$0xff] %v10803_v18  ;;  %v10815_v52 = vpack.c.bf16 %v4728_v53, %v4716_v14  ;;  %v4722_v23 = vand.u32 4294901760, %v4721_v29  ;;  %v12304_v1 = vand.u32 4294901760, %v10552_v58  ;;  %v12305_v22 = vand.u32 4294901760, %v10554_v42  ;;  %v12692_v29 = vld [vmem:[#allocation23_spill] sm:$0xff] }
 0x375   :  { %v10819_v19 = vpack.c.bf16 %v3879_v46, %v3867_v30  ;;  %v4734_v7 = vand.u32 4294901760, %v4733_v16  ;;  %v3885_v56 = vand.u32 4294901760, %v3884_v10  ;;  %v3896_v34 = vsub.f32 %v10548_v2, %v12303_v3  ;;  %v12694_v10 = vld [vmem:[#allocation25_spill] sm:$0xff]  ;;  %v12737_v2 = vld [vmem:[#allocation20_spill] sm:$0xff] }
 0x376   :  { %12690 = vst [vmem:[#allocation98_spill] sm:$0xff] %v10815_v52  ;;  %v4739_v24 = vsub.f32 %v10552_v58, %v12304_v1  ;;  %v4751_v14 = vsub.f32 %v10554_v42, %v12305_v22  ;;  %v12306_v53 = vand.u32 4294901760, %v10560_v8  ;;  %v12309_v52 = vand.u32 4294901760, %v12692_v29 }
 0x377   :  { %12691 = vst [vmem:[#allocation99_spill] sm:$0xff] %v10819_v19  ;;  %v10832_v30 = vpack.c.bf16 %v4734_v7, %v4722_v23  ;;  %v3897_v46 = vand.u32 4294901760, %v3896_v34  ;;  %v12310_v16 = vand.u32 4294901760, %v12694_v10  ;;  %v12311_v19 = vand.u32 4294901760, %v10571_v49 }
 0x378   :  { %v4740_v3 = vand.u32 4294901760, %v4739_v24  ;;  %v4752_v18 = vand.u32 4294901760, %v4751_v14  ;;  %v3890_v1 = vsub.f32 %v10560_v8, %v12306_v53  ;;  %v3902_v22 = vsub.f32 %v12692_v29, %v12309_v52 }
 0x379   :  { %12693 = vst [vmem:[#allocation100_spill] sm:$0xff] %v10832_v30  ;;  %v10842_v11 = vpack.c.bf16 %v3897_v46, %v3885_v56  ;;  %v4745_v34 = vsub.f32 %v12694_v10, %v12310_v16  ;;  %v4757_v23 = vsub.f32 %v10571_v49, %v12311_v19  ;;  %v12312_v24 = vand.u32 4294901760, %v10575_v12  ;;  %v12697_v46 = vld [vmem:[#allocation57_spill] sm:$0xff] }
 0x37a   :  { %v10851_v7 = vpack.c.bf16 %v4752_v18, %v4740_v3  ;;  %v3891_v14 = vand.u32 4294901760, %v3890_v1  ;;  %v3903_v53 = vand.u32 4294901760, %v3902_v22  ;;  %v12317_v30 = vand.u32 4294901760, %v10577_v4  ;;  %v12699_v3 = vld [vmem:[#allocation58_spill] sm:$0xff]  ;;  %v12700_v1 = vld [vmem:[#allocation45_spill] sm:$0xff] }
 0x37b   :  { %12695 = vst [vmem:[#allocation25_spill] sm:$0xff] %v10842_v11  ;;  %v4746_v8 = vand.u32 4294901760, %v4745_v34  ;;  %v4758_v52 = vand.u32 4294901760, %v4757_v23  ;;  %v3908_v56 = vsub.f32 %v10575_v12, %v12312_v24  ;;  %v12318_v16 = vand.u32 4294901760, %v12697_v46  ;;  %v12702_v24 = vld [vmem:[#allocation59_spill] sm:$0xff] }
 0x37c   :  { %12696 = vst [vmem:[#allocation101_spill] sm:$0xff] %v10851_v7  ;;  %v10858_v11 = vpack.c.bf16 %v3903_v53, %v3891_v14  ;;  %v3920_v19 = vsub.f32 %v10577_v4, %v12317_v30  ;;  %v12320_v18 = vand.u32 4294901760, %v12699_v3  ;;  %v12321_v22 = vand.u32 4294901760, %v12700_v1  ;;  %v12703_v30 = vld [vmem:[#allocation51_spill] sm:$0xff] }
 0x37d   :  { %v10865_v7 = vpack.c.bf16 %v4758_v52, %v4746_v8  ;;  %v3909_v34 = vand.u32 4294901760, %v3908_v56  ;;  %v4763_v23 = vsub.f32 %v12697_v46, %v12318_v16  ;;  %v12322_v12 = vand.u32 4294901760, %v12702_v24 }
 0x37e   :  { %12698 = vst [vmem:[#allocation102_spill] sm:$0xff] %v10858_v11  ;;  %v3921_v49 = vand.u32 4294901760, %v3920_v19  ;;  %v4775_v53 = vsub.f32 %v12699_v3, %v12320_v18  ;;  %v3914_v14 = vsub.f32 %v12700_v1, %v12321_v22  ;;  %v12326_v11 = vand.u32 4294901760, %v12703_v30 }
 0x37f   :  { %12701 = vst [vmem:[#allocation103_spill] sm:$0xff] %v10865_v7  ;;  %v4764_v8 = vand.u32 4294901760, %v4763_v23  ;;  %v3926_v52 = vsub.f32 %v12702_v24, %v12322_v12  ;;  %v12327_v56 = vand.u32 4294901760, %v10602_v54  ;;  %v12328_v16 = vand.u32 4294901760, %v10606_v13 }
 0x380   :  { %v10883_v19 = vpack.c.bf16 %v3921_v49, %v3909_v34  ;;  %v4776_v7 = vand.u32 4294901760, %v4775_v53  ;;  %v3915_v46 = vand.u32 4294901760, %v3914_v14  ;;  %v4769_v18 = vsub.f32 %v12703_v30, %v12326_v11  ;;  %v12706_v34 = vld [vmem:[#allocation61_spill] sm:$0xff]  ;;  %v12707_v14 = vld [vmem:[#allocation62_spill] sm:$0xff] }
 0x381   :  { %v3927_v22 = vand.u32 4294901760, %v3926_v52  ;;  %v4781_v23 = vsub.f32 %v10602_v54, %v12327_v56  ;;  %v3932_v12 = vsub.f32 %v10606_v13, %v12328_v16  ;;  %v12333_v24 = vand.u32 4294901760, %v10608_v63 }
 0x382   :  { %12704 = vst [vmem:[#allocation104_spill] sm:$0xff] %v10883_v19  ;;  %v10895_v1 = vpack.c.bf16 %v4776_v7, %v4764_v8  ;;  %v4770_v49 = vand.u32 4294901760, %v4769_v18  ;;  %v12336_v53 = vand.u32 4294901760, %v12706_v34  ;;  %v12337_v19 = vand.u32 4294901760, %v12707_v14  ;;  %v12709_v18 = vld [vmem:[#allocation64_spill] sm:$0xff] }
 0x383   :  { %v10899_v3 = vpack.c.bf16 %v3927_v22, %v3915_v46  ;;  %v4782_v52 = vand.u32 4294901760, %v4781_v23  ;;  %v3933_v11 = vand.u32 4294901760, %v3932_v12  ;;  %v3944_v56 = vsub.f32 %v10608_v63, %v12333_v24  ;;  %v12712_v12 = vld [vmem:[#allocation66_spill] sm:$0xff] }
 0x384   :  { %12705 = vst [vmem:[#allocation105_spill] sm:$0xff] %v10895_v1  ;;  %v4787_v16 = vsub.f32 %v12706_v34, %v12336_v53  ;;  %v4799_v7 = vsub.f32 %v12707_v14, %v12337_v19  ;;  %v12339_v8 = vand.u32 4294901760, %v12709_v18  ;;  %v12710_v1 = vld [vmem:[#allocation65_spill] sm:$0xff]  ;;  %v12343_v23 = vand.u32 4294901760, %v12712_v12 }
 0x385   :  { %12708 = vst [vmem:[#allocation106_spill] sm:$0xff] %v10899_v3  ;;  %v12342_v13 = vand.u32 4294901760, %v12710_v1  ;;  %v10912_v46 = vpack.c.bf16 %v4782_v52, %v4770_v49  ;;  %v3945_v22 = vand.u32 4294901760, %v3944_v56  ;;  %v12713_v3 = vld [vmem:[#allocation68_spill] sm:$0xff] }
 0x386   :  { %v12344_v54 = vand.u32 4294901760, %v12713_v3  ;;  %v4788_v24 = vand.u32 4294901760, %v4787_v16  ;;  %v4800_v63 = vand.u32 4294901760, %v4799_v7  ;;  %v3938_v53 = vsub.f32 %v12709_v18, %v12339_v8  ;;  %v12715_v16 = vld [vmem:[#allocation69_spill] sm:$0xff] }
 0x387   :  { %12711 = vst [vmem:[#allocation107_spill] sm:$0xff] %v10912_v46  ;;  %v3950_v19 = vsub.f32 %v12710_v1, %v12342_v13  ;;  %v10922_v14 = vpack.c.bf16 %v3945_v22, %v3933_v11  ;;  %v4793_v56 = vsub.f32 %v12712_v12, %v12343_v23  ;;  %v12345_v52 = vand.u32 4294901760, %v12715_v16  ;;  %v12717_v22 = vld [vmem:[#allocation72_spill] sm:$0xff] }
 0x388   :  { %v4805_v49 = vsub.f32 %v12713_v3, %v12344_v54  ;;  %v10931_v7 = vpack.c.bf16 %v4800_v63, %v4788_v24  ;;  %v3939_v46 = vand.u32 4294901760, %v3938_v53  ;;  %v12346_v18 = vand.u32 4294901760, %v10642_v55  ;;  %v12745_v3 = vld [vmem:[#allocation89_spill] sm:$0xff] }
 0x389   :  { %12714 = vst [vmem:[#allocation108_spill] sm:$0xff] %v10922_v14  ;;  %v3951_v8 = vand.u32 4294901760, %v3950_v19  ;;  %v4794_v34 = vand.u32 4294901760, %v4793_v56  ;;  %v3956_v11 = vsub.f32 %v12715_v16, %v12345_v52  ;;  %v12347_v23 = vand.u32 4294901760, %v12717_v22 }
 0x38a   :  { %12716 = vst [vmem:[#allocation109_spill] sm:$0xff] %v10931_v7  ;;  %v4806_v13 = vand.u32 4294901760, %v4805_v49  ;;  %v3968_v54 = vsub.f32 %v10642_v55, %v12346_v18  ;;  %v12348_v63 = vand.u32 4294901760, %v10648_v50  ;;  %v12349_v24 = vand.u32 4294901760, %v10652_v35  ;;  %v3629_v55 = vld [vmem:[#allocation7 + $0x8] sm:$0x3] }
 0x38b   :  { %v10938_v14 = vpack.c.bf16 %v3951_v8, %v3939_v46  ;;  %v3957_v53 = vand.u32 4294901760, %v3956_v11  ;;  %v4811_v56 = vsub.f32 %v12717_v22, %v12347_v23  ;;  %v12350_v49 = vand.u32 4294901760, %v10657_v27  ;;  %v12720_v11 = vld [vmem:[#allocation80_spill] sm:$0xff]  ;;  %v3605_v22 = vld [vmem:[#allocation7 + $0x2] sm:$0x3] }
 0x38c   :  { %v10945_v19 = vpack.c.bf16 %v4806_v13, %v4794_v34  ;;  %v3969_v52 = vand.u32 4294901760, %v3968_v54  ;;  %v4823_v8 = vsub.f32 %v10648_v50, %v12348_v63  ;;  %v3962_v46 = vsub.f32 %v10652_v35, %v12349_v24  ;;  %v3613_v50 = vld [vmem:[#allocation7 + $0x4] sm:$0x3] }
 0x38d   :  { %12718 = vst [vmem:[#allocation110_spill] sm:$0xff] %v10938_v14  ;;  %v12355_v18 = vand.u32 4294901760, %v10659_v51  ;;  %v4812_v13 = vand.u32 4294901760, %v4811_v56  ;;  %v3974_v34 = vsub.f32 %v10657_v27, %v12350_v49  ;;  %v12356_v23 = vand.u32 4294901760, %v12720_v11 }
 0x38e   :  { %12719 = vst [vmem:[#allocation111_spill] sm:$0xff] %v10945_v19  ;;  %v12357_v19 = vand.u32 4294901760, %v10669_v61  ;;  %v10963_v54 = vpack.c.bf16 %v3969_v52, %v3957_v53  ;;  %v4824_v14 = vand.u32 4294901760, %v4823_v8  ;;  %v3963_v7 = vand.u32 4294901760, %v3962_v46 }
 0x38f   :  { %v4817_v63 = vsub.f32 %v10659_v51, %v12355_v18  ;;  %v3975_v24 = vand.u32 4294901760, %v3974_v34  ;;  %v4829_v56 = vsub.f32 %v12720_v11, %v12356_v23  ;;  %v12358_v27 = vand.u32 4294901760, %v10671_v17  ;;  %v3621_v51 = vld [vmem:[#allocation7 + $0x6] sm:$0x3] }
 0x390   :  { %12721 = vst [vmem:[#allocation112_spill] sm:$0xff] %v10963_v54  ;;  %v3980_v49 = vsub.f32 %v10669_v61, %v12357_v19  ;;  %v10975_v35 = vpack.c.bf16 %v4824_v14, %v4812_v13  ;;  %v12359_v53 = vand.u32 4294901760, %v10676_v0  ;;  %v12360_v8 = vand.u32 4294901760, %v10678_v26 }
 0x391   :  { %v4818_v52 = vand.u32 4294901760, %v4817_v63  ;;  %v10979_v46 = vpack.c.bf16 %v3975_v24, %v3963_v7  ;;  %v4830_v34 = vand.u32 4294901760, %v4829_v56  ;;  %v3992_v23 = vsub.f32 %v10671_v17, %v12358_v27 }
 0x392   :  { %12722 = vst [vmem:[#allocation113_spill] sm:$0xff] %v10975_v35  ;;  %v3981_v18 = vand.u32 4294901760, %v3980_v49  ;;  %v4835_v19 = vsub.f32 %v10676_v0, %v12359_v53  ;;  %v4847_v14 = vsub.f32 %v10678_v26, %v12360_v8  ;;  %v12361_v63 = vand.u32 4294901760, %v10682_v6 }
 0x393   :  { %12723 = vst [vmem:[#allocation114_spill] sm:$0xff] %v10979_v46  ;;  %v12362_v13 = vand.u32 4294901760, %v10686_v57  ;;  %v10992_v7 = vpack.c.bf16 %v4830_v34, %v4818_v52  ;;  %v3993_v24 = vand.u32 4294901760, %v3992_v23  ;;  %v12363_v49 = vand.u32 4294901760, %v10697_v43 }
 0x394   :  { %v12368_v56 = vand.u32 4294901760, %v10699_v37  ;;  %v4836_v27 = vand.u32 4294901760, %v4835_v19  ;;  %v4848_v46 = vand.u32 4294901760, %v4847_v14  ;;  %v3986_v53 = vsub.f32 %v10682_v6, %v12361_v63  ;;  %v12731_v19 = vld [vmem:[#allocation39_spill] sm:$0xff] }
 0x395   :  { %12724 = vst [vmem:[#allocation115_spill] sm:$0xff] %v10992_v7  ;;  %v3998_v8 = vsub.f32 %v10686_v57, %v12362_v13  ;;  %v11002_v35 = vpack.c.bf16 %v3993_v24, %v3981_v18  ;;  %v4841_v23 = vsub.f32 %v10697_v43, %v12363_v49  ;;  %v12726_v7 = vld [vmem:[#allocation19_spill] sm:$0xff]  ;;  %v12728_v49 = vld [vmem:[#allocation29_spill] sm:$0xff] }
 0x396   :  { %v4853_v52 = vsub.f32 %v10699_v37, %v12368_v56  ;;  %v11012_v34 = vpack.c.bf16 %v4848_v46, %v4836_v27  ;;  %v3987_v14 = vand.u32 4294901760, %v3986_v53  ;;  %v12732_v43 = vld [vmem:[#allocation57_spill] sm:$0xff]  ;;  %v12736_v53 = vld [vmem:[#allocation18_spill] sm:$0xff] }
 0x397   :  { %12725 = vst [vmem:[#allocation116_spill] sm:$0xff] %v11002_v35  ;;  %v3999_v63 = vand.u32 4294901760, %v3998_v8  ;;  %v4842_v18 = vand.u32 4294901760, %v4841_v23  ;;  %v12727_v35 = vld [vmem:[#allocation27_spill] sm:$0xff]  ;;  %v3598_v56 = vld [vmem:[#allocation7] sm:$0x3] }
 0x398   :  { %v4854_v24 = vand.u32 4294901760, %v4853_v52  ;;  %v12730_v23 = vld [vmem:[#allocation31_spill] sm:$0xff]  ;;  %v12733_v52 = vld [vmem:[#allocation58_spill] sm:$0xff] }
 0x399   :  { %v11020_v57 = vpack.c.bf16 %v3999_v63, %v3987_v14  ;;  %v12735_v14 = vld [vmem:[#allocation59_spill] sm:$0xff]  ;;  %v12744_v63 = vld [vmem:[#allocation86_spill] sm:$0xff] }
 0x39a   :  { %v11028_v8 = vpack.c.bf16 %v4854_v24, %v4842_v18  ;;  %v12738_v18 = vld [vmem:[#allocation22_spill] sm:$0xff] }
 0x3c1   :  { %v3602_v16 = vpop.permute.xlu1 %3601  ;;  %v3617_v30 = vpop.permute.xlu0 %3616 }
 0x3c2   :  { %v3604_v39 = vmul.f32 %v3602_v16, %v3598_v56  ;;  %v3619_v11 = vmul.f32 %v3617_v30, %v3613_v50  ;;  %v12753_v30 = vand.u32 4294901760, %v12745_v3 }
 0x3c5   :  { %v3609_v13 = vpop.permute.xlu1 %3608 }
 0x3c6   :  { %v3611_v58 = vmul.f32 %v3609_v13, %v3605_v22  ;;  %v12757_v13 = vld [vmem:[#allocation92_spill] sm:$0xff] }
 0x3c8   :  { %v3612_v24 = vadd.f32 %v3611_v58, %v3604_v39  ;;  %v12747_v58 = vand.u32 4294901760, %v10676_v0 }
 0x3c9   :  { %v3625_v61 = vpop.permute.xlu1 %3624 }
 0x3ca   :  { %v3620_v17 = vadd.f32 %v3619_v11, %v3612_v24  ;;  %v3627_v27 = vmul.f32 %v3625_v61, %v3621_v51  ;;  %v12748_v51 = vand.u32 4294901760, %v10678_v26  ;;  %v12759_v24 = vld [vmem:[#allocation94_spill] sm:$0xff] }
 0x3cc   :  { %v3628_v12 = vadd.f32 %v3627_v27, %v3620_v17  ;;  %v11092_v50 = vpack.c.bf16 %v12748_v51, %v12747_v58  ;;  %v12751_v17 = vand.u32 4294901760, %v12744_v63  ;;  %v12758_v27 = vld [vmem:[#allocation93_spill] sm:$0xff]  ;;  %v12761_v58 = vld [vmem:[#allocation95_spill] sm:$0xff]  ;;  %v12762_v51 = vld [vmem:[#allocation96_spill] sm:$0xff] }
 0x3cd   :  { %v3633_v29 = vpop.permute.xlu1 %3632 }
 0x3ce   :  { %v3635_v1 = vmul.f32 %v3633_v29, %v3629_v55  ;;  %12749 = vst [vmem:[#allocation27_spill] sm:$0xff] %v11092_v50  ;;  %v12750_v55 = vand.u32 4294901760, %v10682_v6  ;;  %v12825_v50 = vld [vmem:[#allocation69_spill] sm:$0xff] }
 0x3d0   :  { %v3636_v54 = vadd.f32 %v3635_v1, %v3628_v12  ;;  %v12754_v1 = vand.u32 4294901760, %v10699_v37 }
 0x3d1   :  { %v6769_v42 = vpop.permute.xlu1 %6768 }
 0x3d2   :  { %v11080_v46 = vand.u32 4294901760, %v3636_v54  ;;  %6772 = vst.msk [vmem:[#allocation12 + $0x4] sm:$0x3] %vm6771_vm4, %v6769_v42  ;;  %v11098_v42 = vpack.c.bf16 %v12751_v17, %v12750_v55  ;;  %v11106_v12 = vpack.c.bf16 %v12754_v1, %v12753_v30  ;;  %v12763_v55 = vld [vmem:[#allocation97_spill] sm:$0xff]  ;;  %v12764_v17 = vld [vmem:[#allocation98_spill] sm:$0xff] }
 0x3d3   :  { %v12767_v30 = vld [vmem:[#allocation25_spill] sm:$0xff] }
 0x3d4   :  { %12746 = vst [vmem:[#allocation19_spill] sm:$0xff] %v11080_v46  ;;  %v11083_v16 = vsub.f32 %v3636_v54, %v11080_v46  ;;  %12752 = vst [vmem:[#allocation29_spill] sm:$0xff] %v11098_v42  ;;  %v12756_v54 = vld [vmem:[#allocation91_spill] sm:$0xff]  ;;  %v12768_v1 = vld [vmem:[#allocation101_spill] sm:$0xff] }
 0x3d5   :  { %v6781_v22 = vpop.permute.xlu1 %6780  ;;  %12755 = vst [vmem:[#allocation31_spill] sm:$0xff] %v11106_v12  ;;  %v12822_v12 = vld [vmem:[#allocation66_spill] sm:$0xff] }
 0x3d6   :  { %6784 = vst.msk [vmem:[#allocation12 + $0x4] sm:$0x3] %vm6783_vm5, %v6781_v22  ;;  %v11086_v39 = vand.u32 4294901760, %v11083_v16  ;;  %v12760_v22 = vmov 0.0  }
 0x3d8   :  { %v3801_v61 = vsub.f32 %v11083_v16, %v11086_v39 }
 0x3d9   :  { %v6793_v29 = vpop.permute.xlu1 %6792 }
 0x3da   :  { %6796 = vst.msk [vmem:[#allocation12 + $0x4] sm:$0x3] %vm6795_vm6, %v6793_v29  ;;  %v3802_v11 = vand.u32 4294901760, %v3801_v61  ;;  %v12765_v61 = vld [vmem:[#allocation99_spill] sm:$0xff]  ;;  %v12766_v29 = vld [vmem:[#allocation100_spill] sm:$0xff] }
 0x3dc   :  { %3803 = vmatmul.mubr.f32.vlgmr.msra.gmra.mrb[2].mxu0 %v3802_v11  ;;  %4658 = vmatmul.mubr.f32.vlgmr.msra.gmra.mrb[6].mxu1 %v3802_v11  ;;  %v12769_v11 = vld [vmem:[#allocation102_spill] sm:$0xff] }
 0x3dd   :  { %8383 = vmatpush1.bf16.msra.mxu0 %v12756_v54  ;;  %8575 = vmatpush1.bf16.msra.mxu1 %v12757_v13  ;;  %v6805_v56 = vpop.permute.xlu1 %6804  ;;  %v12770_v54 = vld [vmem:[#allocation103_spill] sm:$0xff]  ;;  %v12771_v13 = vld [vmem:[#allocation104_spill] sm:$0xff] }
 0x3de   :  { %6808 = vst.msk [vmem:[#allocation12 + $0x4] sm:$0x3] %vm6807_vm7, %v6805_v56  ;;  %8385 = vmatprep.subr.bf16.mxu0 %v12758_v27  ;;  %8577 = vmatprep.subr.bf16.mxu1 %v12759_v24  ;;  %v12772_v56 = vld [vmem:[#allocation105_spill] sm:$0xff]  ;;  %v12773_v27 = vld [vmem:[#allocation106_spill] sm:$0xff]  ;;  %v12774_v24 = vld [vmem:[#allocation107_spill] sm:$0xff] }
 0x3df   :  { %4033 = vmatprep.mubr.f32.mxu0 %v12760_v22  ;;  %4888 = vmatprep.mubr.f32.mxu1 %v12760_v22 }
 0x3e1   :  { %8387 = vmatpush1.bf16.msra.mxu0 %v12761_v58  ;;  %8579 = vmatpush1.bf16.msra.mxu1 %v12762_v51  ;;  %v12775_v58 = vld [vmem:[#allocation108_spill] sm:$0xff]  ;;  %v12776_v51 = vld [vmem:[#allocation109_spill] sm:$0xff] }
 0x3e2   :  { %8389 = vmatprep.subr.bf16.mxu0 %v12763_v55  ;;  %8581 = vmatprep.subr.bf16.mxu1 %v12764_v17  ;;  %v12777_v55 = vld [vmem:[#allocation110_spill] sm:$0xff]  ;;  %v12778_v17 = vld [vmem:[#allocation111_spill] sm:$0xff] }
 0x3e5   :  { %8391 = vmatpush1.bf16.msra.mxu0 %v12765_v61  ;;  %8583 = vmatpush1.bf16.msra.mxu1 %v12766_v29  ;;  %v12779_v61 = vld [vmem:[#allocation112_spill] sm:$0xff]  ;;  %v12780_v29 = vld [vmem:[#allocation113_spill] sm:$0xff] }
 0x3e6   :  { %8393 = vmatprep.subr.bf16.mxu0 %v12767_v30  ;;  %8585 = vmatprep.subr.bf16.mxu1 %v12768_v1  ;;  %v12781_v30 = vld [vmem:[#allocation114_spill] sm:$0xff]  ;;  %v12782_v1 = vld [vmem:[#allocation115_spill] sm:$0xff] }
 0x3e9   :  { %8395 = vmatpush1.bf16.msra.mxu0 %v12769_v11  ;;  %8587 = vmatpush1.bf16.msra.mxu1 %v12770_v54  ;;  %v12783_v11 = vld [vmem:[#allocation116_spill] sm:$0xff]  ;;  %v12784_v54 = vpack.c.bf16 %v10409_v60, %v10400_v38 }
 0x3ea   :  { %8397 = vmatprep.subr.bf16.mxu0 %v12771_v13  ;;  %8589 = vmatprep.subr.bf16.mxu1 %v12772_v56  ;;  %v12785_v13 = vpack.c.bf16 %v12726_v7, %v10414_v48  ;;  %v11148_v56 = vpop.f32.mrb[4].mxu1 }
 0x3eb   :  { %12786 = vst [vmem:[#allocation39_spill] sm:$0xff] %v11148_v56  ;;  %v12819_v56 = vld [vmem:[#allocation64_spill] sm:$0xff] }
 0x3ed   :  { %8399 = vmatpush1.bf16.msra.mxu0 %v12773_v27  ;;  %8591 = vmatpush1.bf16.msra.mxu1 %v12774_v24  ;;  %v12790_v27 = vpack.c.bf16 %v10447_v45, %v10443_v9  ;;  %v12791_v24 = vpack.c.bf16 %v10452_v31, %v10449_v15 }
 0x3ee   :  { %8401 = vmatprep.subr.bf16.mxu0 %v12775_v58  ;;  %8593 = vmatprep.subr.bf16.mxu1 %v12776_v51  ;;  %v12792_v58 = vpack.c.bf16 %v10460_v62, %v10454_v59  ;;  %v12793_v51 = vpack.c.bf16 %v10466_v41, %v10464_v44 }
 0x3f1   :  { %8403 = vmatpush1.bf16.msra.mxu0 %v12777_v55  ;;  %8595 = vmatpush1.bf16.msra.mxu1 %v12778_v17  ;;  %v12794_v55 = vpack.c.bf16 %v10519_v32, %v10515_v36  ;;  %v12795_v17 = vpack.c.bf16 %v10526_v28, %v10523_v40 }
 0x3f2   :  { %8405 = vmatprep.subr.bf16.mxu0 %v12779_v61  ;;  %8597 = vmatprep.subr.bf16.mxu1 %v12780_v29  ;;  %v12796_v61 = vpack.c.bf16 %v10532_v47, %v10530_v20  ;;  %v12797_v29 = vpack.c.bf16 %v10541_v5, %v10536_v21 }
 0x3f5   :  { %8407 = vmatpush1.bf16.msra.mxu0 %v12781_v30  ;;  %8599 = vmatpush1.bf16.msra.mxu1 %v12782_v1  ;;  %v12798_v30 = vld [vmem:[#allocation54_spill] sm:$0xff]  ;;  %v12799_v1 = vld [vmem:[#allocation53_spill] sm:$0xff] }
 0x3f6   :  { %8409 = vmatprep.subr.bf16.mxu0 %v12783_v11  ;;  %8601 = vmatprep.subr.bf16.mxu1 %v11012_v34  ;;  %v12787_v34 = vpack.c.bf16 %v10434_v25, %v12727_v35  ;;  %v12800_v11 = vpack.c.bf16 %v12798_v30, %v12799_v1 }
 0x3f9   :  { %8411 = vmatpush1.bf16.msra.mxu0 %v11020_v57  ;;  %8603 = vmatpush1.bf16.msra.mxu1 %v11028_v8  ;;  %v12788_v57 = vpack.c.bf16 %v10440_v33, %v12728_v49  ;;  %v11156_v8 = vpop.f32.mrb[5].mxu1 }
 0x3fa   :  { %8413 = vmatprep.subr.bf16.mxu0 %v12784_v54  ;;  %8605 = vmatprep.subr.bf16.mxu1 %v12785_v13  ;;  %12789 = vst [vmem:[#allocation57_spill] sm:$0xff] %v11156_v8  ;;  %v12801_v54 = vld [vmem:[#allocation35_spill] sm:$0xff]  ;;  %v12802_v13 = vld [vmem:[#allocation56_spill] sm:$0xff] }
 0x3fc   :  { %4035 = vmatmul.mubr.f32.vlgmr.msra.gmra.mrb[2].mxu0 %v11080_v46  ;;  %4890 = vmatmul.mubr.f32.vlgmr.msra.gmra.mrb[6].mxu1 %v11080_v46 }
 0x3fd   :  { %8415 = vmatpush1.bf16.msra.mxu0 %v12787_v34  ;;  %8607 = vmatpush1.bf16.msra.mxu1 %v12788_v57  ;;  %v12803_v34 = vpack.c.bf16 %v12801_v54, %v12802_v13  ;;  %v12804_v57 = vld [vmem:[#allocation23_spill] sm:$0xff] }
 0x3fe   :  { %8417 = vmatprep.subr.bf16.mxu0 %v12790_v27  ;;  %8609 = vmatprep.subr.bf16.mxu1 %v12791_v24  ;;  %v12805_v27 = vld [vmem:[#allocation38_spill] sm:$0xff] }
 0x3ff   :  { %4169 = vmatprep.mubr.f32.mxu0 %v12760_v22  ;;  %5024 = vmatprep.mubr.f32.mxu1 %v12760_v22  ;;  %v12806_v24 = vpack.c.bf16 %v12804_v57, %v12805_v27 }
 0x401   :  { %8419 = vmatpush1.bf16.msra.mxu0 %v12792_v58  ;;  %8611 = vmatpush1.bf16.msra.mxu1 %v12793_v51  ;;  %v12807_v58 = vpack.c.bf16 %v12730_v23, %v12694_v10  ;;  %v12808_v51 = vpack.c.bf16 %v10577_v4, %v12731_v19 }
 0x402   :  { %8421 = vmatprep.subr.bf16.mxu0 %v12794_v55  ;;  %8613 = vmatprep.subr.bf16.mxu1 %v12795_v17  ;;  %v12809_v55 = vpack.c.bf16 %v12733_v52, %v12732_v43  ;;  %v12810_v17 = vld [vmem:[#allocation45_spill] sm:$0xff] }
 0x405   :  { %8423 = vmatpush1.bf16.msra.mxu0 %v12796_v61  ;;  %8615 = vmatpush1.bf16.msra.mxu1 %v12797_v29  ;;  %v12811_v61 = vpack.c.bf16 %v12735_v14, %v12810_v17  ;;  %v12812_v29 = vld [vmem:[#allocation51_spill] sm:$0xff] }
 0x406   :  { %8425 = vmatprep.subr.bf16.mxu0 %v12800_v11  ;;  %8617 = vmatprep.subr.bf16.mxu1 %v12803_v34  ;;  %v12813_v11 = vpack.c.bf16 %v12736_v53, %v12812_v29  ;;  %v12814_v34 = vpack.c.bf16 %v12738_v18, %v12737_v2  ;;  %v12828_v29 = vld [vmem:[#allocation72_spill] sm:$0xff] }
 0x407   :  { %v12831_v2 = vld [vmem:[#allocation76_spill] sm:$0xff] }
 0x409   :  { %8427 = vmatpush1.bf16.msra.mxu0 %v12806_v24  ;;  %8619 = vmatpush1.bf16.msra.mxu1 %v12807_v58  ;;  %v12815_v24 = vld [vmem:[#allocation62_spill] sm:$0xff]  ;;  %v12816_v58 = vld [vmem:[#allocation61_spill] sm:$0xff] }
 0x40a   :  { %8429 = vmatprep.subr.bf16.mxu0 %v12808_v51  ;;  %8621 = vmatprep.subr.bf16.mxu1 %v12809_v55  ;;  %v12817_v8 = vpack.c.bf16 %v12815_v24, %v12816_v58  ;;  %v12818_v51 = vld [vmem:[#allocation65_spill] sm:$0xff]  ;;  %v12821_v55 = vld [vmem:[#allocation68_spill] sm:$0xff]  ;;  %v12834_v58 = vld [vmem:[#allocation78_spill] sm:$0xff] }
 0x40b   :  { %v12820_v46 = vpack.c.bf16 %v12818_v51, %v12819_v56  ;;  %v12823_v42 = vpack.c.bf16 %v12821_v55, %v12822_v12  ;;  %v12837_v56 = vld [vmem:[#allocation82_spill] sm:$0xff] }
 0x40d   :  { %8431 = vmatpush1.bf16.msra.mxu0 %v12811_v61  ;;  %8623 = vmatpush1.bf16.msra.mxu1 %v12813_v11  ;;  %v12824_v61 = vld [vmem:[#allocation71_spill] sm:$0xff]  ;;  %v12827_v11 = vld [vmem:[#allocation74_spill] sm:$0xff] }
 0x40e   :  { %8433 = vmatprep.subr.bf16.mxu0 %v12814_v34  ;;  %8625 = vmatprep.subr.bf16.mxu1 %v12817_v8  ;;  %v12826_v53 = vpack.c.bf16 %v12824_v61, %v12825_v50  ;;  %v12829_v18 = vpack.c.bf16 %v12827_v11, %v12828_v29  ;;  %v12830_v34 = vld [vmem:[#allocation77_spill] sm:$0xff]  ;;  %v12833_v8 = vld [vmem:[#allocation80_spill] sm:$0xff] }
 0x40f   :  { %v12832_v24 = vpack.c.bf16 %v12830_v34, %v12831_v2  ;;  %v12835_v51 = vpack.c.bf16 %v12833_v8, %v12834_v58  ;;  %v12843_v8 = vld [vmem:[#allocation36_spill] sm:$0xff] }
 0x411   :  { %8435 = vmatpush1.bf16.msra.mxu0 %v12820_v46  ;;  %8627 = vmatpush1.bf16.msra.mxu1 %v12823_v42  ;;  %v12836_v46 = vld [vmem:[#allocation83_spill] sm:$0xff]  ;;  %v12839_v42 = vpack.c.bf16 %v10678_v26, %v10676_v0  ;;  %v12845_v0 = vld [vmem:[#allocation37_spill] sm:$0xff]  ;;  %v12846_v26 = vld [vmem:[#allocation34_spill] sm:$0xff] }
 0x412   :  { %8437 = vmatprep.subr.bf16.mxu0 %v12826_v53  ;;  %8629 = vmatprep.subr.bf16.mxu1 %v12829_v18  ;;  %v12838_v55 = vpack.c.bf16 %v12836_v46, %v12837_v56  ;;  %v12840_v53 = vpack.c.bf16 %v12744_v63, %v10682_v6  ;;  %v12841_v18 = vpack.c.bf16 %v10699_v37, %v12745_v3  ;;  %v12847_v6 = vld [vmem:[#allocation42_spill] sm:$0xff]  ;;  %v12848_v37 = vld [vmem:[#allocation33_spill] sm:$0xff]  ;;  %v12849_v3 = vld [vmem:[#allocation43_spill] sm:$0xff] }
 0x413   :  { %v12850_v63 = vld [vmem:[#allocation46_spill] sm:$0xff] }
 0x415   :  { %8439 = vmatpush1.bf16.msra.mxu0 %v12832_v24  ;;  %8631 = vmatpush1.bf16.msra.mxu1 %v12835_v51  ;;  %v12842_v24 = vld [vmem:[#allocation26_spill] sm:$0xff]  ;;  %v12844_v51 = vld [vmem:[#allocation28_spill] sm:$0xff] }
 0x416   :  { %8441 = vmatprep.subr.bf16.mxu0 %v12838_v55  ;;  %8633 = vmatprep.subr.bf16.mxu1 %v12839_v42  ;;  %v12851_v55 = vld [vmem:[#allocation47_spill] sm:$0xff]  ;;  %v12853_v42 = vld [vmem:[#allocation49_spill] sm:$0xff] }
 0x419   :  { %8443 = vmatpush1.bf16.msra.mxu0 %v12840_v53  ;;  %8635 = vmatpush1.bf16.msra.mxu1 %v12841_v18  ;;  %v12854_v53 = vld [vmem:[#allocation50_spill] sm:$0xff]  ;;  %v12855_v18 = vld [vmem:[#allocation55_spill] sm:$0xff] }
 0x41a   :  { %8445 = vmatprep.subr.bf16.mxu0 %v12842_v24  ;;  %8637 = vmatprep.subr.bf16.mxu1 %v12843_v8 }
 0x41c   :  { %4172 = vmatmul.mubr.f32.vlgmr.msra.gmra.mrb[2].mxu0 %v11083_v16  ;;  %5027 = vmatmul.mubr.f32.vlgmr.msra.gmra.mrb[6].mxu1 %v11083_v16  ;;  %v12852_v16 = vld [vmem:[#allocation48_spill] sm:$0xff] }
 0x41d   :  { %8447 = vmatpush1.bf16.msra.mxu0 %v12844_v51  ;;  %8639 = vmatpush1.bf16.msra.mxu1 %v12845_v0  ;;  %v12858_v0 = vld [vmem:[#allocation32_spill] sm:$0xff]  ;;  %v12876_v51 = vld [vmem:[#allocation85_spill] sm:$0xff] }
 0x41e   :  { %8449 = vmatprep.subr.bf16.mxu0 %v12846_v26  ;;  %8641 = vmatprep.subr.bf16.mxu1 %v12847_v6  ;;  %v12856_v6 = vld [vmem:[#allocation21_spill] sm:$0xff]  ;;  %v12857_v26 = vld [vmem:[#allocation30_spill] sm:$0xff] }
 0x41f   :  { %4274 = vmatprep.mubr.f32.mxu0 %v12760_v22  ;;  %5129 = vmatprep.mubr.f32.mxu1 %v12760_v22 }
 0x421   :  { %8451 = vmatpush1.bf16.msra.mxu0 %v12848_v37  ;;  %8643 = vmatpush1.bf16.msra.mxu1 %v12849_v3  ;;  %v12859_v37 = vld [vmem:[#allocation52_spill] sm:$0xff] }
 0x422   :  { %8453 = vmatprep.subr.bf16.mxu0 %v12850_v63  ;;  %8645 = vmatprep.subr.bf16.mxu1 %v12851_v55  ;;  %v12860_v3 = vld [vmem:[#allocation44_spill] sm:$0xff]  ;;  %v12862_v55 = vld [vmem:[#allocation17_spill] sm:$0xff] }
 0x423   :  { %v12861_v63 = vld [vmem:[#allocation40_spill] sm:$0xff] }
 0x425   :  { %8455 = vmatpush1.bf16.msra.mxu0 %v12852_v16  ;;  %8647 = vmatpush1.bf16.msra.mxu1 %v12853_v42  ;;  %v12863_v16 = vld [vmem:[#allocation60_spill] sm:$0xff]  ;;  %v12864_v42 = vld [vmem:[#allocation63_spill] sm:$0xff] }
 0x426   :  { %8457 = vmatprep.subr.bf16.mxu0 %v12854_v53  ;;  %8649 = vmatprep.subr.bf16.mxu1 %v12855_v18  ;;  %v12865_v53 = vld [vmem:[#allocation67_spill] sm:$0xff]  ;;  %v12866_v18 = vld [vmem:[#allocation70_spill] sm:$0xff] }
 0x429   :  { %8459 = vmatpush1.bf16.msra.mxu0 %v12856_v6  ;;  %8651 = vmatpush1.bf16.msra.mxu1 %v12857_v26  ;;  %v12867_v6 = vld [vmem:[#allocation73_spill] sm:$0xff]  ;;  %v12868_v26 = vld [vmem:[#allocation75_spill] sm:$0xff] }
 0x42a   :  { %8461 = vmatprep.subr.bf16.mxu0 %v12858_v0  ;;  %8653 = vmatprep.subr.bf16.mxu1 %v12859_v37  ;;  %v12869_v0 = vld [vmem:[#allocation79_spill] sm:$0xff]  ;;  %v12870_v37 = vld [vmem:[#allocation81_spill] sm:$0xff] }
 0x42d   :  { %8463 = vmatpush1.bf16.msra.mxu0 %v12860_v3  ;;  %8655 = vmatpush1.bf16.msra.mxu1 %v12861_v63  ;;  %v12871_v3 = vld [vmem:[#allocation84_spill] sm:$0xff] }
 0x42e   :  { %8465 = vmatprep.subr.bf16.mxu0 %v12862_v55  ;;  %8657 = vmatprep.subr.bf16.mxu1 %v12863_v16  ;;  %v12872_v55 = vand.u32 4294901760, %v10400_v38  ;;  %v12873_v16 = vand.u32 4294901760, %v10409_v60  ;;  %v12881_v38 = vand.u32 4294901760, %v10440_v33  ;;  %v12887_v33 = vand.u32 4294901760, %v10460_v62 }
 0x42f   :  { %v12894_v62 = vand.u32 4294901760, %v10530_v20 }
 0x430   :  { %v8476_v63 = vpack.c.bf16 %v12873_v16, %v12872_v55  ;;  %v12884_v16 = vand.u32 4294901760, %v10449_v15  ;;  %v12890_v15 = vand.u32 4294901760, %v10515_v36  ;;  %v12896_v36 = vand.u32 4294901760, %v10536_v21 }
 0x431   :  { %8467 = vmatpush1.bf16.msra.mxu0 %v12864_v42  ;;  %8659 = vmatpush1.bf16.msra.mxu1 %v12865_v53  ;;  %v12874_v42 = vand.u32 4294901760, %v10414_v48  ;;  %v12875_v53 = vand.u32 4294901760, %v12726_v7  ;;  %v12882_v48 = vand.u32 4294901760, %v10443_v9  ;;  %v12883_v7 = vand.u32 4294901760, %v10447_v45 }
 0x432   :  { %8469 = vmatprep.subr.bf16.mxu0 %v12866_v18  ;;  %8661 = vmatprep.subr.bf16.mxu1 %v12867_v6  ;;  %v12877_v6 = vld [vmem:[#allocation88_spill] sm:$0xff]  ;;  %v12888_v9 = vand.u32 4294901760, %v10464_v44  ;;  %v12889_v45 = vand.u32 4294901760, %v10466_v41  ;;  %v12895_v44 = vand.u32 4294901760, %v10532_v47  ;;  %v12902_v47 = vand.u32 4294901760, %v12805_v27 }
 0x433   :  { %v8668_v18 = vpack.c.bf16 %v12875_v53, %v12874_v42  ;;  %v8480_v55 = vpack.c.bf16 %v12883_v7, %v12882_v48  ;;  %v12885_v42 = vand.u32 4294901760, %v10452_v31  ;;  %v12891_v31 = vand.u32 4294901760, %v10519_v32 }
 0x434   :  { %v8486_v41 = vpack.c.bf16 %v12895_v44, %v12894_v62  ;;  %v12897_v32 = vand.u32 4294901760, %v10541_v5  ;;  %v12900_v53 = vand.u32 4294901760, %v12802_v13  ;;  %v12903_v21 = vand.u32 4294901760, %v12804_v57 }
 0x435   :  { %8471 = vmatpush1.bf16.msra.mxu0 %v12868_v26  ;;  %8663 = vmatpush1.bf16.msra.mxu1 %v12869_v0  ;;  %v12878_v0 = vand.u32 4294901760, %v12727_v35  ;;  %v8672_v35 = vpack.c.bf16 %v12885_v42, %v12884_v16  ;;  %v12907_v13 = vand.u32 4294901760, %v10577_v4  ;;  %v12908_v48 = vand.u32 4294901760, %v12732_v43  ;;  %v12914_v42 = vld [vmem:[#allocation18_spill] sm:$0xff]  ;;  %v12916_v4 = vld [vmem:[#allocation20_spill] sm:$0xff] }
 0x436   :  { %8473 = vmatprep.subr.bf16.mxu0 %v12870_v37  ;;  %8665 = vmatprep.subr.bf16.mxu1 %v12871_v3  ;;  %v12879_v37 = vand.u32 4294901760, %v10434_v25  ;;  %v12880_v3 = vand.u32 4294901760, %v12728_v49  ;;  %v12886_v25 = vand.u32 4294901760, %v10454_v59  ;;  %v8490_v5 = vpack.c.bf16 %v12903_v21, %v12902_v47  ;;  %v12918_v43 = vld [vmem:[#allocation22_spill] sm:$0xff]  ;;  %v12942_v21 = vld [vmem:[#allocation27_spill] sm:$0xff] }
 0x437   :  { %v12909_v7 = vand.u32 4294901760, %v12733_v52  ;;  %v12910_v57 = vand.u32 4294901760, %v12810_v17 }
 0x438   :  { %v8478_v26 = vpack.c.bf16 %v12879_v37, %v12878_v0  ;;  %v8670_v60 = vpack.c.bf16 %v12881_v38, %v12880_v3  ;;  %v8482_v49 = vpack.c.bf16 %v12887_v33, %v12886_v25  ;;  %v8674_v0 = vpack.c.bf16 %v12889_v45, %v12888_v9  ;;  %v12922_v45 = vld [vmem:[#allocation62_spill] sm:$0xff] }
 0x439   :  { %8475 = vmatpush1.bf16.msra.mxu0 %v12876_v51  ;;  %8667 = vmatpush1.bf16.msra.mxu1 %v12877_v6  ;;  %v8484_v37 = vpack.c.bf16 %v12891_v31, %v12890_v15  ;;  %v8678_v3 = vpack.c.bf16 %v12897_v32, %v12896_v36  ;;  %v12904_v38 = vand.u32 4294901760, %v12694_v10  ;;  %v8684_v27 = vpack.c.bf16 %v12909_v7, %v12908_v48  ;;  %v12926_v31 = vld [vmem:[#allocation65_spill] sm:$0xff]  ;;  %v12957_v48 = vld [vmem:[#allocation55_spill] sm:$0xff] }
 0x43a   :  { %8477 = vmatprep.subr.bf16.mxu0 %v8476_v63  ;;  %8669 = vmatprep.subr.bf16.mxu1 %v8668_v18  ;;  %v12901_v18 = vand.u32 4294901760, %v12801_v54  ;;  %v12911_v10 = vand.u32 4294901760, %v12735_v14  ;;  %v12917_v25 = vand.u32 4294901760, %v12916_v4  ;;  %v12919_v33 = vand.u32 4294901760, %v12918_v43  ;;  %v12924_v14 = vld [vmem:[#allocation64_spill] sm:$0xff]  ;;  %v12958_v7 = vld [vmem:[#allocation21_spill] sm:$0xff] }
 0x43b   :  { %v12925_v15 = vand.u32 4294901760, %v12924_v14  ;;  %v12932_v36 = vand.u32 4294901760, %v12824_v61  ;;  %v12940_v61 = vand.u32 4294901760, %v12837_v56  ;;  %v12946_v56 = vld [vmem:[#allocation28_spill] sm:$0xff]  ;;  %v12968_v4 = vld [vmem:[#allocation70_spill] sm:$0xff]  ;;  %v12970_v43 = vld [vmem:[#allocation75_spill] sm:$0xff] }
 0x43c   :  { %4278 = vmatmul.mubr.f32.vlgmr.msra.gmra.mrb[2].mxu0 %v11086_v39  ;;  %5133 = vmatmul.mubr.f32.vlgmr.msra.gmra.mrb[6].mxu1 %v11086_v39  ;;  %v12892_v39 = vand.u32 4294901760, %v10523_v40  ;;  %v12898_v40 = vand.u32 4294901760, %v12799_v1  ;;  %v8680_v20 = vpack.c.bf16 %v12901_v18, %v12900_v53  ;;  %v8496_v52 = vpack.c.bf16 %v12919_v33, %v12917_v25  ;;  %v12969_v25 = vld [vmem:[#allocation73_spill] sm:$0xff]  ;;  %v12971_v33 = vld [vmem:[#allocation79_spill] sm:$0xff] }
 0x43d   :  { %8479 = vmatpush1.bf16.msra.mxu0 %v8478_v26  ;;  %8671 = vmatpush1.bf16.msra.mxu1 %v8670_v60  ;;  %v12893_v26 = vand.u32 4294901760, %v10526_v28  ;;  %v12899_v28 = vand.u32 4294901760, %v12798_v30  ;;  %v12905_v60 = vand.u32 4294901760, %v12730_v23  ;;  %v12906_v30 = vand.u32 4294901760, %v12731_v19 }
 0x43e   :  { %8481 = vmatprep.subr.bf16.mxu0 %v8480_v55  ;;  %8673 = vmatprep.subr.bf16.mxu1 %v8672_v35  ;;  %v8494_v23 = vpack.c.bf16 %v12911_v10, %v12910_v57  ;;  %v12912_v55 = vld [vmem:[#allocation51_spill] sm:$0xff]  ;;  %v12915_v35 = vand.u32 4294901760, %v12914_v42  ;;  %v12937_v18 = vand.u32 4294901760, %v12834_v58  ;;  %v12960_v57 = vld [vmem:[#allocation32_spill] sm:$0xff] }
 0x43f   :  { %v8676_v59 = vpack.c.bf16 %v12893_v26, %v12892_v39  ;;  %4444 = vmatprep.mubr.f32.mxu0 %v12760_v22  ;;  %5299 = vmatprep.mubr.f32.mxu1 %v12760_v22  ;;  %v8488_v63 = vpack.c.bf16 %v12899_v28, %v12898_v40  ;;  %v8682_v1 = vpack.c.bf16 %v12905_v60, %v12904_v38  ;;  %v12913_v16 = vand.u32 4294901760, %v12912_v55  ;;  %v12945_v58 = vld [vmem:[#allocation19_spill] sm:$0xff]  ;;  %v12949_v38 = vld [vmem:[#allocation42_spill] sm:$0xff]  ;;  %v12950_v60 = vld [vmem:[#allocation33_spill] sm:$0xff] }
 0x440   :  { %v8492_v54 = vpack.c.bf16 %v12907_v13, %v12906_v30  ;;  %v12928_v26 = vand.u32 4294901760, %v12822_v12  ;;  %v12934_v40 = vand.u32 4294901760, %v12827_v11  ;;  %v12936_v12 = vand.u32 4294901760, %v12830_v34  ;;  %v12944_v34 = vld [vmem:[#allocation31_spill] sm:$0xff]  ;;  %v12954_v30 = vld [vmem:[#allocation48_spill] sm:$0xff]  ;;  %v12955_v13 = vld [vmem:[#allocation49_spill] sm:$0xff] }
 0x441   :  { %8483 = vmatpush1.bf16.msra.mxu0 %v8482_v49  ;;  %8675 = vmatpush1.bf16.msra.mxu1 %v8674_v0  ;;  %v8686_v19 = vpack.c.bf16 %v12915_v35, %v12913_v16  ;;  %v12920_v49 = vld [vmem:[#allocation61_spill] sm:$0xff]  ;;  %v12923_v0 = vand.u32 4294901760, %v12922_v45  ;;  %v12961_v10 = vld [vmem:[#allocation52_spill] sm:$0xff]  ;;  %v12966_v35 = vld [vmem:[#allocation63_spill] sm:$0xff] }
 0x442   :  { %8485 = vmatprep.subr.bf16.mxu0 %v8484_v37  ;;  %8677 = vmatprep.subr.bf16.mxu1 %v8676_v59  ;;  %v12921_v9 = vand.u32 4294901760, %v12920_v49  ;;  %v12927_v37 = vand.u32 4294901760, %v12926_v31  ;;  %v12929_v59 = vld [vmem:[#allocation68_spill] sm:$0xff]  ;;  %v12964_v16 = vld [vmem:[#allocation17_spill] sm:$0xff] }
 0x443   :  { %v12930_v62 = vand.u32 4294901760, %v12929_v59  ;;  %v12963_v55 = vld [vmem:[#allocation40_spill] sm:$0xff] }
 0x444   :  { %v8688_v17 = vpack.c.bf16 %v12923_v0, %v12921_v9  ;;  %v8498_v39 = vpack.c.bf16 %v12927_v37, %v12925_v15  ;;  %v12965_v42 = vld [vmem:[#allocation60_spill] sm:$0xff]  ;;  %v5435_v9 = vld [vmem:[#allocation9 + $0x48] sm:$0xff]  ;;  %v9303_v15 = vmov 0.0|0.0   ;;  %v5438_v37 = vld [vmem:[#allocation9 + $0x150] sm:$0xff] }
 0x445   :  { %8487 = vmatpush1.bf16.msra.mxu0 %v8486_v41  ;;  %8679 = vmatpush1.bf16.msra.mxu1 %v8678_v3  ;;  %v8690_v44 = vpack.c.bf16 %v12930_v62, %v12928_v26  ;;  %v12931_v41 = vand.u32 4294901760, %v12825_v50  ;;  %v12933_v3 = vand.u32 4294901760, %v12828_v29  ;;  %v12941_v29 = vand.u32 4294901760, %v12836_v46  ;;  %v12947_v46 = vld [vmem:[#allocation37_spill] sm:$0xff]  ;;  %v12973_v49 = vld [vmem:[#allocation84_spill] sm:$0xff] }
 0x446   :  { %8489 = vmatprep.subr.bf16.mxu0 %v8488_v63  ;;  %8681 = vmatprep.subr.bf16.mxu1 %v8680_v20  ;;  %v12935_v63 = vand.u32 4294901760, %v12831_v2  ;;  %v12938_v20 = vld [vmem:[#allocation80_spill] sm:$0xff]  ;;  %v12943_v2 = vld [vmem:[#allocation29_spill] sm:$0xff]  ;;  %v5452_v0 = vand.u32 4294901760, %v5435_v9 }
 0x447   :  { %v8500_v32 = vpack.c.bf16 %v12932_v36, %v12931_v41  ;;  %v8692_v28 = vpack.c.bf16 %v12934_v40, %v12933_v3  ;;  %v12939_v47 = vand.u32 4294901760, %v12938_v20  ;;  %v8504_v11 = vpack.c.bf16 %v12941_v29, %v12940_v61  ;;  %v5436_v45 = vld [vmem:[#allocation9 + $0xa0] sm:$0xff]  ;;  %v5437_v31 = vld [vmem:[#allocation9 + $0xf8] sm:$0xff]  ;;  %v5439_v26 = vld [vmem:[#allocation9 + $0x1a8] sm:$0xff] }
 0x448   :  { %v8502_v53 = vpack.c.bf16 %v12936_v12, %v12935_v63  ;;  %v5440_v59 = vld [vmem:[#allocation9 + $0x200] sm:$0xff]  ;;  %v5464_v62 = vand.u32 4294901760, %v5439_v26  ;;  %v11450_v41 = vsub.f32 %v5435_v9, %v5452_v0  ;;  %v5441_v40 = vld [vmem:[#allocation9 + $0x258] sm:$0xff]  ;;  %v5443_v63 = vld [vmem:[#allocation9 + $0x308] sm:$0xff] }
 0x449   :  { %8491 = vmatpush1.bf16.msra.mxu0 %v8490_v5  ;;  %8683 = vmatpush1.bf16.msra.mxu1 %v8682_v1  ;;  %v8694_v50 = vpack.c.bf16 %v12939_v47, %v12937_v18  ;;  %v12948_v5 = vld [vmem:[#allocation34_spill] sm:$0xff]  ;;  %v12953_v1 = vld [vmem:[#allocation47_spill] sm:$0xff]  ;;  %v5470_v20 = vand.u32 4294901760, %v5441_v40  ;;  %v5444_v47 = vld [vmem:[#allocation9 + $0x360] sm:$0xff] }
 0x44a   :  { %8493 = vmatprep.subr.bf16.mxu0 %v8492_v54  ;;  %8685 = vmatprep.subr.bf16.mxu1 %v8684_v27  ;;  %v12956_v54 = vld [vmem:[#allocation50_spill] sm:$0xff] }
 0x44b   :  { %v12959_v27 = vld [vmem:[#allocation30_spill] sm:$0xff] }
 0x44c   :  { %v5446_v61 = vld [vmem:[#allocation9 + $0x410] sm:$0xff] }
 0x44d   :  { %8495 = vmatpush1.bf16.msra.mxu0 %v8494_v23  ;;  %8687 = vmatpush1.bf16.msra.mxu1 %v8686_v19  ;;  %v12962_v23 = vld [vmem:[#allocation44_spill] sm:$0xff]  ;;  %v12967_v19 = vld [vmem:[#allocation67_spill] sm:$0xff] }
 0x44e   :  { %8497 = vmatprep.subr.bf16.mxu0 %v8496_v52  ;;  %8689 = vmatprep.subr.bf16.mxu1 %v8688_v17  ;;  %v12972_v52 = vld [vmem:[#allocation81_spill] sm:$0xff]  ;;  %v5455_v17 = vand.u32 4294901760, %v5436_v45 }
 0x450   :  { %v11441_v14 = vpack.c.bf16 %v5455_v17, %v5452_v0  ;;  %v11452_v36 = vsub.f32 %v5436_v45, %v5455_v17 }
 0x451   :  { %8499 = vmatpush1.bf16.msra.mxu0 %v8498_v39  ;;  %8691 = vmatpush1.bf16.msra.mxu1 %v8690_v44  ;;  %v5467_v44 = vand.u32 4294901760, %v5440_v59 }
 0x452   :  { %8501 = vmatprep.subr.bf16.mxu0 %v8500_v32  ;;  %8693 = vmatprep.subr.bf16.mxu1 %v8692_v28  ;;  %v5442_v28 = vld [vmem:[#allocation9 + $0x2b0] sm:$0xff] }
 0x453   :  { %v11459_v12 = vpack.c.bf16 %v5467_v44, %v5464_v62  ;;  %v11463_v18 = vsub.f32 %v5440_v59, %v5467_v44  ;;  %v5473_v29 = vand.u32 4294901760, %v5442_v28 }
 0x455   :  { %8503 = vmatpush1.bf16.msra.mxu0 %v8502_v53  ;;  %8695 = vmatpush1.bf16.msra.mxu1 %v8694_v50  ;;  %v11461_v53 = vsub.f32 %v5439_v26, %v5464_v62  ;;  %v5445_v50 = vld [vmem:[#allocation9 + $0x3b8] sm:$0xff]  ;;  %v12410_v26 = vand.u32 4294901760, %v11463_v18 }
 0x456   :  { %8505 = vmatprep.subr.bf16.mxu0 %v8504_v11  ;;  %8697 = vmatprep.subr.bf16.mxu1 %v12942_v21  ;;  %v5476_v11 = vand.u32 4294901760, %v5443_v63  ;;  %v5479_v21 = vand.u32 4294901760, %v5444_v47 }
 0x457   :  { %v5581_v44 = vsub.f32 %v11463_v18, %v12410_v26 }
 0x459   :  { %8507 = vmatpush1.bf16.msra.mxu0 %v12943_v2  ;;  %8699 = vmatpush1.bf16.msra.mxu1 %v12944_v34  ;;  %v5447_v2 = vld [vmem:[#allocation9 + $0x468] sm:$0xff]  ;;  %v5448_v34 = vld [vmem:[#allocation9 + $0x4c0] sm:$0xff] }
 0x45a   :  { %8509 = vmatprep.subr.bf16.mxu0 %v12842_v24  ;;  %8701 = vmatprep.subr.bf16.mxu1 %v12843_v8  ;;  %v12951_v24 = vld [vmem:[#allocation43_spill] sm:$0xff]  ;;  %v12952_v8 = vld [vmem:[#allocation46_spill] sm:$0xff] }
 0x45c   :  { %4446 = vmatmul.mubr.f32.vlgmr.msra.gmra.mrb[2].mxu0 %v12945_v58  ;;  %5301 = vmatmul.mubr.f32.vlgmr.msra.gmra.mrb[6].mxu1 %v12945_v58 }
 0x45d   :  { %8511 = vmatpush1.bf16.msra.mxu0 %v12946_v56  ;;  %8703 = vmatpush1.bf16.msra.mxu1 %v12947_v46  ;;  %v5482_v56 = vand.u32 4294901760, %v5445_v50  ;;  %v5485_v46 = vand.u32 4294901760, %v5446_v61 }
 0x45e   :  { %8513 = vmatprep.subr.bf16.mxu0 %v12948_v5  ;;  %8705 = vmatprep.subr.bf16.mxu1 %v12949_v38  ;;  %v5488_v5 = vand.u32 4294901760, %v5447_v2  ;;  %v5449_v38 = vld [vmem:[#allocation9 + $0x518] sm:$0xff] }
 0x45f   :  { %4548 = vmatprep.mubr.f32.mxu0 %v12760_v22  ;;  %5403 = vmatprep.mubr.f32.mxu1 %v12760_v22 }
 0x461   :  { %8515 = vmatpush1.bf16.msra.mxu0 %v12950_v60  ;;  %8707 = vmatpush1.bf16.msra.mxu1 %v12951_v24  ;;  %v11469_v60 = vpack.c.bf16 %v5473_v29, %v5470_v20  ;;  %v11471_v24 = vsub.f32 %v5442_v28, %v5473_v29  ;;  %v5582_v28 = vand.u32 4294901760, %v5581_v44 }
 0x462   :  { %8517 = vmatprep.subr.bf16.mxu0 %v12952_v8  ;;  %8709 = vmatprep.subr.bf16.mxu1 %v12953_v1  ;;  %v11473_v8 = vsub.f32 %v5443_v63, %v5476_v11  ;;  %v5491_v1 = vand.u32 4294901760, %v5448_v34 }
 0x465   :  { %8519 = vmatpush1.bf16.msra.mxu0 %v12954_v30  ;;  %8711 = vmatpush1.bf16.msra.mxu1 %v12955_v13  ;;  %v5450_v30 = vld [vmem:[#allocation9 + $0x570] sm:$0xff]  ;;  %v11475_v13 = vsub.f32 %v5444_v47, %v5479_v21 }
 0x466   :  { %8521 = vmatprep.subr.bf16.mxu0 %v12956_v54  ;;  %8713 = vmatprep.subr.bf16.mxu1 %v12957_v48  ;;  %v11477_v54 = vsub.f32 %v5445_v50, %v5482_v56  ;;  %v11479_v48 = vsub.f32 %v5446_v61, %v5485_v46 }
 0x469   :  { %8523 = vmatpush1.bf16.msra.mxu0 %v12958_v7  ;;  %8715 = vmatpush1.bf16.msra.mxu1 %v12959_v27  ;;  %v11481_v7 = vsub.f32 %v5447_v2, %v5488_v5  ;;  %v11483_v27 = vsub.f32 %v5448_v34, %v5491_v1  ;;  %v12406_v2 = vand.u32 4294901760, %v11475_v13 }
 0x46a   :  { %8525 = vmatprep.subr.bf16.mxu0 %v12960_v57  ;;  %8717 = vmatprep.subr.bf16.mxu1 %v12961_v10  ;;  %v5494_v57 = vand.u32 4294901760, %v5449_v38  ;;  %v11486_v10 = vpack.c.bf16 %v5479_v21, %v5476_v11  ;;  %v12407_v21 = vand.u32 4294901760, %v11473_v8 }
 0x46d   :  { %8527 = vmatpush1.bf16.msra.mxu0 %v12962_v23  ;;  %8719 = vmatpush1.bf16.msra.mxu1 %v12963_v55  ;;  %v5497_v23 = vand.u32 4294901760, %v5450_v30  ;;  %v11489_v55 = vsub.f32 %v5449_v38, %v5494_v57 }
 0x46e   :  { %8529 = vmatprep.subr.bf16.mxu0 %v12964_v16  ;;  %8721 = vmatprep.subr.bf16.mxu1 %v12965_v42  ;;  %v11498_v42 = vpack.c.bf16 %v5485_v46, %v5482_v56  ;;  %v5602_v56 = vsub.f32 %v11473_v8, %v12407_v21  ;;  %v5609_v46 = vsub.f32 %v11475_v13, %v12406_v2 }
 0x46f   :  { %v11493_v16 = vsub.f32 %v5450_v30, %v5497_v23  ;;  %v12404_v30 = vand.u32 4294901760, %v11479_v48 }
 0x470   :  { %v5610_v38 = vand.u32 4294901760, %v5609_v46 }
 0x471   :  { %8531 = vmatpush1.bf16.msra.mxu0 %v12966_v35  ;;  %8723 = vmatpush1.bf16.msra.mxu1 %v12967_v19  ;;  %v11502_v35 = vpack.c.bf16 %v5491_v1, %v5488_v5  ;;  %v11506_v19 = vpack.c.bf16 %v5497_v23, %v5494_v57  ;;  %v5603_v5 = vand.u32 4294901760, %v5602_v56  ;;  %v12405_v1 = vand.u32 4294901760, %v11477_v54 }
 0x472   :  { %8533 = vmatprep.subr.bf16.mxu0 %v12968_v4  ;;  %8725 = vmatprep.subr.bf16.mxu1 %v12969_v25  ;;  %v12415_v4 = vand.u32 4294901760, %v11450_v41  ;;  %v12414_v25 = vand.u32 4294901760, %v11452_v36 }
 0x473   :  { %v11561_v57 = vpack.c.bf16 %v5610_v38, %v5603_v5  ;;  %v5616_v23 = vsub.f32 %v11477_v54, %v12405_v1  ;;  %v8781_v5 = vpack.c.bf16 %v11452_v36, %v11450_v41 }
 0x475   :  { %8535 = vmatpush1.bf16.msra.mxu0 %v12970_v43  ;;  %8727 = vmatpush1.bf16.msra.mxu1 %v12971_v33  ;;  %v5546_v43 = vsub.f32 %v11450_v41, %v12415_v4  ;;  %v5553_v33 = vsub.f32 %v11452_v36, %v12414_v25  ;;  %v12979_v25 = vld [vmem:[#allocation24_spill] sm:$0xff] }
 0x476   :  { %8537 = vmatprep.subr.bf16.mxu0 %v12972_v52  ;;  %8729 = vmatprep.subr.bf16.mxu1 %v12973_v49 }
 0x477   :  { %v5547_v52 = vand.u32 4294901760, %v5546_v43  ;;  %v5554_v49 = vand.u32 4294901760, %v5553_v33  ;;  %v5623_v43 = vsub.f32 %v11479_v48, %v12404_v30  ;;  %v5617_v33 = vand.u32 4294901760, %v5616_v23  ;;  %v12977_v30 = vld [vmem:[#allocation39_spill] sm:$0xff] }
 0x478   :  { %v8787_v23 = vpack.c.bf16 %v11463_v18, %v11461_v53 }
 0x479   :  { %8539 = vmatpush1.bf16.msra.mxu0 %v12876_v51  ;;  %8731 = vmatpush1.bf16.msra.mxu1 %v12877_v6  ;;  %v5458_v51 = vand.u32 4294901760, %v5437_v31  ;;  %v5461_v6 = vand.u32 4294901760, %v5438_v37  ;;  %v11521_v0 = vpack.c.bf16 %v5554_v49, %v5547_v52  ;;  %v5624_v52 = vand.u32 4294901760, %v5623_v43 }
 0x47a   :  { %8732 = vmatprep.subr.bf16.mxu1 %v9303_v15  ;;  %8876 = vmatprep.subr.bf16.mxu0 %v9303_v15  ;;  %v12403_v49 = vand.u32 4294901760, %v11481_v7 }
 0x47b   :  { %v11447_v39 = vpack.c.bf16 %v5461_v6, %v5458_v51  ;;  %v11454_v32 = vsub.f32 %v5437_v31, %v5458_v51  ;;  %v11456_v3 = vsub.f32 %v5438_v37, %v5461_v6  ;;  %v12411_v6 = vand.u32 4294901760, %v11461_v53 }
 0x47c   :  { %4550 = vmatmul.mubr.f32.vlgmr.msra.gmra.mrb[2].mxu0 %v12945_v58  ;;  %5405 = vmatmul.mubr.f32.vlgmr.msra.gmra.mrb[6].mxu1 %v12945_v58  ;;  %v11466_v58 = vsub.f32 %v5441_v40, %v5470_v20  ;;  %v12408_v20 = vand.u32 4294901760, %v11471_v24 }
 0x47d   :  { %8734 = vmatpush3.bf16.msra.mxu1 %v11441_v14  ;;  %7384 = vmatprep.mubr.msk.f32.mxu1 %vm9304_vm8, %v12760_v22  ;;  %v12413_v9 = vand.u32 4294901760, %v11454_v32  ;;  %v12412_v45 = vand.u32 4294901760, %v11456_v3  ;;  %v5574_v62 = vsub.f32 %v11461_v53, %v12411_v6  ;;  %v8784_v38 = vpack.c.bf16 %v11456_v3, %v11454_v32 }
 0x47e   :  { %8735 = vmatprep.subr.bf16.mxu1 %v9303_v15  ;;  %7594 = vmatprep.mubr.msk.f32.mxu0 %vm9304_vm8, %v12760_v22  ;;  %v12409_v63 = vand.u32 4294901760, %v11466_v58  ;;  %v5595_v61 = vsub.f32 %v11471_v24, %v12408_v20  ;;  %v8790_v43 = vpack.c.bf16 %v11471_v24, %v11466_v58 }
 0x47f   :  { %v5560_v17 = vsub.f32 %v11454_v32, %v12413_v9  ;;  %v5567_v31 = vsub.f32 %v11456_v3, %v12412_v45  ;;  %v5575_v40 = vand.u32 4294901760, %v5574_v62  ;;  %v12978_v45 = vld [vmem:[#allocation87_spill] sm:$0xff] }
 0x480   :  { %v5588_v50 = vsub.f32 %v11466_v58, %v12409_v63  ;;  %v5596_v11 = vand.u32 4294901760, %v5595_v61 }
 0x481   :  { %8737 = vmatpush3.bf16.msra.mxu1 %v11447_v39  ;;  %v5561_v37 = vand.u32 4294901760, %v5560_v17  ;;  %v5568_v51 = vand.u32 4294901760, %v5567_v31  ;;  %v11541_v47 = vpack.c.bf16 %v5582_v28, %v5575_v40  ;;  %v12402_v17 = vand.u32 4294901760, %v11483_v27 }
 0x482   :  { %8738 = vmatprep.subr.bf16.mxu1 %v9303_v15  ;;  %v5589_v29 = vand.u32 4294901760, %v5588_v50  ;;  %v11571_v31 = vpack.c.bf16 %v5624_v52, %v5617_v33  ;;  %v12401_v40 = vand.u32 4294901760, %v11489_v55  ;;  %v12400_v28 = vand.u32 4294901760, %v11493_v16 }
 0x483   :  { %v11531_v59 = vpack.c.bf16 %v5568_v51, %v5561_v37  ;;  %v5630_v37 = vsub.f32 %v11481_v7, %v12403_v49  ;;  %v5637_v51 = vsub.f32 %v11483_v27, %v12402_v17  ;;  %v8793_v33 = vpack.c.bf16 %v11475_v13, %v11473_v8 }
 0x484   :  { %v11551_v34 = vpack.c.bf16 %v5596_v11, %v5589_v29  ;;  %v5644_v61 = vsub.f32 %v11489_v55, %v12401_v40  ;;  %v5651_v29 = vsub.f32 %v11493_v16, %v12400_v28  ;;  %v9168_v28 = vld [vmem:[%s12060_s5] sm:$0xf] }
 0x485   :  { %8740 = vmatpush3.bf16.msra.mxu1 %v11459_v12  ;;  %v5631_v62 = vand.u32 4294901760, %v5630_v37  ;;  %v5638_v44 = vand.u32 4294901760, %v5637_v51 }
 0x486   :  { %8741 = vmatprep.subr.bf16.mxu1 %v9303_v15  ;;  %v5645_v11 = vand.u32 4294901760, %v5644_v61  ;;  %v5652_v56 = vand.u32 4294901760, %v5651_v29 }
 0x487   :  { %v11581_v50 = vpack.c.bf16 %v5638_v44, %v5631_v62  ;;  %v11610_v62 = vld [vmem:[%s12060_s5 + $0x4] sm:$0xf]  ;;  %v12974_v44 = vld [vmem:[#allocation41_spill] sm:$0xff] }
 0x488   :  { %v11589_v46 = vpack.c.bf16 %v5652_v56, %v5645_v11  ;;  %v154_v61 = vsub.s32 2, %v12974_v44  ;;  %v12975_v11 = vsub.s32 0, %v12974_v44  ;;  %v12976_v17 = vsub.s32 1, %v12974_v44 }
 0x489   :  { %8743 = vmatpush3.bf16.msra.mxu1 %v11469_v60 }
 0x48a   :  { %8744 = vmatprep.subr.bf16.mxu1 %v9303_v15  ;;  %v1891_v29 = vrot.slane %v11610_v62, %v154_v61  ;;  %v1883_v56 = vrot.slane %v11610_v62, %v12975_v11  ;;  %v155_v40 = vrot.slane %v9168_v28, %v154_v61  ;;  %v1887_v49 = vrot.slane %v11610_v62, %v12976_v17 }
 0x48c   :  { %v9028_v1 = vadd.f32 %v12977_v30, %v1891_v29  ;;  %v9024_v11 = vadd.f32 %v12978_v45, %v155_v40  ;;  %v158_v30 = vsub.s32 3, %v12974_v44  ;;  %v12980_v29 = vld [vmem:[#allocation90_spill] sm:$0xff]  ;;  %v9169_v40 = vld [vmem:[%s12056_s1] sm:$0x3] }
 0x48d   :  { %8746 = vmatpush3.bf16.msra.mxu1 %v11486_v10 }
 0x48e   :  { %8747 = vmatprep.subr.bf16.mxu1 %v9303_v15 }
 0x491   :  { %8749 = vmatpush3.bf16.msra.mxu1 %v11498_v42 }
 0x492   :  { %8750 = vmatprep.subr.bf16.mxu1 %v9303_v15 }
 0x495   :  { %8752 = vmatpush3.bf16.msra.mxu1 %v11502_v35 }
 0x496   :  { %8753 = vmatprep.subr.bf16.mxu1 %v9303_v15 }
 0x499   :  { %8755 = vmatpush3.bf16.msra.mxu1 %v11506_v19 }
 0x49a   :  { %8756 = vmatprep.subr.bf16.mxu1 %v9303_v15 }
 0x54f   :  { %v4551_v2 = vpop.f32.mrb[2].mxu0  ;;  %v5406_v21 = vpop.f32.mrb[6].mxu1 }
 0x550   :  { %v9026_v20 = vadd.f32 %v4551_v2, %v1883_v56  ;;  %v5413_v63 = vadd.f32 %v9028_v1, %v5406_v21  ;;  %v4553_v26 = vpop.f32.mrb[3].mxu0  ;;  %v11624_v6 = vpop.f32.mrb[7].mxu1  ;;  %v159_v21 = vrot.slane %v9168_v28, %v158_v30 }
 0x551   :  { %v9027_v9 = vadd.f32 %v4553_v26, %v1887_v49 }
 0x552   :  { %v5414_v4 = vadd.f32 %v9026_v20, %v12979_v25  ;;  %v9025_v45 = vadd.f32 %v12980_v29, %v159_v21  ;;  %v6099_v21 = vld [vmem:[#allocation9 + $0x260] sm:$0xff]  ;;  %v6101_v29 = vld [vmem:[#allocation9 + $0x310] sm:$0xff] }
 0x553   :  { %v5421_v51 = vadd.f32 %v9027_v9, %v9024_v11 }
 0x554   :  { %v6827_v61 = vmul.f32 -1.442695, %v5414_v4 }
 0x555   :  { %v6828_v37 = vmul.f32 -1.442695, %v5421_v51 }
 0x556   :  { %9158 = vpow2.f32 %v6827_v61 }
 0x557   :  { %9160 = vpow2.f32 %v6828_v37 }
 0x560   :  { %v9159_v17 = vpop.eup %9158 }
 0x561   :  { %v5418_v52 = vadd.f32 1.0, %v9159_v17  ;;  %v9161_v2 = vpop.eup %9160 }
 0x562   :  { %v5425_v1 = vadd.f32 1.0, %v9161_v2 }
 0x563   :  { %9162 = vrcp.f32 %v5418_v52 }
 0x564   :  { %9164 = vrcp.f32 %v5425_v1  ;;  %v6100_v1 = vld [vmem:[#allocation9 + $0x2b8] sm:$0xff] }
 0x56d   :  { %v9163_v26 = vpop.eup %9162 }
 0x56e   :  { %v5428_v49 = vmul.f32 %v9163_v26, %v9025_v45  ;;  %v9165_v4 = vpop.eup %9164 }
 0x56f   :  { %v5431_v9 = vsub.f32 1.0, %v9165_v4  ;;  %v5433_v52 = vmul.f32 %v9169_v40, %v9165_v4  ;;  %v6102_v4 = vld [vmem:[#allocation9 + $0x368] sm:$0xff] }
 0x570   :  { %v5429_v25 = vadd.f32 %v5428_v49, %v5413_v63 }
 0x572   :  { %9166 = vtanh.f32 %v5429_v25 }
 0x57c   :  { %v9167_v20 = vpop.eup %9166 }
 0x57d   :  { %v5432_v37 = vmul.f32 %v9167_v20, %v5431_v9 }
 0x57f   :  { %v5434_v51 = vadd.f32 %v5433_v52, %v5432_v37  ;;  %v6135_v37 = vand.u32 4294901760, %v6099_v21 }
 0x581   :  { %v11635_v56 = vand.u32 4294901760, %v5434_v51  ;;  %6757 = vst [vmem:[#allocation12] sm:$0x3] %v5434_v51 }
 0x583   :  { %v11638_v28 = vsub.f32 %v5434_v51, %v11635_v56  ;;  %v6138_v51 = vand.u32 4294901760, %v6100_v1 }
 0x585   :  { %v5534_v11 = vand.u32 4294901760, %v11638_v28 }
 0x587   :  { %v5535_v63 = vsub.f32 %v11638_v28, %v5534_v11 }
 0x589   :  { %v5536_v61 = vand.u32 4294901760, %v5535_v63  ;;  %v6141_v63 = vand.u32 4294901760, %v6101_v29 }
 0x58b   :  { %7385 = vmatmul.mubr.f32.vlgmr.msra.gmra.mrb[8].mxu1 %v5536_v61  ;;  %v6144_v61 = vand.u32 4294901760, %v6102_v4 }
 0x58c   :  { %8758 = vmatpush3.bf16.msra.mxu1 %v11521_v0  ;;  %7419 = vmatprep.mubr.msk.f32.mxu1 %vm9304_vm8, %v12760_v22  ;;  %v12981_v0 = vpack.c.bf16 %v11479_v48, %v11477_v54 }
 0x58d   :  { %8759 = vmatprep.subr.bf16.mxu1 %v9303_v15 }
 0x590   :  { %8761 = vmatpush3.bf16.msra.mxu1 %v11531_v59  ;;  %v12982_v59 = vpack.c.bf16 %v11483_v27, %v11481_v7 }
 0x591   :  { %8762 = vmatprep.subr.bf16.mxu1 %v9303_v15 }
 0x594   :  { %8764 = vmatpush3.bf16.msra.mxu1 %v11541_v47  ;;  %v12983_v47 = vpack.c.bf16 %v11493_v16, %v11489_v55 }
 0x595   :  { %8765 = vmatprep.subr.bf16.mxu1 %v9303_v15 }
 0x598   :  { %8767 = vmatpush3.bf16.msra.mxu1 %v11551_v34  ;;  %v6093_v34 = vld [vmem:[#allocation9 + $0x50] sm:$0xff] }
 0x599   :  { %8768 = vmatprep.subr.bf16.mxu1 %v9303_v15 }
 0x59c   :  { %8770 = vmatpush3.bf16.msra.mxu1 %v11561_v57  ;;  %v6094_v57 = vld [vmem:[#allocation9 + $0xa8] sm:$0xff] }
 0x59d   :  { %8771 = vmatprep.subr.bf16.mxu1 %v9303_v15 }
 0x5a0   :  { %8773 = vmatpush3.bf16.msra.mxu1 %v11571_v31  ;;  %v6095_v31 = vld [vmem:[#allocation9 + $0x100] sm:$0xff] }
 0x5a1   :  { %8774 = vmatprep.subr.bf16.mxu1 %v9303_v15 }
 0x5a4   :  { %8776 = vmatpush3.bf16.msra.mxu1 %v11581_v50  ;;  %v6117_v50 = vand.u32 4294901760, %v6093_v34 }
 0x5a5   :  { %8777 = vmatprep.subr.bf16.mxu1 %v9303_v15 }
 0x5a6   :  { %v11714_v26 = vsub.f32 %v6093_v34, %v6117_v50  ;;  %v11738_v34 = vsub.f32 %v6102_v4, %v6144_v61 }
 0x5a8   :  { %8779 = vmatpush3.bf16.msra.mxu1 %v11589_v46  ;;  %v6120_v46 = vand.u32 4294901760, %v6094_v57 }
 0x5a9   :  { %8780 = vmatprep.subr.bf16.mxu1 %v9303_v15 }
 0x5aa   :  { %v11712_v45 = vpack.c.bf16 %v6120_v46, %v6117_v50  ;;  %v11716_v49 = vsub.f32 %v6094_v57, %v6120_v46  ;;  %v12984_v57 = vand.u32 4294901760, %v11450_v41 }
 0x5ab   :  { %7420 = vmatmul.mubr.f32.vlgmr.msra.gmra.mrb[10].mxu1 %v11635_v56 }
 0x5ac   :  { %8782 = vmatpush3.bf16.msra.mxu1 %v8781_v5  ;;  %7454 = vmatprep.mubr.msk.f32.mxu1 %vm9304_vm8, %v12760_v22  ;;  %v6096_v5 = vld [vmem:[#allocation9 + $0x158] sm:$0xff] }
 0x5ad   :  { %8783 = vmatprep.subr.bf16.mxu1 %v9303_v15  ;;  %8878 = vmatpush3.bf16.msra.mxu0 %v11712_v45 }
 0x5ae   :  { %8879 = vmatprep.subr.bf16.mxu0 %v9303_v15 }
 0x5b0   :  { %8785 = vmatpush3.bf16.msra.mxu1 %v8784_v38  ;;  %v6123_v38 = vand.u32 4294901760, %v6095_v31 }
 0x5b1   :  { %8786 = vmatprep.subr.bf16.mxu1 %v9303_v15 }
 0x5b2   :  { %v11718_v25 = vsub.f32 %v6095_v31, %v6123_v38  ;;  %v12985_v31 = vand.u32 4294901760, %v11452_v36  ;;  %v11760_v36 = vpack.c.bf16 %v6138_v51, %v6135_v37 }
 0x5b4   :  { %8788 = vmatpush3.bf16.msra.mxu1 %v8787_v23  ;;  %v6097_v23 = vld [vmem:[#allocation9 + $0x1b0] sm:$0xff]  ;;  %v8829_v50 = vpack.c.bf16 %v12985_v31, %v12984_v57 }
 0x5b5   :  { %8789 = vmatprep.subr.bf16.mxu1 %v9303_v15  ;;  %v6129_v17 = vand.u32 4294901760, %v6097_v23 }
 0x5b7   :  { %v11724_v40 = vsub.f32 %v6097_v23, %v6129_v17  ;;  %v12990_v23 = vand.u32 4294901760, %v11466_v58  ;;  %v12994_v58 = vand.u32 4294901760, %v11477_v54  ;;  %v6104_v54 = vld [vmem:[#allocation9 + $0x418] sm:$0xff] }
 0x5b8   :  { %8791 = vmatpush3.bf16.msra.mxu1 %v8790_v43  ;;  %v6098_v43 = vld [vmem:[#allocation9 + $0x208] sm:$0xff] }
 0x5b9   :  { %8792 = vmatprep.subr.bf16.mxu1 %v9303_v15  ;;  %v6132_v2 = vand.u32 4294901760, %v6098_v43 }
 0x5bb   :  { %v11728_v52 = vsub.f32 %v6098_v43, %v6132_v2  ;;  %v11748_v46 = vpack.c.bf16 %v6132_v2, %v6129_v17  ;;  %v12991_v43 = vand.u32 4294901760, %v11471_v24  ;;  %v12995_v24 = vand.u32 4294901760, %v11479_v48 }
 0x5bc   :  { %8794 = vmatpush3.bf16.msra.mxu1 %v8793_v33  ;;  %v6126_v33 = vand.u32 4294901760, %v6096_v5 }
 0x5bd   :  { %8795 = vmatprep.subr.bf16.mxu1 %v9303_v15  ;;  %v8844_v2 = vpack.c.bf16 %v12995_v24, %v12994_v58 }
 0x5be   :  { %v11720_v9 = vpack.c.bf16 %v6126_v33, %v6123_v38  ;;  %v11722_v20 = vsub.f32 %v6096_v5, %v6126_v33  ;;  %v12986_v5 = vand.u32 4294901760, %v11454_v32  ;;  %v12987_v38 = vand.u32 4294901760, %v11456_v3 }
 0x5bf   :  { %v11769_v3 = vpack.c.bf16 %v6144_v61, %v6141_v63  ;;  %v8838_v33 = vpack.c.bf16 %v12991_v43, %v12990_v23  ;;  %v6224_v23 = vand.u32 4294901760, %v11718_v25 }
 0x5c0   :  { %8797 = vmatpush3.bf16.msra.mxu1 %v12981_v0  ;;  %v11732_v0 = vsub.f32 %v6099_v21, %v6135_v37  ;;  %8881 = vmatpush3.bf16.msra.mxu0 %v11720_v9  ;;  %v8832_v41 = vpack.c.bf16 %v12987_v38, %v12986_v5  ;;  %v12996_v21 = vand.u32 4294901760, %v11481_v7  ;;  %v6150_v7 = vand.u32 4294901760, %v6104_v54 }
 0x5c1   :  { %8798 = vmatprep.subr.bf16.mxu1 %v9303_v15  ;;  %8882 = vmatprep.subr.bf16.mxu0 %v9303_v15  ;;  %v6231_v43 = vand.u32 4294901760, %v11722_v20 }
 0x5c2   :  { %v11833_v57 = vsub.f32 %v6104_v54, %v6150_v7 }
 0x5c3   :  { %v8976_v44 = vpack.c.bf16 %v6231_v43, %v6224_v23 }
 0x5c4   :  { %8800 = vmatpush3.bf16.msra.mxu1 %v12982_v59  ;;  %v11734_v59 = vsub.f32 %v6100_v1, %v6138_v51  ;;  %8884 = vmatpush3.bf16.msra.mxu0 %v11748_v46  ;;  %v12997_v1 = vand.u32 4294901760, %v11483_v27  ;;  %v6210_v51 = vand.u32 4294901760, %v11714_v26 }
 0x5c5   :  { %8801 = vmatprep.subr.bf16.mxu1 %v9303_v15  ;;  %8885 = vmatprep.subr.bf16.mxu0 %v9303_v15 }
 0x5c8   :  { %8803 = vmatpush3.bf16.msra.mxu1 %v12983_v47  ;;  %v11736_v47 = vsub.f32 %v6101_v29, %v6141_v63  ;;  %8887 = vmatpush3.bf16.msra.mxu0 %v11760_v36  ;;  %v8847_v29 = vpack.c.bf16 %v12997_v1, %v12996_v21  ;;  %v6217_v63 = vand.u32 4294901760, %v11716_v49  ;;  %v6245_v21 = vand.u32 4294901760, %v11728_v52 }
 0x5c9   :  { %8804 = vmatprep.subr.bf16.mxu1 %v9303_v15  ;;  %8888 = vmatprep.subr.bf16.mxu0 %v9303_v15 }
 0x5cb   :  { %7455 = vmatmul.mubr.f32.vlgmr.msra.gmra.mrb[10].mxu1 %v11638_v28  ;;  %v12988_v28 = vand.u32 4294901760, %v11461_v53  ;;  %v12992_v53 = vand.u32 4294901760, %v11473_v8  ;;  %v12998_v8 = vand.u32 4294901760, %v11489_v55  ;;  %v6106_v55 = vld [vmem:[#allocation9 + $0x4c8] sm:$0xff] }
 0x5cc   :  { %8806 = vmatpush3.bf16.msra.mxu1 %v11441_v14  ;;  %7489 = vmatprep.mubr.msk.f32.mxu1 %vm9304_vm8, %v12760_v22 }
 0x5cd   :  { %8807 = vmatprep.subr.bf16.mxu1 %v9303_v15  ;;  %8890 = vmatpush3.bf16.msra.mxu0 %v11769_v3 }
 0x5ce   :  { %8891 = vmatprep.subr.bf16.mxu0 %v9303_v15 }
 0x5d0   :  { %8809 = vmatpush3.bf16.msra.mxu1 %v11447_v39 }
 0x5d1   :  { %8810 = vmatprep.subr.bf16.mxu1 %v9303_v15 }
 0x5d4   :  { %8812 = vmatpush3.bf16.msra.mxu1 %v11459_v12 }
 0x5d5   :  { %8813 = vmatprep.subr.bf16.mxu1 %v9303_v15 }
 0x5d8   :  { %8815 = vmatpush3.bf16.msra.mxu1 %v11469_v60 }
 0x5d9   :  { %8816 = vmatprep.subr.bf16.mxu1 %v9303_v15 }
 0x5dc   :  { %8818 = vmatpush3.bf16.msra.mxu1 %v11486_v10 }
 0x5dd   :  { %8819 = vmatprep.subr.bf16.mxu1 %v9303_v15 }
 0x5e0   :  { %8821 = vmatpush3.bf16.msra.mxu1 %v11498_v42 }
 0x5e1   :  { %8822 = vmatprep.subr.bf16.mxu1 %v9303_v15 }
 0x5e4   :  { %8824 = vmatpush3.bf16.msra.mxu1 %v11502_v35 }
 0x5e5   :  { %8825 = vmatprep.subr.bf16.mxu1 %v9303_v15 }
 0x5e8   :  { %8827 = vmatpush3.bf16.msra.mxu1 %v11506_v19 }
 0x5e9   :  { %8828 = vmatprep.subr.bf16.mxu1 %v9303_v15 }
 0x5eb   :  { %7490 = vmatmul.mubr.f32.vlgmr.msra.gmra.mrb[10].mxu1 %v5534_v11  ;;  %v12989_v11 = vand.u32 4294901760, %v11463_v18  ;;  %v12993_v18 = vand.u32 4294901760, %v11475_v13  ;;  %v12999_v13 = vand.u32 4294901760, %v11493_v16 }
 0x5ec   :  { %8830 = vmatpush3.bf16.msra.mxu1 %v8829_v50  ;;  %7524 = vmatprep.mubr.msk.f32.mxu1 %vm9304_vm8, %v12760_v22 }
 0x5ed   :  { %8831 = vmatprep.subr.bf16.mxu1 %v9303_v15  ;;  %v8835_v32 = vpack.c.bf16 %v12989_v11, %v12988_v28  ;;  %v8841_v17 = vpack.c.bf16 %v12993_v18, %v12992_v53  ;;  %v8850_v4 = vpack.c.bf16 %v12999_v13, %v12998_v8  ;;  %v6211_v28 = vsub.f32 %v11714_v26, %v6210_v51 }
 0x5ee   :  { %v6218_v11 = vsub.f32 %v11716_v49, %v6217_v63  ;;  %v6225_v53 = vsub.f32 %v11718_v25, %v6224_v23  ;;  %v6232_v18 = vsub.f32 %v11722_v20, %v6231_v43  ;;  %v6246_v8 = vsub.f32 %v11728_v52, %v6245_v21 }
 0x5f0   :  { %8833 = vmatpush3.bf16.msra.mxu1 %v8832_v41  ;;  %v6226_v58 = vand.u32 4294901760, %v6225_v53  ;;  %v6233_v24 = vand.u32 4294901760, %v6232_v18 }
 0x5f1   :  { %8834 = vmatprep.subr.bf16.mxu1 %v9303_v15 }
 0x5f2   :  { %v11866_v1 = vpack.c.bf16 %v6233_v24, %v6226_v58 }
 0x5f4   :  { %8836 = vmatpush3.bf16.msra.mxu1 %v8835_v32  ;;  %v6212_v32 = vand.u32 4294901760, %v6211_v28 }
 0x5f5   :  { %8837 = vmatprep.subr.bf16.mxu1 %v9303_v15 }
 0x5f8   :  { %8839 = vmatpush3.bf16.msra.mxu1 %v8838_v33  ;;  %v6219_v33 = vand.u32 4294901760, %v6218_v11  ;;  %v12420_v11 = vand.u32 4294901760, %v11833_v57 }
 0x5f9   :  { %8840 = vmatprep.subr.bf16.mxu1 %v9303_v15 }
 0x5fa   :  { %v6288_v53 = vsub.f32 %v11833_v57, %v12420_v11 }
 0x5fc   :  { %8842 = vmatpush3.bf16.msra.mxu1 %v8841_v17  ;;  %v11862_v17 = vpack.c.bf16 %v6219_v33, %v6212_v32  ;;  %v6289_v58 = vand.u32 4294901760, %v6288_v53 }
 0x5fd   :  { %8843 = vmatprep.subr.bf16.mxu1 %v9303_v15 }
 0x600   :  { %8845 = vmatpush3.bf16.msra.mxu1 %v8844_v2  ;;  %v6238_v2 = vand.u32 4294901760, %v11724_v40 }
 0x601   :  { %8846 = vmatprep.subr.bf16.mxu1 %v9303_v15 }
 0x604   :  { %8848 = vmatpush3.bf16.msra.mxu1 %v8847_v29  ;;  %v6239_v29 = vsub.f32 %v11724_v40, %v6238_v2 }
 0x605   :  { %8849 = vmatprep.subr.bf16.mxu1 %v9303_v15 }
 0x606   :  { %v6240_v13 = vand.u32 4294901760, %v6239_v29 }
 0x608   :  { %8851 = vmatpush3.bf16.msra.mxu1 %v8850_v4  ;;  %v6247_v4 = vand.u32 4294901760, %v6246_v8 }
 0x609   :  { %8852 = vmatprep.subr.bf16.mxu1 %v9303_v15 }
 0x60b   :  { %7525 = vmatmul.mubr.f32.vlgmr.msra.gmra.mrb[10].mxu1 %v11635_v56 }
 0x60c   :  { %8854 = vmatpush3.bf16.msra.mxu1 %v11441_v14  ;;  %7559 = vmatprep.mubr.msk.f32.mxu1 %vm9304_vm8, %v12760_v22 }
 0x60d   :  { %8855 = vmatprep.subr.bf16.mxu1 %v9303_v15 }
 0x610   :  { %8857 = vmatpush3.bf16.msra.mxu1 %v11447_v39 }
 0x611   :  { %8858 = vmatprep.subr.bf16.mxu1 %v9303_v15 }
 0x614   :  { %8860 = vmatpush3.bf16.msra.mxu1 %v11459_v12 }
 0x615   :  { %8861 = vmatprep.subr.bf16.mxu1 %v9303_v15 }
 0x618   :  { %8863 = vmatpush3.bf16.msra.mxu1 %v11469_v60  ;;  %v6103_v60 = vld [vmem:[#allocation9 + $0x3c0] sm:$0xff] }
 0x619   :  { %8864 = vmatprep.subr.bf16.mxu1 %v9303_v15  ;;  %v6147_v48 = vand.u32 4294901760, %v6103_v60 }
 0x61b   :  { %v11822_v27 = vpack.c.bf16 %v6150_v7, %v6147_v48  ;;  %v11831_v61 = vsub.f32 %v6103_v60, %v6147_v48  ;;  %v8907_v60 = vpack.c.bf16 %v6247_v4, %v6240_v13 }
 0x61c   :  { %8866 = vmatpush3.bf16.msra.mxu1 %v11486_v10  ;;  %v6105_v10 = vld [vmem:[#allocation9 + $0x470] sm:$0xff] }
 0x61d   :  { %8867 = vmatprep.subr.bf16.mxu1 %v9303_v15  ;;  %8893 = vmatpush3.bf16.msra.mxu0 %v11822_v27  ;;  %v6153_v16 = vand.u32 4294901760, %v6105_v10  ;;  %v12421_v28 = vand.u32 4294901760, %v11831_v61 }
 0x61e   :  { %8894 = vmatprep.subr.bf16.mxu0 %v9303_v15 }
 0x61f   :  { %v11835_v31 = vsub.f32 %v6105_v10, %v6153_v16  ;;  %v6281_v33 = vsub.f32 %v11831_v61, %v12421_v28 }
 0x620   :  { %8869 = vmatpush3.bf16.msra.mxu1 %v11498_v42  ;;  %v6156_v42 = vand.u32 4294901760, %v6106_v55 }
 0x621   :  { %8870 = vmatprep.subr.bf16.mxu1 %v9303_v15  ;;  %v6282_v18 = vand.u32 4294901760, %v6281_v33  ;;  %v12419_v24 = vand.u32 4294901760, %v11835_v31 }
 0x622   :  { %v11837_v50 = vsub.f32 %v6106_v55, %v6156_v42  ;;  %v12423_v55 = vand.u32 4294901760, %v11736_v47 }
 0x623   :  { %v8916_v8 = vpack.c.bf16 %v6289_v58, %v6282_v18  ;;  %v6295_v13 = vsub.f32 %v11835_v31, %v12419_v24  ;;  %v8925_v18 = vpack.c.bf16 %v11716_v49, %v11714_v26  ;;  %v8928_v58 = vpack.c.bf16 %v11722_v20, %v11718_v25 }
 0x624   :  { %8872 = vmatpush3.bf16.msra.mxu1 %v11502_v35  ;;  %v11826_v35 = vpack.c.bf16 %v6156_v42, %v6153_v16  ;;  %v12422_v16 = vand.u32 4294901760, %v11738_v34  ;;  %v12418_v29 = vand.u32 4294901760, %v11837_v50  ;;  %v13001_v26 = vand.u32 4294901760, %v11732_v0 }
 0x625   :  { %8873 = vmatprep.subr.bf16.mxu1 %v9303_v15  ;;  %v13002_v49 = vand.u32 4294901760, %v11734_v59  ;;  %v13003_v20 = vand.u32 4294901760, %v11736_v47 }
 0x626   :  { %8896 = vmatpush3.bf16.msra.mxu0 %v11826_v35  ;;  %v6302_v4 = vsub.f32 %v11837_v50, %v12418_v29 }
 0x627   :  { %8897 = vmatprep.subr.bf16.mxu0 %v9303_v15  ;;  %v8982_v25 = vpack.c.bf16 %v13002_v49, %v13001_v26 }
 0x628   :  { %8875 = vmatpush3.bf16.msra.mxu1 %v11506_v19  ;;  %v6107_v19 = vld [vmem:[#allocation9 + $0x520] sm:$0xff] }
 0x62b   :  { %7560 = vmatmul.mubr.f32.vlgmr.msra.gmra.mrb[10].mxu1 %v11635_v56  ;;  %v6159_v56 = vand.u32 4294901760, %v6107_v19 }
 0x62d   :  { %v11842_v38 = vsub.f32 %v6107_v19, %v6159_v56  ;;  %v6267_v19 = vsub.f32 %v11736_v47, %v12423_v55 }
 0x65e   :  { %v5538_v14 = vpop.f32.mrb[8].mxu1 }
 0x65f   :  { %v11820_v39 = vadd.f32 %v5538_v14, %v11624_v6  ;;  %v7386_v12 = vpop.f32.mrb[9].mxu1  ;;  %v6108_v6 = vld [vmem:[#allocation9 + $0x578] sm:$0xff]  ;;  %v12425_v14 = vand.u32 4294901760, %v11732_v0 }
 0x660   :  { %v6162_v37 = vand.u32 4294901760, %v6108_v6  ;;  %v12424_v12 = vand.u32 4294901760, %v11734_v59 }
 0x661   :  { %v6253_v54 = vsub.f32 %v11732_v0, %v12425_v14 }
 0x662   :  { %v11840_v5 = vpack.c.bf16 %v6162_v37, %v6159_v56  ;;  %v11844_v41 = vsub.f32 %v6108_v6, %v6162_v37  ;;  %v6260_v48 = vsub.f32 %v11734_v59, %v12424_v12  ;;  %v6274_v6 = vsub.f32 %v11738_v34, %v12422_v16 }
 0x663   :  { %v6254_v7 = vand.u32 4294901760, %v6253_v54  ;;  %v6268_v56 = vand.u32 4294901760, %v6267_v19  ;;  %v6296_v54 = vand.u32 4294901760, %v6295_v13  ;;  %v8931_v13 = vpack.c.bf16 %v11728_v52, %v11724_v40 }
 0x664   :  { %8899 = vmatpush3.bf16.msra.mxu0 %v11840_v5  ;;  %v6261_v10 = vand.u32 4294901760, %v6260_v48  ;;  %v6275_v37 = vand.u32 4294901760, %v6274_v6  ;;  %v6303_v48 = vand.u32 4294901760, %v6302_v4  ;;  %v8934_v4 = vpack.c.bf16 %v11734_v59, %v11732_v0 }
 0x665   :  { %8900 = vmatprep.subr.bf16.mxu0 %v9303_v15  ;;  %v13005_v40 = vand.u32 4294901760, %v11831_v61  ;;  %v13006_v52 = vand.u32 4294901760, %v11833_v57  ;;  %v13007_v0 = vand.u32 4294901760, %v11835_v31  ;;  %v13008_v59 = vand.u32 4294901760, %v11837_v50 }
 0x666   :  { %v8910_v42 = vpack.c.bf16 %v6261_v10, %v6254_v7  ;;  %v8913_v32 = vpack.c.bf16 %v6275_v37, %v6268_v56  ;;  %v12417_v7 = vand.u32 4294901760, %v11842_v38  ;;  %v12416_v10 = vand.u32 4294901760, %v11844_v41 }
 0x667   :  { %v8919_v19 = vpack.c.bf16 %v6303_v48, %v6296_v54  ;;  %v8937_v54 = vpack.c.bf16 %v11738_v34, %v11736_v47  ;;  %v8940_v48 = vpack.c.bf16 %v11833_v57, %v11831_v61  ;;  %v8991_v23 = vpack.c.bf16 %v13008_v59, %v13007_v0 }
 0x668   :  { %v6309_v6 = vsub.f32 %v11842_v38, %v12417_v7  ;;  %v6316_v56 = vsub.f32 %v11844_v41, %v12416_v10  ;;  %v13000_v10 = vld [vmem:[#allocation57_spill] sm:$0xff]  ;;  %v13009_v47 = vand.u32 4294901760, %v11842_v38 }
 0x66a   :  { %v6310_v37 = vand.u32 4294901760, %v6309_v6  ;;  %v6317_v33 = vand.u32 4294901760, %v6316_v56  ;;  %v8943_v6 = vpack.c.bf16 %v11837_v50, %v11835_v31  ;;  %v8946_v56 = vpack.c.bf16 %v11844_v41, %v11842_v38 }
 0x66c   :  { %v8922_v53 = vpack.c.bf16 %v6317_v33, %v6310_v37  ;;  %v1895_v37 = vrot.slane %v11610_v62, %v158_v30  ;;  %v8973_v62 = vpack.c.bf16 %v6217_v63, %v6210_v51  ;;  %v8979_v30 = vpack.c.bf16 %v6245_v21, %v6238_v2 }
 0x66d   :  { %v8988_v63 = vpack.c.bf16 %v13006_v52, %v13005_v40 }
 0x66e   :  { %v9029_v7 = vadd.f32 %v13000_v10, %v1895_v37 }
 0x6fe   :  { %v6088_v33 = vpop.f32.mrb[10].mxu1 }
 0x6ff   :  { %v9032_v29 = vadd.f32 %v6088_v33, %v11820_v39  ;;  %v7561_v24 = vpop.f32.mrb[11].mxu1  ;;  %v13004_v39 = vand.u32 4294901760, %v11738_v34  ;;  %v13010_v34 = vand.u32 4294901760, %v11844_v41 }
 0x701   :  { %v6092_v11 = vadd.f32 %v9032_v29, %v9029_v7  ;;  %v8985_v51 = vpack.c.bf16 %v13004_v39, %v13003_v20  ;;  %v8994_v43 = vpack.c.bf16 %v13010_v34, %v13009_v47 }
 0x703   :  { %v11935_v28 = vand.u32 4294901760, %v6092_v11 }
 0x705   :  { %v6198_v16 = vsub.f32 %v6092_v11, %v11935_v28 }
 0x707   :  { %v6199_v55 = vand.u32 4294901760, %v6198_v16 }
 0x709   :  { %v6200_v12 = vsub.f32 %v6198_v16, %v6199_v55 }
 0x70b   :  { %v6201_v14 = vand.u32 4294901760, %v6200_v12 }
 0x70d   :  { %7595 = vmatmul.mubr.f32.vlgmr.msra.gmra.mrb[6].mxu0 %v6201_v14 }
 0x70e   :  { %8902 = vmatpush3.bf16.msra.mxu0 %v11862_v17  ;;  %7629 = vmatprep.mubr.msk.f32.mxu0 %vm9304_vm8, %v12760_v22 }
 0x70f   :  { %8903 = vmatprep.subr.bf16.mxu0 %v9303_v15 }
 0x712   :  { %8905 = vmatpush3.bf16.msra.mxu0 %v11866_v1 }
 0x713   :  { %8906 = vmatprep.subr.bf16.mxu0 %v9303_v15 }
 0x716   :  { %8908 = vmatpush3.bf16.msra.mxu0 %v8907_v60 }
 0x717   :  { %8909 = vmatprep.subr.bf16.mxu0 %v9303_v15 }
 0x71a   :  { %8911 = vmatpush3.bf16.msra.mxu0 %v8910_v42 }
 0x71b   :  { %8912 = vmatprep.subr.bf16.mxu0 %v9303_v15 }
 0x71e   :  { %8914 = vmatpush3.bf16.msra.mxu0 %v8913_v32 }
 0x71f   :  { %8915 = vmatprep.subr.bf16.mxu0 %v9303_v15 }
 0x722   :  { %8917 = vmatpush3.bf16.msra.mxu0 %v8916_v8 }
 0x723   :  { %8918 = vmatprep.subr.bf16.mxu0 %v9303_v15 }
 0x726   :  { %8920 = vmatpush3.bf16.msra.mxu0 %v8919_v19 }
 0x727   :  { %8921 = vmatprep.subr.bf16.mxu0 %v9303_v15 }
 0x72a   :  { %8923 = vmatpush3.bf16.msra.mxu0 %v8922_v53 }
 0x72b   :  { %8924 = vmatprep.subr.bf16.mxu0 %v9303_v15 }
 0x72d   :  { %7630 = vmatmul.mubr.f32.vlgmr.msra.gmra.mrb[6].mxu0 %v11935_v28 }
 0x72e   :  { %8926 = vmatpush3.bf16.msra.mxu0 %v8925_v18  ;;  %7664 = vmatprep.mubr.msk.f32.mxu0 %vm9304_vm8, %v12760_v22 }
 0x72f   :  { %8927 = vmatprep.subr.bf16.mxu0 %v9303_v15 }
 0x732   :  { %8929 = vmatpush3.bf16.msra.mxu0 %v8928_v58 }
 0x733   :  { %8930 = vmatprep.subr.bf16.mxu0 %v9303_v15 }
 0x736   :  { %8932 = vmatpush3.bf16.msra.mxu0 %v8931_v13 }
 0x737   :  { %8933 = vmatprep.subr.bf16.mxu0 %v9303_v15 }
 0x73a   :  { %8935 = vmatpush3.bf16.msra.mxu0 %v8934_v4 }
 0x73b   :  { %8936 = vmatprep.subr.bf16.mxu0 %v9303_v15 }
 0x73e   :  { %8938 = vmatpush3.bf16.msra.mxu0 %v8937_v54 }
 0x73f   :  { %8939 = vmatprep.subr.bf16.mxu0 %v9303_v15 }
 0x742   :  { %8941 = vmatpush3.bf16.msra.mxu0 %v8940_v48 }
 0x743   :  { %8942 = vmatprep.subr.bf16.mxu0 %v9303_v15 }
 0x746   :  { %8944 = vmatpush3.bf16.msra.mxu0 %v8943_v6 }
 0x747   :  { %8945 = vmatprep.subr.bf16.mxu0 %v9303_v15 }
 0x74a   :  { %8947 = vmatpush3.bf16.msra.mxu0 %v8946_v56 }
 0x74b   :  { %8948 = vmatprep.subr.bf16.mxu0 %v9303_v15 }
 0x74d   :  { %7665 = vmatmul.mubr.f32.vlgmr.msra.gmra.mrb[6].mxu0 %v6198_v16 }
 0x74e   :  { %8950 = vmatpush3.bf16.msra.mxu0 %v11712_v45  ;;  %7699 = vmatprep.mubr.msk.f32.mxu0 %vm9304_vm8, %v12760_v22 }
 0x74f   :  { %8951 = vmatprep.subr.bf16.mxu0 %v9303_v15 }
 0x752   :  { %8953 = vmatpush3.bf16.msra.mxu0 %v11720_v9 }
 0x753   :  { %8954 = vmatprep.subr.bf16.mxu0 %v9303_v15 }
 0x756   :  { %8956 = vmatpush3.bf16.msra.mxu0 %v11748_v46 }
 0x757   :  { %8957 = vmatprep.subr.bf16.mxu0 %v9303_v15 }
 0x75a   :  { %8959 = vmatpush3.bf16.msra.mxu0 %v11760_v36 }
 0x75b   :  { %8960 = vmatprep.subr.bf16.mxu0 %v9303_v15 }
 0x75e   :  { %8962 = vmatpush3.bf16.msra.mxu0 %v11769_v3 }
 0x75f   :  { %8963 = vmatprep.subr.bf16.mxu0 %v9303_v15 }
 0x762   :  { %8965 = vmatpush3.bf16.msra.mxu0 %v11822_v27 }
 0x763   :  { %8966 = vmatprep.subr.bf16.mxu0 %v9303_v15 }
 0x766   :  { %8968 = vmatpush3.bf16.msra.mxu0 %v11826_v35 }
 0x767   :  { %8969 = vmatprep.subr.bf16.mxu0 %v9303_v15 }
 0x76a   :  { %8971 = vmatpush3.bf16.msra.mxu0 %v11840_v5 }
 0x76b   :  { %8972 = vmatprep.subr.bf16.mxu0 %v9303_v15 }
 0x76d   :  { %7700 = vmatmul.mubr.f32.vlgmr.msra.gmra.mrb[6].mxu0 %v6199_v55 }
 0x76e   :  { %8974 = vmatpush3.bf16.msra.mxu0 %v8973_v62  ;;  %7734 = vmatprep.mubr.msk.f32.mxu0 %vm9304_vm8, %v12760_v22 }
 0x76f   :  { %8975 = vmatprep.subr.bf16.mxu0 %v9303_v15 }
 0x772   :  { %8977 = vmatpush3.bf16.msra.mxu0 %v8976_v44 }
 0x773   :  { %8978 = vmatprep.subr.bf16.mxu0 %v9303_v15 }
 0x776   :  { %8980 = vmatpush3.bf16.msra.mxu0 %v8979_v30 }
 0x777   :  { %8981 = vmatprep.subr.bf16.mxu0 %v9303_v15 }
 0x77a   :  { %8983 = vmatpush3.bf16.msra.mxu0 %v8982_v25 }
 0x77b   :  { %8984 = vmatprep.subr.bf16.mxu0 %v9303_v15 }
 0x77e   :  { %8986 = vmatpush3.bf16.msra.mxu0 %v8985_v51 }
 0x77f   :  { %8987 = vmatprep.subr.bf16.mxu0 %v9303_v15 }
 0x782   :  { %8989 = vmatpush3.bf16.msra.mxu0 %v8988_v63 }
 0x783   :  { %8990 = vmatprep.subr.bf16.mxu0 %v9303_v15 }
 0x786   :  { %8992 = vmatpush3.bf16.msra.mxu0 %v8991_v23 }
 0x787   :  { %8993 = vmatprep.subr.bf16.mxu0 %v9303_v15 }
 0x78a   :  { %8995 = vmatpush3.bf16.msra.mxu0 %v8994_v43 }
 0x78b   :  { %8996 = vmatprep.subr.bf16.mxu0 %v9303_v15 }
 0x78d   :  { %7735 = vmatmul.mubr.f32.vlgmr.msra.gmra.mrb[6].mxu0 %v11935_v28 }
 0x78e   :  { %8998 = vmatpush3.bf16.msra.mxu0 %v11712_v45  ;;  %7769 = vmatprep.mubr.msk.f32.mxu0 %vm9304_vm8, %v12760_v22  ;;  %v6829_v22 = vld [vmem:[%s12060_s5 + $0x8] ss:$0 sm:$0xff] }
 0x78f   :  { %8999 = vmatprep.subr.bf16.mxu0 %v9303_v15 }
 0x792   :  { %9001 = vmatpush3.bf16.msra.mxu0 %v11720_v9 }
 0x793   :  { %9002 = vmatprep.subr.bf16.mxu0 %v9303_v15 }
 0x796   :  { %9004 = vmatpush3.bf16.msra.mxu0 %v11748_v46 }
 0x797   :  { %9005 = vmatprep.subr.bf16.mxu0 %v9303_v15 }
 0x79a   :  { %9007 = vmatpush3.bf16.msra.mxu0 %v11760_v36 }
 0x79b   :  { %9008 = vmatprep.subr.bf16.mxu0 %v9303_v15 }
 0x79e   :  { %9010 = vmatpush3.bf16.msra.mxu0 %v11769_v3 }
 0x79f   :  { %9011 = vmatprep.subr.bf16.mxu0 %v9303_v15 }
 0x7a2   :  { %9013 = vmatpush3.bf16.msra.mxu0 %v11822_v27 }
 0x7a3   :  { %9014 = vmatprep.subr.bf16.mxu0 %v9303_v15 }
 0x7a6   :  { %9016 = vmatpush3.bf16.msra.mxu0 %v11826_v35 }
 0x7a7   :  { %9017 = vmatprep.subr.bf16.mxu0 %v9303_v15 }
 0x7aa   :  { %9019 = vmatpush3.bf16.msra.mxu0 %v11840_v5 }
 0x7ad   :  { %7770 = vmatmul.mubr.f32.vlgmr.msra.gmra.mrb[6].mxu0 %v11935_v28 }
 0x880   :  { %v6753_v45 = vpop.f32.mrb[6].mxu0 }
 0x881   :  { %v9033_v9 = vadd.f32 %v6829_v22, %v6753_v45  ;;  %v7771_v46 = vpop.f32.mrb[7].mxu0 }
 0x883   :  { %6758 = vst [vmem:[#allocation12 + $0x2] sm:$0x3] %v9033_v9 }
 0x884   :  { %9269 = shalt.err (!%p9266_p8)
}
 0x885   :  { %s9270_s18 = scalar_lea.hbm %s12061_s6, 96 }
 0x886   :  { %p9271_p9 = scmp.ne.s32.totalorder %s12061_s6, %s9270_s18  ;;  %p9274_p10 = scmp.lt.u32.totalorder %s9270_s18, %s12061_s6 }
 0x888   :  { %p9276_p11 = pnand %p9274_p10, %p9271_p9 }
 0x88a   :  { %9279 = shalt.err (!%p9276_p11)
}
 0x88b   :  { %6818 = dma.vmem_to_hbm [thread:$0]  %s6816_s13, 96, %s12061_s6, [#allocation6]  }
 0x88c   :  { %9286 = dma.done.wait [#allocation6], 96  }
 0x88d   :  { %9287 = vsyncadd [#allocation6], 4294967200 }
 0x88e   :  { %6822 = vsyncpa [#allocation5], 1 }
 0x88f   :  { %6823 = vsyncpa [#allocation8], 1 }
 0x890   :  { %6824 = vsyncpa [#allocation11], 1 }
 0x891   :  { %6825 = vsyncpa [#allocation6], 1 }

</bundles_post_ra>
